<compile_context>
chip_gen: v7x
topology: tpu7x:2x2x1
jax: 0.10.0
libtpu: 0.0.40
codegen_flags: <defaults>
</compile_context>

<pallas_src>
import functools

import jax
import jax.numpy as jnp
from jax.experimental import pallas as pl
from jax.experimental.pallas import tpu as pltpu


VMEM_LIMIT_BYTES = 48 * 1024 * 1024  # <= v7x's 64 MiB/TC; far above actual tile usage


def _round_up(x, m):
    return (x + m - 1) // m * m


# --------------------------------------------------------------------------
# Pallas kernel: tiled  (X @ W) * scale + bias  [+ ReLU]   (bf16 in, f32 acc)
# --------------------------------------------------------------------------
def _gemm_bn_act_kernel(x_ref, w_ref, scale_ref, bias_ref, o_ref, acc_ref, *, apply_relu):
    k = pl.program_id(1)

    @pl.when(k == 0)
    def _():
        acc_ref[...] = jnp.zeros_like(acc_ref)

    acc_ref[...] += jnp.dot(x_ref[...], w_ref[...], preferred_element_type=jnp.float32)

    @pl.when(k == pl.num_programs(1) - 1)
    def _():
        y = acc_ref[...] * scale_ref[...] + bias_ref[...]
        if apply_relu:
            y = jnp.maximum(y, 0.0)
        o_ref[...] = y.astype(o_ref.dtype)


def gemm_bn_act(x, w, scale, bias, *, apply_relu, out_dtype=jnp.bfloat16, tile_m=256):
    """x: (M,K), w: (K,N), scale/bias: (N,) -> (M,N). bf16 operands, f32 accumulate."""
    M, K = x.shape
    K2, N = w.shape
    assert K == K2
    x = x.astype(jnp.bfloat16)
    w = w.astype(jnp.bfloat16)
    scale = scale.reshape(1, N).astype(jnp.float32)
    bias = bias.reshape(1, N).astype(jnp.float32)

    tm = min(tile_m, _round_up(M, 8))
    # Only K-tile when K splits exactly (avoids garbage in padded K blocks).
    tk = 512 if (K > 512 and K % 512 == 0) else K
    grid = (pl.cdiv(M, tm), K // tk)

    kernel = functools.partial(_gemm_bn_act_kernel, apply_relu=apply_relu)
    return pl.pallas_call(
        kernel,
        out_shape=jax.ShapeDtypeStruct((M, N), out_dtype),
        grid=grid,
        in_specs=[
            pl.BlockSpec((tm, tk), lambda i, k: (i, k)),
            pl.BlockSpec((tk, N), lambda i, k: (k, 0)),
            pl.BlockSpec((1, N), lambda i, k: (0, 0)),
            pl.BlockSpec((1, N), lambda i, k: (0, 0)),
        ],
        out_specs=pl.BlockSpec((tm, N), lambda i, k: (i, 0)),
        scratch_shapes=[pltpu.VMEM((tm, N), jnp.float32)],
        compiler_params=pltpu.CompilerParams(
            dimension_semantics=("parallel", "arbitrary"),
            vmem_limit_bytes=VMEM_LIMIT_BYTES,
        ),
    )(x, w, scale, bias)


# --------------------------------------------------------------------------
# Pallas kernel: fused FC head  relu(flat @ W1 + b1) @ W2 + b2
# K-tiled over the 4096-wide fc1 contraction; fc2 computed in the epilogue.
# --------------------------------------------------------------------------
def _fc_head_kernel(x_ref, w1_ref, b1_ref, w2_ref, b2_ref, o_ref, acc_ref):
    k = pl.program_id(0)

    @pl.when(k == 0)
    def _():
        acc_ref[...] = jnp.zeros_like(acc_ref)

    acc_ref[...] += jnp.dot(x_ref[...], w1_ref[...], preferred_element_type=jnp.float32)

    @pl.when(k == pl.num_programs(0) - 1)
    def _():
        h = jnp.maximum(acc_ref[...] + b1_ref[...], 0.0)
        q = jnp.dot(h.astype(jnp.bfloat16), w2_ref[...], preferred_element_type=jnp.float32)
        o_ref[...] = (q + b2_ref[...]).astype(o_ref.dtype)


def fc_head(flat, w1, b1, w2, b2, *, tile_k=512):
    """flat: (B, K), w1: (K, H), w2: (H, A) -> (B, A) f32 Q-values."""
    B, K = flat.shape
    K2, H = w1.shape
    H2, A = w2.shape
    assert K == K2 and H == H2
    flat = flat.astype(jnp.bfloat16)
    w1 = w1.astype(jnp.bfloat16)
    w2 = w2.astype(jnp.bfloat16)
    b1 = b1.reshape(1, H).astype(jnp.float32)
    b2 = b2.reshape(1, A).astype(jnp.float32)

    tk = tile_k if (K % tile_k == 0) else K
    grid = (K // tk,)

    return pl.pallas_call(
        _fc_head_kernel,
        out_shape=jax.ShapeDtypeStruct((B, A), jnp.float32),
        grid=grid,
        in_specs=[
            pl.BlockSpec((B, tk), lambda k: (0, k)),
            pl.BlockSpec((tk, H), lambda k: (k, 0)),
            pl.BlockSpec((1, H), lambda k: (0, 0)),
            pl.BlockSpec((H, A), lambda k: (0, 0)),
            pl.BlockSpec((1, A), lambda k: (0, 0)),
        ],
        out_specs=pl.BlockSpec((B, A), lambda k: (0, 0)),
        scratch_shapes=[pltpu.VMEM((B, H), jnp.float32)],
        compiler_params=pltpu.CompilerParams(
            dimension_semantics=("arbitrary",),
            vmem_limit_bytes=VMEM_LIMIT_BYTES,
        ),
    )(flat, w1, b1, w2, b2)


# --------------------------------------------------------------------------
# Glue: NHWC patch extraction (no per-layer layout transposes)
# --------------------------------------------------------------------------
def im2col_nhwc(x, kh, kw, stride):
    """x: (B, H, W, C) -> (B*OH*OW, kh*kw*C) patches, flattened in (kh, kw, c) order."""
    B, H, W, C = x.shape
    OH = (H - kh) // stride + 1
    OW = (W - kw) // stride + 1
    taps = []
    for i in range(kh):
        for j in range(kw):
            taps.append(x[:, i:i + stride * OH:stride, j:j + stride * OW:stride, :])
    p = jnp.stack(taps, axis=3)                      # (B, OH, OW, kh*kw, C)
    return p.reshape(B * OH * OW, kh * kw * C), OH, OW


def conv_bn_relu_nhwc(x, conv_w, conv_b, bn_gamma, bn_beta, bn_mean, bn_var, stride, eps=1e-5):
    """Conv2d (valid) + BatchNorm2d (eval stats) + ReLU on NHWC activations."""
    OC, IC, KH, KW = conv_w.shape
    B = x.shape[0]
    patches, OH, OW = im2col_nhwc(x, KH, KW, stride)                 # (B*OH*OW, KH*KW*IC)
    w_mat = conv_w.transpose(2, 3, 1, 0).reshape(KH * KW * IC, OC)   # (kh,kw,ic) -> oc
    scale = bn_gamma / jnp.sqrt(bn_var + eps)                        # (OC,)
    bias = scale * (conv_b - bn_mean) + bn_beta                      # (OC,)
    out = gemm_bn_act(patches, w_mat, scale, bias, apply_relu=True)  # (B*OH*OW, OC) bf16
    return out.reshape(B, OH, OW, OC)


# --------------------------------------------------------------------------
# DQN parameters (deterministic init) and forward
# --------------------------------------------------------------------------
def init_dqn_params(n_actions, input_channels=1, key=None):
    if key is None:
        key = jax.random.PRNGKey(42)
    ks = jax.random.split(key, 10)

    def rnd(k, shape, std=0.05):
        return jax.random.normal(k, shape, dtype=jnp.float32) * std

    p = {}
    # conv1: Conv2d(input_channels, 32, kernel_size=8, stride=4)
    p["w1"] = rnd(ks[0], (32, input_channels, 8, 8))
    p["b1"] = rnd(ks[1], (32,))
    # conv2: Conv2d(32, 64, kernel_size=4, stride=2)
    p["w2"] = rnd(ks[2], (64, 32, 4, 4))
    p["b2"] = rnd(ks[3], (64,))
    # conv3: Conv2d(64, 64, kernel_size=3, stride=1)
    p["w3"] = rnd(ks[4], (64, 64, 3, 3))
    p["b3"] = rnd(ks[5], (64,))
    # BatchNorm2d params (default init, eval-mode running stats)
    for i, c in zip((1, 2, 3), (32, 64, 64)):
        p[f"bn{i}_gamma"] = jnp.ones((c,), jnp.float32)
        p[f"bn{i}_beta"] = jnp.zeros((c,), jnp.float32)
        p[f"bn{i}_mean"] = jnp.zeros((c,), jnp.float32)
        p[f"bn{i}_var"] = jnp.ones((c,), jnp.float32)
    # fc_input_dim for 96x96 input: 96 -> 23 -> 10 -> 8 ; 64*8*8 = 4096
    fc_in = 64 * 8 * 8
    # fc1: Linear(4096, 512); fc2: Linear(512, n_actions)   (PyTorch weight is (out, in))
    p["fc1_w"] = rnd(ks[6], (512, fc_in), std=0.02)
    p["fc1_b"] = rnd(ks[7], (512,), std=0.02)
    p["fc2_w"] = rnd(ks[8], (n_actions, 512), std=0.02)
    p["fc2_b"] = rnd(ks[9], (n_actions,), std=0.02)
    return p


def dqn_forward(params, x):
    """x: (B, input_channels, 96, 96) NCHW float32 -> (B, n_actions) float32."""
    p = params
    # Single NCHW -> NHWC transpose at the model boundary; bf16 downstream.
    h = jnp.transpose(x, (0, 2, 3, 1)).astype(jnp.bfloat16)
    h = conv_bn_relu_nhwc(h, p["w1"], p["b1"], p["bn1_gamma"], p["bn1_beta"],
                          p["bn1_mean"], p["bn1_var"], stride=4)
    h = conv_bn_relu_nhwc(h, p["w2"], p["b2"], p["bn2_gamma"], p["bn2_beta"],
                          p["bn2_mean"], p["bn2_var"], stride=2)
    h = conv_bn_relu_nhwc(h, p["w3"], p["b3"], p["bn3_gamma"], p["bn3_beta"],
                          p["bn3_mean"], p["bn3_var"], stride=1)
    B, OH, OW, OC = h.shape
    flat = h.reshape(B, OH * OW * OC)                 # NHWC flatten: (h, w, c) order
    # PyTorch flattens NCHW as (c, h, w); permute fc1's columns once to compensate.
    fc1_w = p["fc1_w"].reshape(-1, OC, OH, OW).transpose(0, 2, 3, 1).reshape(-1, OC * OH * OW)
    w1_mat = fc1_w.T                                  # (4096, 512)
    w2_mat = p["fc2_w"].T                             # (512, n_actions)
    return fc_head(flat, w1_mat, p["fc1_b"], w2_mat, p["fc2_b"])


if __name__ == "__main__":
    n_actions = 4
    input_channels = 1
    batch = 2

    params = init_dqn_params(n_actions, input_channels)

    key = jax.random.PRNGKey(0)
    # The module hard-codes 96x96 spatial input (fc_input_dim derived from it).
    x = jax.random.normal(key, (batch, input_channels, 96, 96), dtype=jnp.float32)

    fwd = jax.jit(dqn_forward)
    q_values = fwd(params, x)
    jax.block_until_ready(q_values)

    assert q_values.shape == (batch, n_actions), q_values.shape
    assert bool(jnp.all(jnp.isfinite(q_values))), "non-finite Q-values"
    print("KERNEL_OK")
</pallas_src>

<mosaic_0001>
module attributes {stable_mosaic.version = 11 : i64} {
  func.func @_gemm_bn_act_kernel(%arg0: i32, %arg1: i32, %arg2: memref<256x64xbf16, #tpu.memory_space<vmem>>, %arg3: memref<64x32xbf16, #tpu.memory_space<vmem>>, %arg4: memref<1x32xf32, #tpu.memory_space<vmem>>, %arg5: memref<1x32xf32, #tpu.memory_space<vmem>>, %arg6: memref<256x32xbf16, #tpu.memory_space<vmem>>, %arg7: memref<256x32xf32, #tpu.memory_space<vmem>>) attributes {dimension_semantics = [#tpu.dimension_semantics<parallel>, #tpu.dimension_semantics<arbitrary>], iteration_bounds = array<i64: 5, 1>, scalar_prefetch = 0 : i64, scratch_operands = 1 : i64, tpu.core_type = #tpu.core_type<tc>, window_params = [{transform_indices = @transform_0, window_bounds = array<i64: 256, 64>}, {transform_indices = @transform_1, window_bounds = array<i64: 64, 32>}, {pipeline_mode = #tpu.pipeline_mode<synchronous>, transform_indices = @transform_2, window_bounds = array<i64: 1, 32>}, {pipeline_mode = #tpu.pipeline_mode<synchronous>, transform_indices = @transform_3, window_bounds = array<i64: 1, 32>}, {transform_indices = @transform_4, window_bounds = array<i64: 256, 32>}]} {
    %c0_i32 = arith.constant 0 : i32
    %0 = arith.cmpi eq, %arg1, %c0_i32 : i32
    %1 = arith.extui %0 : i1 to i32
    %c0_i32_0 = arith.constant 0 : i32
    %2 = arith.cmpi ne, %1, %c0_i32_0 : i32
    scf.if %2 {
      %cst_10 = arith.constant 0.000000e+00 : f32
      %12 = vector.broadcast %cst_10 : f32 to vector<256x32xf32>
      %c0_11 = arith.constant 0 : index
      %c0_12 = arith.constant 0 : index
      %13 = vector.load %arg7[%c0_11, %c0_12] : memref<256x32xf32, #tpu.memory_space<vmem>>, vector<256x32xf32>
      tpu.vector_store %arg7[%c0_11, %c0_12], %12 {strides = array<i32>} : memref<256x32xf32, #tpu.memory_space<vmem>>, vector<256x32xf32>,
    } else {
    }
    %c0 = arith.constant 0 : index
    %c0_1 = arith.constant 0 : index
    %3 = vector.load %arg7[%c0, %c0_1] : memref<256x32xf32, #tpu.memory_space<vmem>>, vector<256x32xf32>
    %c0_2 = arith.constant 0 : index
    %c0_3 = arith.constant 0 : index
    %4 = vector.load %arg2[%c0_2, %c0_3] : memref<256x64xbf16, #tpu.memory_space<vmem>>, vector<256x64xbf16>
    %c0_4 = arith.constant 0 : index
    %c0_5 = arith.constant 0 : index
    %5 = vector.load %arg3[%c0_4, %c0_5] : memref<64x32xbf16, #tpu.memory_space<vmem>>, vector<64x32xbf16>
    %cst = arith.constant dense<0.000000e+00> : vector<256x32xf32>
    %6 = tpu.matmul %4, %5, %cst {dimension_numbers = #tpu.dot_dimension_numbers<[1], [0], [0], [1], [0, 0, 1, 1], [], []>} : vector<256x64xbf16>, vector<64x32xbf16>, vector<256x32xf32> -> vector<256x32xf32>
    %7 = arith.addf %3, %6 : vector<256x32xf32>
    %c0_6 = arith.constant 0 : index
    %c0_7 = arith.constant 0 : index
    %8 = vector.load %arg7[%c0_6, %c0_7] : memref<256x32xf32, #tpu.memory_space<vmem>>, vector<256x32xf32>
    tpu.vector_store %arg7[%c0_6, %c0_7], %7 {strides = array<i32>} : memref<256x32xf32, #tpu.memory_space<vmem>>, vector<256x32xf32>,
    %c0_i32_8 = arith.constant 0 : i32
    %9 = arith.cmpi eq, %arg1, %c0_i32_8 : i32
    %10 = arith.extui %9 : i1 to i32
    %c0_i32_9 = arith.constant 0 : i32
    %11 = arith.cmpi ne, %10, %c0_i32_9 : i32
    scf.if %11 {
      %c0_10 = arith.constant 0 : index
      %c0_11 = arith.constant 0 : index
      %12 = vector.load %arg7[%c0_10, %c0_11] : memref<256x32xf32, #tpu.memory_space<vmem>>, vector<256x32xf32>
      %c0_12 = arith.constant 0 : index
      %c0_13 = arith.constant 0 : index
      %13 = vector.load %arg4[%c0_12, %c0_13] : memref<1x32xf32, #tpu.memory_space<vmem>>, vector<1x32xf32>
      %14 = vector.broadcast %13 : vector<1x32xf32> to vector<256x32xf32>
      %15 = arith.mulf %12, %14 : vector<256x32xf32>
      %c0_14 = arith.constant 0 : index
      %c0_15 = arith.constant 0 : index
      %16 = vector.load %arg5[%c0_14, %c0_15] : memref<1x32xf32, #tpu.memory_space<vmem>>, vector<1x32xf32>
      %17 = vector.broadcast %16 : vector<1x32xf32> to vector<256x32xf32>
      %18 = arith.addf %15, %17 : vector<256x32xf32>
      %cst_16 = arith.constant 0.000000e+00 : f32
      %19 = vector.broadcast %cst_16 : f32 to vector<256x32xf32>
      %20 = arith.maximumf %18, %19 : vector<256x32xf32>
      %21 = arith.truncf %20 : vector<256x32xf32> to vector<256x32xbf16>
      %c0_17 = arith.constant 0 : index
      %c0_18 = arith.constant 0 : index
      %22 = vector.load %arg6[%c0_17, %c0_18] : memref<256x32xbf16, #tpu.memory_space<vmem>>, vector<256x32xbf16>
      tpu.vector_store %arg6[%c0_17, %c0_18], %21 {strides = array<i32>} : memref<256x32xbf16, #tpu.memory_space<vmem>>, vector<256x32xbf16>,
    } else {
    }
    return
  }
  func.func @transform_0(%arg0: i32, %arg1: i32) -> (i32, i32) {
    %c0_i32 = arith.constant 0 : i32
    return %arg0, %arg1 : i32, i32
  }
  func.func @transform_1(%arg0: i32, %arg1: i32) -> (i32, i32) {
    %c0_i32 = arith.constant 0 : i32
    %c0_i32_0 = arith.constant 0 : i32
    return %arg1, %c0_i32 : i32, i32
  }
  func.func @transform_2(%arg0: i32, %arg1: i32) -> (i32, i32) {
    %c0_i32 = arith.constant 0 : i32
    %c0_i32_0 = arith.constant 0 : i32
    %c0_i32_1 = arith.constant 0 : i32
    return %c0_i32, %c0_i32_0 : i32, i32
  }
  func.func @transform_3(%arg0: i32, %arg1: i32) -> (i32, i32) {
    %c0_i32 = arith.constant 0 : i32
    %c0_i32_0 = arith.constant 0 : i32
    %c0_i32_1 = arith.constant 0 : i32
    return %c0_i32, %c0_i32_0 : i32, i32
  }
  func.func @transform_4(%arg0: i32, %arg1: i32) -> (i32, i32) {
    %c0_i32 = arith.constant 0 : i32
    %c0_i32_0 = arith.constant 0 : i32
    return %arg0, %c0_i32 : i32, i32
  }
}

module attributes {stable_mosaic.version = 11 : i64} {
  func.func @_gemm_bn_act_kernel(%arg0: i32, %arg1: i32, %arg2: memref<200x512xbf16, #tpu.memory_space<vmem>>, %arg3: memref<512x64xbf16, #tpu.memory_space<vmem>>, %arg4: memref<1x64xf32, #tpu.memory_space<vmem>>, %arg5: memref<1x64xf32, #tpu.memory_space<vmem>>, %arg6: memref<200x64xbf16, #tpu.memory_space<vmem>>, %arg7: memref<200x64xf32, #tpu.memory_space<vmem>>) attributes {dimension_semantics = [#tpu.dimension_semantics<parallel>, #tpu.dimension_semantics<arbitrary>], iteration_bounds = array<i64: 1, 1>, scalar_prefetch = 0 : i64, scratch_operands = 1 : i64, tpu.core_type = #tpu.core_type<tc>, window_params = [{transform_indices = @transform_0, window_bounds = array<i64: 200, 512>}, {transform_indices = @transform_1, window_bounds = array<i64: 512, 64>}, {pipeline_mode = #tpu.pipeline_mode<synchronous>, transform_indices = @transform_2, window_bounds = array<i64: 1, 64>}, {pipeline_mode = #tpu.pipeline_mode<synchronous>, transform_indices = @transform_3, window_bounds = array<i64: 1, 64>}, {transform_indices = @transform_4, window_bounds = array<i64: 200, 64>}]} {
    %c0_i32 = arith.constant 0 : i32
    %0 = arith.cmpi eq, %arg1, %c0_i32 : i32
    %1 = arith.extui %0 : i1 to i32
    %c0_i32_0 = arith.constant 0 : i32
    %2 = arith.cmpi ne, %1, %c0_i32_0 : i32
    scf.if %2 {
      %cst_10 = arith.constant 0.000000e+00 : f32
      %12 = vector.broadcast %cst_10 : f32 to vector<200x64xf32>
      %c0_11 = arith.constant 0 : index
      %c0_12 = arith.constant 0 : index
      %13 = vector.load %arg7[%c0_11, %c0_12] : memref<200x64xf32, #tpu.memory_space<vmem>>, vector<200x64xf32>
      tpu.vector_store %arg7[%c0_11, %c0_12], %12 {strides = array<i32>} : memref<200x64xf32, #tpu.memory_space<vmem>>, vector<200x64xf32>,
    } else {
    }
    %c0 = arith.constant 0 : index
    %c0_1 = arith.constant 0 : index
    %3 = vector.load %arg7[%c0, %c0_1] : memref<200x64xf32, #tpu.memory_space<vmem>>, vector<200x64xf32>
    %c0_2 = arith.constant 0 : index
    %c0_3 = arith.constant 0 : index
    %4 = vector.load %arg2[%c0_2, %c0_3] : memref<200x512xbf16, #tpu.memory_space<vmem>>, vector<200x512xbf16>
    %c0_4 = arith.constant 0 : index
    %c0_5 = arith.constant 0 : index
    %5 = vector.load %arg3[%c0_4, %c0_5] : memref<512x64xbf16, #tpu.memory_space<vmem>>, vector<512x64xbf16>
    %cst = arith.constant dense<0.000000e+00> : vector<200x64xf32>
    %6 = tpu.matmul %4, %5, %cst {dimension_numbers = #tpu.dot_dimension_numbers<[1], [0], [0], [1], [0, 0, 1, 1], [], []>} : vector<200x512xbf16>, vector<512x64xbf16>, vector<200x64xf32> -> vector<200x64xf32>
    %7 = arith.addf %3, %6 : vector<200x64xf32>
    %c0_6 = arith.constant 0 : index
    %c0_7 = arith.constant 0 : index
    %8 = vector.load %arg7[%c0_6, %c0_7] : memref<200x64xf32, #tpu.memory_space<vmem>>, vector<200x64xf32>
    tpu.vector_store %arg7[%c0_6, %c0_7], %7 {strides = array<i32>} : memref<200x64xf32, #tpu.memory_space<vmem>>, vector<200x64xf32>,
    %c0_i32_8 = arith.constant 0 : i32
    %9 = arith.cmpi eq, %arg1, %c0_i32_8 : i32
    %10 = arith.extui %9 : i1 to i32
    %c0_i32_9 = arith.constant 0 : i32
    %11 = arith.cmpi ne, %10, %c0_i32_9 : i32
    scf.if %11 {
      %c0_10 = arith.constant 0 : index
      %c0_11 = arith.constant 0 : index
      %12 = vector.load %arg7[%c0_10, %c0_11] : memref<200x64xf32, #tpu.memory_space<vmem>>, vector<200x64xf32>
      %c0_12 = arith.constant 0 : index
      %c0_13 = arith.constant 0 : index
      %13 = vector.load %arg4[%c0_12, %c0_13] : memref<1x64xf32, #tpu.memory_space<vmem>>, vector<1x64xf32>
      %14 = vector.broadcast %13 : vector<1x64xf32> to vector<200x64xf32>
      %15 = arith.mulf %12, %14 : vector<200x64xf32>
      %c0_14 = arith.constant 0 : index
      %c0_15 = arith.constant 0 : index
      %16 = vector.load %arg5[%c0_14, %c0_15] : memref<1x64xf32, #tpu.memory_space<vmem>>, vector<1x64xf32>
      %17 = vector.broadcast %16 : vector<1x64xf32> to vector<200x64xf32>
      %18 = arith.addf %15, %17 : vector<200x64xf32>
      %cst_16 = arith.constant 0.000000e+00 : f32
      %19 = vector.broadcast %cst_16 : f32 to vector<200x64xf32>
      %20 = arith.maximumf %18, %19 : vector<200x64xf32>
      %21 = arith.truncf %20 : vector<200x64xf32> to vector<200x64xbf16>
      %c0_17 = arith.constant 0 : index
      %c0_18 = arith.constant 0 : index
      %22 = vector.load %arg6[%c0_17, %c0_18] : memref<200x64xbf16, #tpu.memory_space<vmem>>, vector<200x64xbf16>
      tpu.vector_store %arg6[%c0_17, %c0_18], %21 {strides = array<i32>} : memref<200x64xbf16, #tpu.memory_space<vmem>>, vector<200x64xbf16>,
    } else {
    }
    return
  }
  func.func @transform_0(%arg0: i32, %arg1: i32) -> (i32, i32) {
    %c0_i32 = arith.constant 0 : i32
    return %arg0, %arg1 : i32, i32
  }
  func.func @transform_1(%arg0: i32, %arg1: i32) -> (i32, i32) {
    %c0_i32 = arith.constant 0 : i32
    %c0_i32_0 = arith.constant 0 : i32
    return %arg1, %c0_i32 : i32, i32
  }
  func.func @transform_2(%arg0: i32, %arg1: i32) -> (i32, i32) {
    %c0_i32 = arith.constant 0 : i32
    %c0_i32_0 = arith.constant 0 : i32
    %c0_i32_1 = arith.constant 0 : i32
    return %c0_i32, %c0_i32_0 : i32, i32
  }
  func.func @transform_3(%arg0: i32, %arg1: i32) -> (i32, i32) {
    %c0_i32 = arith.constant 0 : i32
    %c0_i32_0 = arith.constant 0 : i32
    %c0_i32_1 = arith.constant 0 : i32
    return %c0_i32, %c0_i32_0 : i32, i32
  }
  func.func @transform_4(%arg0: i32, %arg1: i32) -> (i32, i32) {
    %c0_i32 = arith.constant 0 : i32
    %c0_i32_0 = arith.constant 0 : i32
    return %arg0, %c0_i32 : i32, i32
  }
}

module attributes {stable_mosaic.version = 11 : i64} {
  func.func @_gemm_bn_act_kernel(%arg0: i32, %arg1: i32, %arg2: memref<128x576xbf16, #tpu.memory_space<vmem>>, %arg3: memref<576x64xbf16, #tpu.memory_space<vmem>>, %arg4: memref<1x64xf32, #tpu.memory_space<vmem>>, %arg5: memref<1x64xf32, #tpu.memory_space<vmem>>, %arg6: memref<128x64xbf16, #tpu.memory_space<vmem>>, %arg7: memref<128x64xf32, #tpu.memory_space<vmem>>) attributes {dimension_semantics = [#tpu.dimension_semantics<parallel>, #tpu.dimension_semantics<arbitrary>], iteration_bounds = array<i64: 1, 1>, scalar_prefetch = 0 : i64, scratch_operands = 1 : i64, tpu.core_type = #tpu.core_type<tc>, window_params = [{transform_indices = @transform_0, window_bounds = array<i64: 128, 576>}, {transform_indices = @transform_1, window_bounds = array<i64: 576, 64>}, {pipeline_mode = #tpu.pipeline_mode<synchronous>, transform_indices = @transform_2, window_bounds = array<i64: 1, 64>}, {pipeline_mode = #tpu.pipeline_mode<synchronous>, transform_indices = @transform_3, window_bounds = array<i64: 1, 64>}, {transform_indices = @transform_4, window_bounds = array<i64: 128, 64>}]} {
    %c0_i32 = arith.constant 0 : i32
    %0 = arith.cmpi eq, %arg1, %c0_i32 : i32
    %1 = arith.extui %0 : i1 to i32
    %c0_i32_0 = arith.constant 0 : i32
    %2 = arith.cmpi ne, %1, %c0_i32_0 : i32
    scf.if %2 {
      %cst_10 = arith.constant 0.000000e+00 : f32
      %12 = vector.broadcast %cst_10 : f32 to vector<128x64xf32>
      %c0_11 = arith.constant 0 : index
      %c0_12 = arith.constant 0 : index
      %13 = vector.load %arg7[%c0_11, %c0_12] : memref<128x64xf32, #tpu.memory_space<vmem>>, vector<128x64xf32>
      tpu.vector_store %arg7[%c0_11, %c0_12], %12 {strides = array<i32>} : memref<128x64xf32, #tpu.memory_space<vmem>>, vector<128x64xf32>,
    } else {
    }
    %c0 = arith.constant 0 : index
    %c0_1 = arith.constant 0 : index
    %3 = vector.load %arg7[%c0, %c0_1] : memref<128x64xf32, #tpu.memory_space<vmem>>, vector<128x64xf32>
    %c0_2 = arith.constant 0 : index
    %c0_3 = arith.constant 0 : index
    %4 = vector.load %arg2[%c0_2, %c0_3] : memref<128x576xbf16, #tpu.memory_space<vmem>>, vector<128x576xbf16>
    %c0_4 = arith.constant 0 : index
    %c0_5 = arith.constant 0 : index
    %5 = vector.load %arg3[%c0_4, %c0_5] : memref<576x64xbf16, #tpu.memory_space<vmem>>, vector<576x64xbf16>
    %cst = arith.constant dense<0.000000e+00> : vector<128x64xf32>
    %6 = tpu.matmul %4, %5, %cst {dimension_numbers = #tpu.dot_dimension_numbers<[1], [0], [0], [1], [0, 0, 1, 1], [], []>} : vector<128x576xbf16>, vector<576x64xbf16>, vector<128x64xf32> -> vector<128x64xf32>
    %7 = arith.addf %3, %6 : vector<128x64xf32>
    %c0_6 = arith.constant 0 : index
    %c0_7 = arith.constant 0 : index
    %8 = vector.load %arg7[%c0_6, %c0_7] : memref<128x64xf32, #tpu.memory_space<vmem>>, vector<128x64xf32>
    tpu.vector_store %arg7[%c0_6, %c0_7], %7 {strides = array<i32>} : memref<128x64xf32, #tpu.memory_space<vmem>>, vector<128x64xf32>,
    %c0_i32_8 = arith.constant 0 : i32
    %9 = arith.cmpi eq, %arg1, %c0_i32_8 : i32
    %10 = arith.extui %9 : i1 to i32
    %c0_i32_9 = arith.constant 0 : i32
    %11 = arith.cmpi ne, %10, %c0_i32_9 : i32
    scf.if %11 {
      %c0_10 = arith.constant 0 : index
      %c0_11 = arith.constant 0 : index
      %12 = vector.load %arg7[%c0_10, %c0_11] : memref<128x64xf32, #tpu.memory_space<vmem>>, vector<128x64xf32>
      %c0_12 = arith.constant 0 : index
      %c0_13 = arith.constant 0 : index
      %13 = vector.load %arg4[%c0_12, %c0_13] : memref<1x64xf32, #tpu.memory_space<vmem>>, vector<1x64xf32>
      %14 = vector.broadcast %13 : vector<1x64xf32> to vector<128x64xf32>
      %15 = arith.mulf %12, %14 : vector<128x64xf32>
      %c0_14 = arith.constant 0 : index
      %c0_15 = arith.constant 0 : index
      %16 = vector.load %arg5[%c0_14, %c0_15] : memref<1x64xf32, #tpu.memory_space<vmem>>, vector<1x64xf32>
      %17 = vector.broadcast %16 : vector<1x64xf32> to vector<128x64xf32>
      %18 = arith.addf %15, %17 : vector<128x64xf32>
      %cst_16 = arith.constant 0.000000e+00 : f32
      %19 = vector.broadcast %cst_16 : f32 to vector<128x64xf32>
      %20 = arith.maximumf %18, %19 : vector<128x64xf32>
      %21 = arith.truncf %20 : vector<128x64xf32> to vector<128x64xbf16>
      %c0_17 = arith.constant 0 : index
      %c0_18 = arith.constant 0 : index
      %22 = vector.load %arg6[%c0_17, %c0_18] : memref<128x64xbf16, #tpu.memory_space<vmem>>, vector<128x64xbf16>
      tpu.vector_store %arg6[%c0_17, %c0_18], %21 {strides = array<i32>} : memref<128x64xbf16, #tpu.memory_space<vmem>>, vector<128x64xbf16>,
    } else {
    }
    return
  }
  func.func @transform_0(%arg0: i32, %arg1: i32) -> (i32, i32) {
    %c0_i32 = arith.constant 0 : i32
    return %arg0, %arg1 : i32, i32
  }
  func.func @transform_1(%arg0: i32, %arg1: i32) -> (i32, i32) {
    %c0_i32 = arith.constant 0 : i32
    %c0_i32_0 = arith.constant 0 : i32
    return %arg1, %c0_i32 : i32, i32
  }
  func.func @transform_2(%arg0: i32, %arg1: i32) -> (i32, i32) {
    %c0_i32 = arith.constant 0 : i32
    %c0_i32_0 = arith.constant 0 : i32
    %c0_i32_1 = arith.constant 0 : i32
    return %c0_i32, %c0_i32_0 : i32, i32
  }
  func.func @transform_3(%arg0: i32, %arg1: i32) -> (i32, i32) {
    %c0_i32 = arith.constant 0 : i32
    %c0_i32_0 = arith.constant 0 : i32
    %c0_i32_1 = arith.constant 0 : i32
    return %c0_i32, %c0_i32_0 : i32, i32
  }
  func.func @transform_4(%arg0: i32, %arg1: i32) -> (i32, i32) {
    %c0_i32 = arith.constant 0 : i32
    %c0_i32_0 = arith.constant 0 : i32
    return %arg0, %c0_i32 : i32, i32
  }
}

module attributes {stable_mosaic.version = 11 : i64} {
  func.func @_fc_head_kernel(%arg0: i32, %arg1: memref<2x512xbf16, #tpu.memory_space<vmem>>, %arg2: memref<512x512xbf16, #tpu.memory_space<vmem>>, %arg3: memref<1x512xf32, #tpu.memory_space<vmem>>, %arg4: memref<512x4xbf16, #tpu.memory_space<vmem>>, %arg5: memref<1x4xf32, #tpu.memory_space<vmem>>, %arg6: memref<2x4xf32, #tpu.memory_space<vmem>>, %arg7: memref<2x512xf32, #tpu.memory_space<vmem>>) attributes {dimension_semantics = [#tpu.dimension_semantics<arbitrary>], iteration_bounds = array<i64: 8>, scalar_prefetch = 0 : i64, scratch_operands = 1 : i64, tpu.core_type = #tpu.core_type<tc>, window_params = [{transform_indices = @transform_0, window_bounds = array<i64: 2, 512>}, {transform_indices = @transform_1, window_bounds = array<i64: 512, 512>}, {pipeline_mode = #tpu.pipeline_mode<synchronous>, transform_indices = @transform_2, window_bounds = array<i64: 1, 512>}, {pipeline_mode = #tpu.pipeline_mode<synchronous>, transform_indices = @transform_3, window_bounds = array<i64: 512, 4>}, {pipeline_mode = #tpu.pipeline_mode<synchronous>, transform_indices = @transform_4, window_bounds = array<i64: 1, 4>}, {pipeline_mode = #tpu.pipeline_mode<synchronous>, transform_indices = @transform_5, window_bounds = array<i64: 2, 4>}]} {
    %c0_i32 = arith.constant 0 : i32
    %0 = arith.cmpi eq, %arg0, %c0_i32 : i32
    %1 = arith.extui %0 : i1 to i32
    %c0_i32_0 = arith.constant 0 : i32
    %2 = arith.cmpi ne, %1, %c0_i32_0 : i32
    scf.if %2 {
      %cst_9 = arith.constant 0.000000e+00 : f32
      %12 = vector.broadcast %cst_9 : f32 to vector<2x512xf32>
      %c0_10 = arith.constant 0 : index
      %c0_11 = arith.constant 0 : index
      %13 = vector.load %arg7[%c0_10, %c0_11] : memref<2x512xf32, #tpu.memory_space<vmem>>, vector<2x512xf32>
      tpu.vector_store %arg7[%c0_10, %c0_11], %12 {strides = array<i32>} : memref<2x512xf32, #tpu.memory_space<vmem>>, vector<2x512xf32>,
    } else {
    }
    %c0 = arith.constant 0 : index
    %c0_1 = arith.constant 0 : index
    %3 = vector.load %arg7[%c0, %c0_1] : memref<2x512xf32, #tpu.memory_space<vmem>>, vector<2x512xf32>
    %c0_2 = arith.constant 0 : index
    %c0_3 = arith.constant 0 : index
    %4 = vector.load %arg1[%c0_2, %c0_3] : memref<2x512xbf16, #tpu.memory_space<vmem>>, vector<2x512xbf16>
    %c0_4 = arith.constant 0 : index
    %c0_5 = arith.constant 0 : index
    %5 = vector.load %arg2[%c0_4, %c0_5] : memref<512x512xbf16, #tpu.memory_space<vmem>>, vector<512x512xbf16>
    %cst = arith.constant dense<0.000000e+00> : vector<2x512xf32>
    %6 = tpu.matmul %4, %5, %cst {dimension_numbers = #tpu.dot_dimension_numbers<[1], [0], [0], [1], [0, 0, 1, 1], [], []>} : vector<2x512xbf16>, vector<512x512xbf16>, vector<2x512xf32> -> vector<2x512xf32>
    %7 = arith.addf %3, %6 : vector<2x512xf32>
    %c0_6 = arith.constant 0 : index
    %c0_7 = arith.constant 0 : index
    %8 = vector.load %arg7[%c0_6, %c0_7] : memref<2x512xf32, #tpu.memory_space<vmem>>, vector<2x512xf32>
    tpu.vector_store %arg7[%c0_6, %c0_7], %7 {strides = array<i32>} : memref<2x512xf32, #tpu.memory_space<vmem>>, vector<2x512xf32>,
    %c7_i32 = arith.constant 7 : i32
    %9 = arith.cmpi eq, %arg0, %c7_i32 : i32
    %10 = arith.extui %9 : i1 to i32
    %c0_i32_8 = arith.constant 0 : i32
    %11 = arith.cmpi ne, %10, %c0_i32_8 : i32
    scf.if %11 {
      %c0_9 = arith.constant 0 : index
      %c0_10 = arith.constant 0 : index
      %12 = vector.load %arg7[%c0_9, %c0_10] : memref<2x512xf32, #tpu.memory_space<vmem>>, vector<2x512xf32>
      %c0_11 = arith.constant 0 : index
      %c0_12 = arith.constant 0 : index
      %13 = vector.load %arg3[%c0_11, %c0_12] : memref<1x512xf32, #tpu.memory_space<vmem>>, vector<1x512xf32>
      %14 = vector.broadcast %13 : vector<1x512xf32> to vector<2x512xf32>
      %15 = arith.addf %12, %14 : vector<2x512xf32>
      %cst_13 = arith.constant 0.000000e+00 : f32
      %16 = vector.broadcast %cst_13 : f32 to vector<2x512xf32>
      %17 = arith.maximumf %15, %16 : vector<2x512xf32>
      %18 = arith.truncf %17 : vector<2x512xf32> to vector<2x512xbf16>
      %c0_14 = arith.constant 0 : index
      %c0_15 = arith.constant 0 : index
      %19 = vector.load %arg4[%c0_14, %c0_15] : memref<512x4xbf16, #tpu.memory_space<vmem>>, vector<512x4xbf16>
      %cst_16 = arith.constant dense<0.000000e+00> : vector<2x4xf32>
      %20 = tpu.matmul %18, %19, %cst_16 {dimension_numbers = #tpu.dot_dimension_numbers<[1], [0], [0], [1], [0, 0, 1, 1], [], []>} : vector<2x512xbf16>, vector<512x4xbf16>, vector<2x4xf32> -> vector<2x4xf32>
      %c0_17 = arith.constant 0 : index
      %c0_18 = arith.constant 0 : index
      %21 = vector.load %arg5[%c0_17, %c0_18] : memref<1x4xf32, #tpu.memory_space<vmem>>, vector<1x4xf32>
      %22 = vector.broadcast %21 : vector<1x4xf32> to vector<2x4xf32>
      %23 = arith.addf %20, %22 : vector<2x4xf32>
      %c0_19 = arith.constant 0 : index
      %c0_20 = arith.constant 0 : index
      %24 = vector.load %arg6[%c0_19, %c0_20] : memref<2x4xf32, #tpu.memory_space<vmem>>, vector<2x4xf32>
      tpu.vector_store %arg6[%c0_19, %c0_20], %23 {strides = array<i32>} : memref<2x4xf32, #tpu.memory_space<vmem>>, vector<2x4xf32>,
    } else {
    }
    return
  }
  func.func @transform_0(%arg0: i32) -> (i32, i32) {
    %c0_i32 = arith.constant 0 : i32
    %c0_i32_0 = arith.constant 0 : i32
    return %c0_i32, %arg0 : i32, i32
  }
  func.func @transform_1(%arg0: i32) -> (i32, i32) {
    %c0_i32 = arith.constant 0 : i32
    %c0_i32_0 = arith.constant 0 : i32
    return %arg0, %c0_i32 : i32, i32
  }
  func.func @transform_2(%arg0: i32) -> (i32, i32) {
    %c0_i32 = arith.constant 0 : i32
    %c0_i32_0 = arith.constant 0 : i32
    %c0_i32_1 = arith.constant 0 : i32
    return %c0_i32, %c0_i32_0 : i32, i32
  }
  func.func @transform_3(%arg0: i32) -> (i32, i32) {
    %c0_i32 = arith.constant 0 : i32
    %c0_i32_0 = arith.constant 0 : i32
    %c0_i32_1 = arith.constant 0 : i32
    return %c0_i32, %c0_i32_0 : i32, i32
  }
  func.func @transform_4(%arg0: i32) -> (i32, i32) {
    %c0_i32 = arith.constant 0 : i32
    %c0_i32_0 = arith.constant 0 : i32
    %c0_i32_1 = arith.constant 0 : i32
    return %c0_i32, %c0_i32_0 : i32, i32
  }
  func.func @transform_5(%arg0: i32) -> (i32, i32) {
    %c0_i32 = arith.constant 0 : i32
    %c0_i32_0 = arith.constant 0 : i32
    %c0_i32_1 = arith.constant 0 : i32
    return %c0_i32, %c0_i32_0 : i32, i32
  }
}

</mosaic_0001>

<bundles_post_ra>
// kernel: dqn_forward.4
= control target key start
LH: loop header
LB: loop body
LE: loop exit
PB: predicated region body
PF: predicated region fallthrough
CT: control target
= control target key end

     0   :  { %s1877_s15 = smov 0   ;;  %s1879_s16 = smov 0   ;;  %s2351_s0 = inlined_call_operand.vmem [shape: bf16[1058,64], index: 0, kind: input, shape index: {}]   ;;  %s2352_s1 = inlined_call_operand.vmem [shape: bf16[64,32], index: 1, kind: input, shape index: {}]   ;;  %s2353_s2 = inlined_call_operand.vmem [shape: f32[1,32], index: 2, kind: input, shape index: {}]   ;;  %s2354_s3 = inlined_call_operand.vmem [shape: f32[1,32], index: 3, kind: input, shape index: {}]   ;;  %s2355_s4 = inlined_call_operand.vmem [shape: bf16[1058,32], index: 4, kind: output, shape index: {}]  }
   0x1   :  { %s1881_s17 = smov 0   ;;  %s1883_s18 = smov 0  }
   0x2   :  { %s1885_s19 = smov 0  }
   0x3 LB: > { %s1423_s20 = sadd.s32 4294967295, %s1817_s19   ;;  %s26_s21 = sadd.s32 1, %s1813_s18  ;;  %s1817_s19 = sphi %s1885_s19, %s14_s19   ;;  %s1813_s18 = sphi %s1883_s18, %s2363_s18   ;;  %s1809_s17 = sphi %s1881_s17, %s2362_s17   ;;  %s1805_s16 = sphi %s1879_s16, %s2361_s16   ;;  %s1801_s15 = sphi %s1877_s15, %s2360_s15  }
   0x4   : > { %p28_p0 = scmp.ge.s32.totalorder %s26_s21, 5  ;;  %s129_s22 = sadd.s32 1, %s1805_s16 }
   0x5   : > { %p139_p1 = scmp.ne.s32.totalorder %s1805_s16, %s1801_s15  ;;  %p140_p2 = scmp.eq.s32.totalorder %s1423_s20, 4 }
   0x6   : > { %s2365_s21 = smov (%p28_p0, %s26_s21), 0  ;;  %p1428_p4 = scmp.ge.s32.totalorder %s1817_s19, 1 }
   0x7   : > { %p1909_p3 = por %p140_p2, %p139_p1  ;;  %s126_s24 = ssub.s32 %s1813_s18, %s2365_s21 }
   0x8   : > { %p199_p5 = scmp.lt.s32.totalorder %s1817_s19, 6  ;;  %p127_p6 = scmp.eq.s32.totalorder %s126_s24, 0 }
   0xa   : > { %p200_p7 = pnand %p1428_p4, %p199_p5 }
   0xb   : > { %s1918_s25 = scalar_select %p127_p6, %s1805_s16, %s129_s22  }
   0xc   : > { %203 = sbr.rel (%p200_p7) target bundleno = 372 (0x174), region = 36  ;;  %v1727_v0 = vld [vmem:[%s2352_s1] sm:$0xff] (!%p200_p7)   ;;  %s1924_s28 = sshll.u32 (!%p200_p7), %s1809_s17, 5  ;;  %v1728_v1 = vld [vmem:[%s2352_s1 + $0x8] sm:$0xff] (!%p200_p7)   ;;  %v1729_v2 = vld [vmem:[%s2352_s1 + $0x10] sm:$0xff] (!%p200_p7)   ;;  %vm269_vm0 = vcmask (!%p200_p7), 261120  }
   0xd   : > { %p241_p8 = scmp.lt.s32.totalorder (!%p200_p7), %s1924_s28, 132  ;;  %1574 = vmatprep.subr.bf16.mxu0 (!%p200_p7), %v1727_v0  ;;  %1614 = vmatprep.subr.bf16.mxu1 (!%p200_p7), %v1727_v0  ;;  %v1851_v3 = vmov (!%p200_p7), 0.0   ;;  %v1730_v4 = vld [vmem:[%s2352_s1 + $0x18] sm:$0xff] (!%p200_p7)   ;;  %vm478_vm1 = vcmask (!%p200_p7), 523264   ;;  %v2022_v49 = vld [vmem:[%s2353_s2] ss:$0 sm:$0xff] (!%p200_p7) }
   0xe   : > { %1575 = vmatpush3.bf16.msra.mxu0 (!%p200_p7), %v1727_v0  ;;  %1618 = vmatpush3.bf16.msra.mxu1 (!%p200_p7), %v1727_v0  ;;  %272 = vst.msk [vmem:[#allocation2 + $0x10] sm:$0xff] (!%p200_p7), %vm269_vm0, %v1851_v3  ;;  %270 = vst.msk [vmem:[#allocation2] sm:$0xff] (!%p200_p7), %vm269_vm0, %v1851_v3  ;;  %v2027_v54 = vld [vmem:[%s2354_s3] ss:$0 sm:$0xff] (!%p200_p7)  ;;  %s233_s26 = sand.u32 (!%p200_p7), 1, %s1801_s15   ;;  %vm1026_vm2 = vcmask (!%p200_p7), 257024  }
   0xf   : > { %1576 = vmatprep.subr.bf16.mxu0 (!%p200_p7), %v1728_v1  ;;  %1615 = vmatprep.subr.bf16.mxu1 (!%p200_p7), %v1728_v1  ;;  %271 = vst.msk [vmem:[#allocation2 + $0x8] sm:$0xff] (!%p200_p7), %vm269_vm0, %v1851_v3  ;;  %273 = vst.msk [vmem:[#allocation2 + $0x18] sm:$0xff] (!%p200_p7), %vm269_vm0, %v1851_v3  ;;  %s2038_s15 = sshll.u32 (!%p200_p7), %s233_s26, 7 }
  0x10   : > { %274 = vst.msk [vmem:[#allocation2 + $0x20] sm:$0xff] (!%p200_p7), %vm269_vm0, %v1851_v3  ;;  %275 = vst.msk [vmem:[#allocation2 + $0x28] sm:$0xff] (!%p200_p7), %vm269_vm0, %v1851_v3  ;;  %s2069_s27 = scalar_lea.vmem (!%p200_p7), [#allocation3], %s2038_s15  }
  0x11   : > { %276 = vst.msk [vmem:[#allocation2 + $0x30] sm:$0xff] (!%p200_p7), %vm269_vm0, %v1851_v3  ;;  %277 = vst.msk [vmem:[#allocation2 + $0x38] sm:$0xff] (!%p200_p7), %vm269_vm0, %v1851_v3 }
  0x12   : > { %278 = vst.msk [vmem:[#allocation2 + $0x40] sm:$0xff] (!%p200_p7), %vm269_vm0, %v1851_v3  ;;  %279 = vst.msk [vmem:[#allocation2 + $0x48] sm:$0xff] (!%p200_p7), %vm269_vm0, %v1851_v3  ;;  %1577 = vmatpush3.bf16.msra.mxu0 (!%p200_p7), %v1728_v1  ;;  %1619 = vmatpush3.bf16.msra.mxu1 (!%p200_p7), %v1728_v1 }
  0x13   : > { %s1931_s5 = scalar_select %p241_p8, %s1924_s28, 132  ;;  %280 = vst.msk [vmem:[#allocation2 + $0x50] sm:$0xff] %vm269_vm0, %v1851_v3  ;;  %281 = vst.msk [vmem:[#allocation2 + $0x58] sm:$0xff] %vm269_vm0, %v1851_v3  ;;  %1578 = vmatprep.subr.bf16.mxu0 %v1729_v2  ;;  %1616 = vmatprep.subr.bf16.mxu1 %v1729_v2 }
  0x14   : > { %282 = vst.msk [vmem:[#allocation2 + $0x60] sm:$0xff] %vm269_vm0, %v1851_v3  ;;  %283 = vst.msk [vmem:[#allocation2 + $0x68] sm:$0xff] %vm269_vm0, %v1851_v3  ;;  %s1067_s29 = ssub.s32 (%p1909_p3), 133, %s1924_s28  ;;  %s1551_s30 = sshll.u32 (%p1909_p3), %s1809_s17, 7 }
  0x15   : > { %s1431_s8 = sshll.u32 %s1931_s5, 2  ;;  %284 = vst.msk [vmem:[#allocation2 + $0x70] sm:$0xff] %vm269_vm0, %v1851_v3  ;;  %285 = vst.msk [vmem:[#allocation2 + $0x78] sm:$0xff] %vm269_vm0, %v1851_v3  ;;  %v304_v21 = vld [vmem:[#allocation2 + $0x10] sm:$0xff]  ;;  %v302_v23 = vld [vmem:[#allocation2] sm:$0xff]  ;;  %p1068_p9 = scmp.lt.s32.totalorder (%p1909_p3), %s1067_s29, 32 }
  0x16   : > { %286 = vst.msk [vmem:[#allocation2 + $0x80] sm:$0xff] %vm269_vm0, %v1851_v3  ;;  %287 = vst.msk [vmem:[#allocation2 + $0x88] sm:$0xff] %vm269_vm0, %v1851_v3  ;;  %s1977_s13 = scalar_lea.vmem %s2351_s0, %s1431_s8  ;;  %1579 = vmatpush3.bf16.msra.mxu0 %v1729_v2  ;;  %1620 = vmatpush3.bf16.msra.mxu1 %v1729_v2  ;;  %v305_v27 = vld [vmem:[#allocation2 + $0x18] sm:$0xff]  ;;  %v303_v33 = vld [vmem:[#allocation2 + $0x8] sm:$0xff]  ;;  %s2218_s7 = scalar_lea.vmem (%p1909_p3), %s2355_s4, %s1551_s30  }
  0x17   : > { %288 = vst.msk [vmem:[#allocation2 + $0x90] sm:$0xff] %vm269_vm0, %v1851_v3  ;;  %289 = vst.msk [vmem:[#allocation2 + $0x98] sm:$0xff] %vm269_vm0, %v1851_v3  ;;  %v1731_v5 = vld [vmem:[%s1977_s13] sm:$0xff]   ;;  %1580 = vmatprep.subr.bf16.mxu0 %v1730_v4  ;;  %1617 = vmatprep.subr.bf16.mxu1 %v1730_v4  ;;  %v1733_v7 = vld [vmem:[%s1977_s13 + $0x8] sm:$0xff]  }
  0x18   : > { %290 = vst.msk [vmem:[#allocation2 + $0xa0] sm:$0xff] %vm269_vm0, %v1851_v3  ;;  %291 = vst.msk [vmem:[#allocation2 + $0xa8] sm:$0xff] %vm269_vm0, %v1851_v3  ;;  %v1732_v6 = vld [vmem:[%s1977_s13 + $0x40] sm:$0xff]   ;;  %1582 = vmatprep.mubr.msk.bf16.mxu0 %vm478_vm1, %v1731_v5  ;;  %v1734_v8 = vld [vmem:[%s1977_s13 + $0x48] sm:$0xff]  }
  0x19   : > { %292 = vst.msk [vmem:[#allocation2 + $0xb0] sm:$0xff] %vm269_vm0, %v1851_v3  ;;  %293 = vst.msk [vmem:[#allocation2 + $0xb8] sm:$0xff] %vm269_vm0, %v1851_v3  ;;  %1598 = vmatprep.mubr.msk.bf16.mxu1 %vm478_vm1, %v1732_v6  ;;  %v1735_v9 = vld [vmem:[%s1977_s13 + $0x10] sm:$0xff]   ;;  %v1737_v11 = vld [vmem:[%s1977_s13 + $0x18] sm:$0xff]  }
  0x1a   : > { %294 = vst.msk [vmem:[#allocation2 + $0xc0] sm:$0xff] %vm269_vm0, %v1851_v3  ;;  %295 = vst.msk [vmem:[#allocation2 + $0xc8] sm:$0xff] %vm269_vm0, %v1851_v3  ;;  %1581 = vmatpush3.bf16.msra.mxu0 %v1730_v4  ;;  %1621 = vmatpush3.bf16.msra.mxu1 %v1730_v4  ;;  %v1736_v10 = vld [vmem:[%s1977_s13 + $0x50] sm:$0xff]   ;;  %v1738_v12 = vld [vmem:[%s1977_s13 + $0x58] sm:$0xff]  }
  0x1b   : > { %296 = vst.msk [vmem:[#allocation2 + $0xd0] sm:$0xff] %vm269_vm0, %v1851_v3  ;;  %297 = vst.msk [vmem:[#allocation2 + $0xd8] sm:$0xff] %vm269_vm0, %v1851_v3  ;;  %v1739_v13 = vld [vmem:[%s1977_s13 + $0x20] sm:$0xff]   ;;  %v1741_v15 = vld [vmem:[%s1977_s13 + $0x28] sm:$0xff]  }
  0x1c   : > { %298 = vst.msk [vmem:[#allocation2 + $0xe0] sm:$0xff] %vm269_vm0, %v1851_v3  ;;  %299 = vst.msk [vmem:[#allocation2 + $0xe8] sm:$0xff] %vm269_vm0, %v1851_v3  ;;  %v1740_v14 = vld [vmem:[%s1977_s13 + $0x60] sm:$0xff]   ;;  %v1742_v16 = vld [vmem:[%s1977_s13 + $0x68] sm:$0xff]  }
  0x1d   : > { %300 = vst.msk [vmem:[#allocation2 + $0xf0] sm:$0xff] %vm269_vm0, %v1851_v3  ;;  %301 = vst.msk [vmem:[#allocation2 + $0xf8] sm:$0xff] %vm269_vm0, %v1851_v3  ;;  %1583 = vmatmul.mubr.msk.bf16.vlgmr.msra.gmra.mrb[0].mxu0 %vm478_vm1, %v1733_v7  ;;  %1599 = vmatmul.mubr.msk.bf16.vlgmr.msra.gmra.mrb[0].mxu1 %vm478_vm1, %v1734_v8  ;;  %v1743_v17 = vld [vmem:[%s1977_s13 + $0x30] sm:$0xff]   ;;  %v1745_v19 = vld [vmem:[%s1977_s13 + $0x38] sm:$0xff]  }
  0x1e   : > { %1586 = vmatprep.mubr.msk.bf16.mxu0 %vm478_vm1, %v1735_v9  ;;  %1602 = vmatprep.mubr.msk.bf16.mxu1 %vm478_vm1, %v1736_v10  ;;  %v1744_v18 = vld [vmem:[%s1977_s13 + $0x70] sm:$0xff]   ;;  %v1746_v20 = vld [vmem:[%s1977_s13 + $0x78] sm:$0xff]   ;;  %v318_v24 = vld [vmem:[#allocation2 + $0x80] sm:$0xff] }
  0x1f   : > { %v320_v22 = vld [vmem:[#allocation2 + $0x90] sm:$0xff]  ;;  %v321_v28 = vld [vmem:[#allocation2 + $0x98] sm:$0xff]  ;;  %v319_v34 = vld [vmem:[#allocation2 + $0x88] sm:$0xff] }
  0x20   : > { %v308_v45 = vld [vmem:[#allocation2 + $0x30] sm:$0xff]  ;;  %v306_v47 = vld [vmem:[#allocation2 + $0x20] sm:$0xff]  ;;  %v309_v52 = vld [vmem:[#allocation2 + $0x38] sm:$0xff] }
  0x21   : > { %v324_v46 = vld [vmem:[#allocation2 + $0xb0] sm:$0xff]  ;;  %v322_v48 = vld [vmem:[#allocation2 + $0xa0] sm:$0xff]  ;;  %v325_v53 = vld [vmem:[#allocation2 + $0xb8] sm:$0xff] }
  0x22   : > { %v307_v59 = vld [vmem:[#allocation2 + $0x28] sm:$0xff] }
  0x23   : > { %v323_v60 = vld [vmem:[#allocation2 + $0xa8] sm:$0xff] }
  0x25   : > { %1587 = vmatmul.mubr.msk.bf16.gmra.mrb[4].mxu0 %vm478_vm1, %v1737_v11  ;;  %1603 = vmatmul.mubr.msk.bf16.gmra.mrb[4].mxu1 %vm478_vm1, %v1738_v12 }
  0x26   : > { %1590 = vmatprep.mubr.msk.bf16.mxu0 %vm478_vm1, %v1739_v13  ;;  %1606 = vmatprep.mubr.msk.bf16.mxu1 %vm478_vm1, %v1740_v14 }
  0x2d   : > { %1591 = vmatmul.mubr.msk.bf16.gmra.mrb[8].mxu0 %vm478_vm1, %v1741_v15  ;;  %1607 = vmatmul.mubr.msk.bf16.gmra.mrb[8].mxu1 %vm478_vm1, %v1742_v16 }
  0x2e   : > { %1594 = vmatprep.mubr.msk.bf16.mxu0 %vm478_vm1, %v1743_v17  ;;  %1610 = vmatprep.mubr.msk.bf16.mxu1 %vm478_vm1, %v1744_v18 }
  0x35   : > { %1595 = vmatmul.mubr.msk.bf16.gmra.mrb[12].mxu0 %vm478_vm1, %v1745_v19  ;;  %1611 = vmatmul.mubr.msk.bf16.gmra.mrb[12].mxu1 %vm478_vm1, %v1746_v20 }
  0xf0   : > { %v1584_v25 = vpop.f32.mrb[0].mxu0  ;;  %v1600_v26 = vpop.f32.mrb[0].mxu1 }
  0xf1   : > { %v690_v29 = vadd.f32 %v1584_v25, %v304_v21  ;;  %v706_v30 = vadd.f32 %v1600_v26, %v320_v22  ;;  %v561_v31 = vpop.f32.mrb[1].mxu0  ;;  %v625_v32 = vpop.f32.mrb[1].mxu1 }
  0xf2   : > { %v688_v35 = vadd.f32 %v561_v31, %v302_v23  ;;  %v704_v36 = vadd.f32 %v625_v32, %v318_v24  ;;  %v1585_v37 = vpop.f32.mrb[2].mxu0  ;;  %v1601_v38 = vpop.f32.mrb[2].mxu1 }
  0xf3   : > { %723 = vst.msk [vmem:[#allocation2 + $0x10] sm:$0xff] %vm269_vm0, %v690_v29  ;;  %739 = vst.msk [vmem:[#allocation2 + $0x90] sm:$0xff] %vm269_vm0, %v706_v30  ;;  %v691_v39 = vadd.f32 %v1585_v37, %v305_v27  ;;  %v707_v40 = vadd.f32 %v1601_v38, %v321_v28  ;;  %v564_v41 = vpop.f32.mrb[3].mxu0  ;;  %v628_v42 = vpop.f32.mrb[3].mxu1 }
  0xf4   : > { %721 = vst.msk [vmem:[#allocation2] sm:$0xff] %vm269_vm0, %v688_v35  ;;  %737 = vst.msk [vmem:[#allocation2 + $0x80] sm:$0xff] %vm269_vm0, %v704_v36  ;;  %v689_v43 = vadd.f32 %v564_v41, %v303_v33  ;;  %v705_v44 = vadd.f32 %v628_v42, %v319_v34 }
  0xf5   : > { %724 = vst.msk [vmem:[#allocation2 + $0x18] sm:$0xff] %vm269_vm0, %v691_v39  ;;  %740 = vst.msk [vmem:[#allocation2 + $0x98] sm:$0xff] %vm269_vm0, %v707_v40 }
  0xf6   : > { %722 = vst.msk [vmem:[#allocation2 + $0x8] sm:$0xff] %vm269_vm0, %v689_v43  ;;  %738 = vst.msk [vmem:[#allocation2 + $0x88] sm:$0xff] %vm269_vm0, %v705_v44 }
  0xf8   : > { %v1588_v50 = vpop.f32.mrb[4].mxu0  ;;  %v1604_v51 = vpop.f32.mrb[4].mxu1 }
  0xf9   : > { %v694_v55 = vadd.f32 %v1588_v50, %v308_v45  ;;  %v710_v56 = vadd.f32 %v1604_v51, %v324_v46  ;;  %v577_v57 = vpop.f32.mrb[5].mxu0  ;;  %v641_v58 = vpop.f32.mrb[5].mxu1 }
  0xfa   : > { %v758_v61 = vld [vmem:[#allocation2 + $0x10] sm:$0xff]  ;;  %v692_v63 = vadd.f32 %v577_v57, %v306_v47  ;;  %v708_v0 = vadd.f32 %v641_v58, %v322_v48  ;;  %v1589_v1 = vpop.f32.mrb[6].mxu0  ;;  %v1605_v2 = vpop.f32.mrb[6].mxu1 }
  0xfb   : > { %v774_v62 = vld [vmem:[#allocation2 + $0x90] sm:$0xff]  ;;  %v797_v3 = vmul.f32 %v2022_v49, %v758_v61  ;;  %v756_v5 = vld [vmem:[#allocation2] sm:$0xff]  ;;  %727 = vst.msk [vmem:[#allocation2 + $0x30] sm:$0xff] %vm269_vm0, %v694_v55  ;;  %743 = vst.msk [vmem:[#allocation2 + $0xb0] sm:$0xff] %vm269_vm0, %v710_v56  ;;  %v695_v7 = vadd.f32 %v1589_v1, %v309_v52  ;;  %v711_v8 = vadd.f32 %v1605_v2, %v325_v53  ;;  %v580_v9 = vpop.f32.mrb[7].mxu0  ;;  %v644_v10 = vpop.f32.mrb[7].mxu1 }
  0xfc   : > { %v813_v4 = vmul.f32 %v2022_v49, %v774_v62  ;;  %v772_v6 = vld [vmem:[#allocation2 + $0x80] sm:$0xff]  ;;  %v795_v11 = vmul.f32 %v2022_v49, %v756_v5  ;;  %v759_v13 = vld [vmem:[#allocation2 + $0x18] sm:$0xff]  ;;  %725 = vst.msk [vmem:[#allocation2 + $0x20] sm:$0xff] %vm269_vm0, %v692_v63  ;;  %741 = vst.msk [vmem:[#allocation2 + $0xa0] sm:$0xff] %vm269_vm0, %v708_v0  ;;  %v693_v15 = vadd.f32 %v580_v9, %v307_v59 }
  0xfd   : > { %v811_v12 = vmul.f32 %v2022_v49, %v772_v6  ;;  %v775_v14 = vld [vmem:[#allocation2 + $0x98] sm:$0xff]  ;;  %v709_v16 = vadd.f32 %v644_v10, %v323_v60  ;;  %v836_v17 = vadd.f32 %v2027_v54, %v797_v3  ;;  %v798_v19 = vmul.f32 %v2022_v49, %v759_v13  ;;  %v757_v21 = vld [vmem:[#allocation2 + $0x8] sm:$0xff]  ;;  %728 = vst.msk [vmem:[#allocation2 + $0x38] sm:$0xff] %vm269_vm0, %v695_v7  ;;  %v312_v13 = vld [vmem:[#allocation2 + $0x50] sm:$0xff] }
  0xfe   : > { %v852_v18 = vadd.f32 %v2027_v54, %v813_v4  ;;  %v814_v20 = vmul.f32 %v2022_v49, %v775_v14  ;;  %v773_v22 = vld [vmem:[#allocation2 + $0x88] sm:$0xff]  ;;  %744 = vst.msk [vmem:[#allocation2 + $0xb8] sm:$0xff] %vm269_vm0, %v711_v8  ;;  %v834_v23 = vadd.f32 %v2027_v54, %v795_v11  ;;  %v796_v25 = vmul.f32 %v2022_v49, %v757_v21 }
  0xff   : > { %v850_v24 = vadd.f32 %v2027_v54, %v811_v12  ;;  %v812_v26 = vmul.f32 %v2022_v49, %v773_v22  ;;  %726 = vst.msk [vmem:[#allocation2 + $0x28] sm:$0xff] %vm269_vm0, %v693_v15  ;;  %742 = vst.msk [vmem:[#allocation2 + $0xa8] sm:$0xff] %vm269_vm0, %v709_v16  ;;  %v868_v27 = vmax.f32 %v836_v17, 0.0  ;;  %v837_v29 = vadd.f32 %v2027_v54, %v798_v19  ;;  %v310_v19 = vld [vmem:[#allocation2 + $0x40] sm:$0xff] }
 0x100   : > { %v884_v28 = vmax.f32 %v852_v18, 0.0  ;;  %v853_v30 = vadd.f32 %v2027_v54, %v814_v20  ;;  %v866_v31 = vmax.f32 %v834_v23, 0.0  ;;  %v835_v33 = vadd.f32 %v2027_v54, %v796_v25  ;;  %v2056_v35 = vpop.f32.mrb[8].mxu0  ;;  %v2058_v36 = vpop.f32.mrb[8].mxu1  ;;  %v328_v18 = vld [vmem:[#allocation2 + $0xd0] sm:$0xff]  ;;  %v326_v20 = vld [vmem:[#allocation2 + $0xc0] sm:$0xff] }
 0x101   : > { %v882_v32 = vmax.f32 %v850_v24, 0.0  ;;  %v851_v34 = vadd.f32 %v2027_v54, %v812_v26  ;;  %v1521_v37 = vpack.c.bf16 %v868_v27, %v868_v27  ;;  %v869_v39 = vmax.f32 %v837_v29, 0.0  ;;  %v2060_v41 = vpop.f32.mrb[9].mxu0  ;;  %v2062_v42 = vpop.f32.mrb[9].mxu1  ;;  %v313_v25 = vld [vmem:[#allocation2 + $0x58] sm:$0xff] }
 0x102   : > { %v1537_v38 = vpack.c.bf16 %v884_v28, %v884_v28  ;;  %v885_v40 = vmax.f32 %v853_v30, 0.0  ;;  %v1519_v43 = vpack.c.bf16 %v866_v31, %v866_v31  ;;  %v867_v45 = vmax.f32 %v835_v33, 0.0  ;;  %v762_v47 = vld [vmem:[#allocation2 + $0x30] sm:$0xff]  ;;  %v2064_v50 = vpop.f32.mrb[10].mxu0  ;;  %v2066_v51 = vpop.f32.mrb[10].mxu1  ;;  %v329_v26 = vld [vmem:[#allocation2 + $0xd8] sm:$0xff] }
 0x103   : > { %v1535_v44 = vpack.c.bf16 %v882_v32, %v882_v32  ;;  %v883_v46 = vmax.f32 %v851_v34, 0.0  ;;  %v778_v48 = vld [vmem:[#allocation2 + $0xb0] sm:$0xff]  ;;  %1029 = vst.msk [vmem:[%s2069_s27 + $0x8] sm:$0xf] %vm1026_vm2, %v1521_v37  ;;  %v1522_v52 = vpack.c.bf16 %v869_v39, %v869_v39  ;;  %v801_v55 = vmul.f32 %v2022_v49, %v762_v47  ;;  %v760_v57 = vld [vmem:[#allocation2 + $0x20] sm:$0xff]  ;;  %v2077_v59 = vpop.f32.mrb[11].mxu0 }
 0x104   : > { %1045 = vst.msk [vmem:[%s2069_s27 + $0x48] sm:$0xf] %vm1026_vm2, %v1537_v38  ;;  %v1538_v53 = vpack.c.bf16 %v885_v40, %v885_v40  ;;  %v817_v56 = vmul.f32 %v2022_v49, %v778_v48  ;;  %v776_v58 = vld [vmem:[#allocation2 + $0xa0] sm:$0xff]  ;;  %v2079_v60 = vpop.f32.mrb[11].mxu1  ;;  %1027 = vst.msk [vmem:[%s2069_s27] sm:$0xf] %vm1026_vm2, %v1519_v43  ;;  %v1520_v61 = vpack.c.bf16 %v867_v45, %v867_v45 }
 0x105   : > { %1043 = vst.msk [vmem:[%s2069_s27 + $0x40] sm:$0xf] %vm1026_vm2, %v1535_v44  ;;  %v1536_v62 = vpack.c.bf16 %v883_v46, %v883_v46  ;;  %v799_v63 = vmul.f32 %v2022_v49, %v760_v57  ;;  %v815_v0 = vmul.f32 %v2022_v49, %v776_v58  ;;  %v763_v1 = vld [vmem:[#allocation2 + $0x38] sm:$0xff]  ;;  %1030 = vst.msk [vmem:[%s2069_s27 + $0xc] sm:$0xf] %vm1026_vm2, %v1522_v52  ;;  %v311_v33 = vld [vmem:[#allocation2 + $0x48] sm:$0xff] }
 0x106   : > { %v779_v2 = vld [vmem:[#allocation2 + $0xb8] sm:$0xff]  ;;  %1046 = vst.msk [vmem:[%s2069_s27 + $0x4c] sm:$0xf] %vm1026_vm2, %v1538_v53  ;;  %v840_v3 = vadd.f32 %v2027_v54, %v801_v55  ;;  %v856_v4 = vadd.f32 %v2027_v54, %v817_v56  ;;  %v802_v5 = vmul.f32 %v2022_v49, %v763_v1  ;;  %v761_v7 = vld [vmem:[#allocation2 + $0x28] sm:$0xff]  ;;  %1028 = vst.msk [vmem:[%s2069_s27 + $0x4] sm:$0xf] %vm1026_vm2, %v1520_v61 }
 0x107   : > { %v818_v6 = vmul.f32 %v2022_v49, %v779_v2  ;;  %v777_v8 = vld [vmem:[#allocation2 + $0xa8] sm:$0xff]  ;;  %1044 = vst.msk [vmem:[%s2069_s27 + $0x44] sm:$0xf] %vm1026_vm2, %v1536_v62  ;;  %v838_v9 = vadd.f32 %v2027_v54, %v799_v63  ;;  %v854_v10 = vadd.f32 %v2027_v54, %v815_v0  ;;  %v800_v11 = vmul.f32 %v2022_v49, %v761_v7  ;;  %v316_v45 = vld [vmem:[#allocation2 + $0x70] sm:$0xff]  ;;  %v314_v57 = vld [vmem:[#allocation2 + $0x60] sm:$0xff] }
 0x108   : > { %v816_v12 = vmul.f32 %v2022_v49, %v777_v8  ;;  %v872_v14 = vmax.f32 %v840_v3, 0.0  ;;  %v888_v15 = vmax.f32 %v856_v4, 0.0  ;;  %v841_v16 = vadd.f32 %v2027_v54, %v802_v5  ;;  %v1596_v27 = vpop.f32.mrb[12].mxu0  ;;  %v1612_v28 = vpop.f32.mrb[12].mxu1  ;;  %v327_v34 = vld [vmem:[#allocation2 + $0xc8] sm:$0xff]  ;;  %v332_v46 = vld [vmem:[#allocation2 + $0xf0] sm:$0xff] }
 0x109   : > { %v857_v17 = vadd.f32 %v2027_v54, %v818_v6  ;;  %v870_v21 = vmax.f32 %v838_v9, 0.0  ;;  %v886_v22 = vmax.f32 %v854_v10, 0.0  ;;  %v839_v23 = vadd.f32 %v2027_v54, %v800_v11  ;;  %v609_v37 = vpop.f32.mrb[13].mxu0  ;;  %v673_v38 = vpop.f32.mrb[13].mxu1  ;;  %v330_v58 = vld [vmem:[#allocation2 + $0xe0] sm:$0xff]  ;;  %v317_v61 = vld [vmem:[#allocation2 + $0x78] sm:$0xff] }
 0x10a   : > { %v855_v24 = vadd.f32 %v2027_v54, %v816_v12  ;;  %v1525_v29 = vpack.c.bf16 %v872_v14, %v872_v14  ;;  %v1541_v30 = vpack.c.bf16 %v888_v15, %v888_v15  ;;  %v873_v31 = vmax.f32 %v841_v16, 0.0  ;;  %v1597_v47 = vpop.f32.mrb[14].mxu0  ;;  %v1613_v48 = vpop.f32.mrb[14].mxu1  ;;  %v333_v3 = vld [vmem:[#allocation2 + $0xf8] sm:$0xff]  ;;  %v331_v4 = vld [vmem:[#allocation2 + $0xe8] sm:$0xff] }
 0x10b   : > { %v889_v32 = vmax.f32 %v857_v17, 0.0  ;;  %v1523_v39 = vpack.c.bf16 %v870_v21, %v870_v21  ;;  %v1539_v40 = vpack.c.bf16 %v886_v22, %v886_v22  ;;  %v871_v43 = vmax.f32 %v839_v23, 0.0  ;;  %v612_v62 = vpop.f32.mrb[15].mxu0  ;;  %v676_v63 = vpop.f32.mrb[15].mxu1 }
 0x10c   : > { %v887_v44 = vmax.f32 %v855_v24, 0.0  ;;  %1033 = vst.msk [vmem:[%s2069_s27 + $0x18] sm:$0xf] %vm1026_vm2, %v1525_v29  ;;  %1049 = vst.msk [vmem:[%s2069_s27 + $0x58] sm:$0xf] %vm1026_vm2, %v1541_v30  ;;  %v1526_v52 = vpack.c.bf16 %v873_v31, %v873_v31  ;;  %v698_v55 = vadd.f32 %v2056_v35, %v312_v13  ;;  %v714_v56 = vadd.f32 %v2058_v36, %v328_v18  ;;  %v315_v36 = vld [vmem:[#allocation2 + $0x68] sm:$0xff] }
 0x10d   : > { %v1542_v53 = vpack.c.bf16 %v889_v32, %v889_v32  ;;  %1031 = vst.msk [vmem:[%s2069_s27 + $0x10] sm:$0xf] %vm1026_vm2, %v1523_v39  ;;  %1047 = vst.msk [vmem:[%s2069_s27 + $0x50] sm:$0xf] %vm1026_vm2, %v1539_v40  ;;  %v1524_v0 = vpack.c.bf16 %v871_v43, %v871_v43  ;;  %v696_v2 = vadd.f32 %v2060_v41, %v310_v19 }
 0x10e   : > { %v1540_v1 = vpack.c.bf16 %v887_v44, %v887_v44  ;;  %v712_v35 = vadd.f32 %v2062_v42, %v326_v20  ;;  %1034 = vst.msk [vmem:[%s2069_s27 + $0x1c] sm:$0xf] %vm1026_vm2, %v1526_v52  ;;  %v699_v5 = vadd.f32 %v2064_v50, %v313_v25  ;;  %v715_v6 = vadd.f32 %v2066_v51, %v329_v26 }
 0x10f   : > { %1050 = vst.msk [vmem:[%s2069_s27 + $0x5c] sm:$0xf] %vm1026_vm2, %v1542_v53  ;;  %v697_v7 = vadd.f32 %v2077_v59, %v311_v33  ;;  %v713_v41 = vadd.f32 %v2079_v60, %v327_v34  ;;  %1032 = vst.msk [vmem:[%s2069_s27 + $0x14] sm:$0xf] %vm1026_vm2, %v1524_v0  ;;  %v702_v42 = vadd.f32 %v1596_v27, %v316_v45 }
 0x110   : > { %731 = vst.msk [vmem:[#allocation2 + $0x50] sm:$0xff] %vm269_vm0, %v698_v55  ;;  %747 = vst.msk [vmem:[#allocation2 + $0xd0] sm:$0xff] %vm269_vm0, %v714_v56  ;;  %v718_v8 = vadd.f32 %v1612_v28, %v332_v46  ;;  %v700_v9 = vadd.f32 %v609_v37, %v314_v57  ;;  %v716_v10 = vadd.f32 %v673_v38, %v330_v58 }
 0x111   : > { %1048 = vst.msk [vmem:[%s2069_s27 + $0x54] sm:$0xf] %vm1026_vm2, %v1540_v1  ;;  %v703_v50 = vadd.f32 %v1597_v47, %v317_v61  ;;  %v719_v51 = vadd.f32 %v1613_v48, %v333_v3  ;;  %v701_v59 = vadd.f32 %v612_v62, %v315_v36  ;;  %v717_v60 = vadd.f32 %v676_v63, %v331_v4 }
 0x112   : > { %729 = vst.msk [vmem:[#allocation2 + $0x40] sm:$0xff] %vm269_vm0, %v696_v2  ;;  %745 = vst.msk [vmem:[#allocation2 + $0xc0] sm:$0xff] %vm269_vm0, %v712_v35 }
 0x113   : > { %732 = vst.msk [vmem:[#allocation2 + $0x58] sm:$0xff] %vm269_vm0, %v699_v5  ;;  %748 = vst.msk [vmem:[#allocation2 + $0xd8] sm:$0xff] %vm269_vm0, %v715_v6 }
 0x114   : > { %730 = vst.msk [vmem:[#allocation2 + $0x48] sm:$0xff] %vm269_vm0, %v697_v7  ;;  %746 = vst.msk [vmem:[#allocation2 + $0xc8] sm:$0xff] %vm269_vm0, %v713_v41 }
 0x115   : > { %735 = vst.msk [vmem:[#allocation2 + $0x70] sm:$0xff] %vm269_vm0, %v702_v42  ;;  %751 = vst.msk [vmem:[#allocation2 + $0xf0] sm:$0xff] %vm269_vm0, %v718_v8 }
 0x116   : > { %733 = vst.msk [vmem:[#allocation2 + $0x60] sm:$0xff] %vm269_vm0, %v700_v9  ;;  %749 = vst.msk [vmem:[#allocation2 + $0xe0] sm:$0xff] %vm269_vm0, %v716_v10 }
 0x117   : > { %736 = vst.msk [vmem:[#allocation2 + $0x78] sm:$0xff] %vm269_vm0, %v703_v50  ;;  %752 = vst.msk [vmem:[#allocation2 + $0xf8] sm:$0xff] %vm269_vm0, %v719_v51  ;;  %v766_v11 = vld [vmem:[#allocation2 + $0x50] sm:$0xff] }
 0x118   : > { %734 = vst.msk [vmem:[#allocation2 + $0x68] sm:$0xff] %vm269_vm0, %v701_v59  ;;  %750 = vst.msk [vmem:[#allocation2 + $0xe8] sm:$0xff] %vm269_vm0, %v717_v60  ;;  %v782_v12 = vld [vmem:[#allocation2 + $0xd0] sm:$0xff]  ;;  %v805_v13 = vmul.f32 %v2022_v49, %v766_v11 }
 0x119   : > { %v821_v14 = vmul.f32 %v2022_v49, %v782_v12  ;;  %v764_v15 = vld [vmem:[#allocation2 + $0x40] sm:$0xff] }
 0x11a   : > { %v780_v16 = vld [vmem:[#allocation2 + $0xc0] sm:$0xff]  ;;  %v803_v17 = vmul.f32 %v2022_v49, %v764_v15  ;;  %v767_v19 = vld [vmem:[#allocation2 + $0x58] sm:$0xff]  ;;  %v844_v22 = vadd.f32 %v2027_v54, %v805_v13 }
 0x11b   : > { %v819_v18 = vmul.f32 %v2022_v49, %v780_v16  ;;  %v783_v20 = vld [vmem:[#allocation2 + $0xd8] sm:$0xff]  ;;  %v765_v21 = vld [vmem:[#allocation2 + $0x48] sm:$0xff]  ;;  %v860_v23 = vadd.f32 %v2027_v54, %v821_v14  ;;  %v806_v24 = vmul.f32 %v2022_v49, %v767_v19 }
 0x11c   : > { %v822_v25 = vmul.f32 %v2022_v49, %v783_v20  ;;  %v781_v26 = vld [vmem:[#allocation2 + $0xc8] sm:$0xff]  ;;  %v842_v27 = vadd.f32 %v2027_v54, %v803_v17  ;;  %v804_v29 = vmul.f32 %v2022_v49, %v765_v21  ;;  %v876_v31 = vmax.f32 %v844_v22, 0.0  ;;  %v770_v43 = vld [vmem:[#allocation2 + $0x70] sm:$0xff] }
 0x11d   : > { %v858_v28 = vadd.f32 %v2027_v54, %v819_v18  ;;  %v820_v30 = vmul.f32 %v2022_v49, %v781_v26  ;;  %v892_v32 = vmax.f32 %v860_v23, 0.0  ;;  %v845_v33 = vadd.f32 %v2027_v54, %v806_v24  ;;  %v786_v44 = vld [vmem:[#allocation2 + $0xf0] sm:$0xff]  ;;  %v768_v52 = vld [vmem:[#allocation2 + $0x60] sm:$0xff] }
 0x11e   : > { %v861_v34 = vadd.f32 %v2027_v54, %v822_v25  ;;  %v874_v37 = vmax.f32 %v842_v27, 0.0  ;;  %v843_v39 = vadd.f32 %v2027_v54, %v804_v29  ;;  %v1529_v45 = vpack.c.bf16 %v876_v31, %v876_v31  ;;  %v784_v53 = vld [vmem:[#allocation2 + $0xe0] sm:$0xff]  ;;  %v771_v61 = vld [vmem:[#allocation2 + $0x78] sm:$0xff] }
 0x11f   : > { %v890_v38 = vmax.f32 %v858_v28, 0.0  ;;  %v859_v40 = vadd.f32 %v2027_v54, %v820_v30  ;;  %v1545_v46 = vpack.c.bf16 %v892_v32, %v892_v32  ;;  %v877_v47 = vmax.f32 %v845_v33, 0.0  ;;  %v787_v62 = vld [vmem:[#allocation2 + $0xf8] sm:$0xff]  ;;  %v769_v35 = vld [vmem:[#allocation2 + $0x68] sm:$0xff] }
 0x120   : > { %v893_v48 = vmax.f32 %v861_v34, 0.0  ;;  %v1527_v55 = vpack.c.bf16 %v874_v37, %v874_v37  ;;  %v875_v57 = vmax.f32 %v843_v39, 0.0  ;;  %1037 = vst.msk [vmem:[%s2069_s27 + $0x28] sm:$0xf] %vm1026_vm2, %v1529_v45  ;;  %v809_v1 = vmul.f32 %v2022_v49, %v770_v43  ;;  %v785_v3 = vld [vmem:[#allocation2 + $0xe8] sm:$0xff] }
 0x121   : > { %v1543_v56 = vpack.c.bf16 %v890_v38, %v890_v38  ;;  %v891_v58 = vmax.f32 %v859_v40, 0.0  ;;  %1053 = vst.msk [vmem:[%s2069_s27 + $0x68] sm:$0xf] %vm1026_vm2, %v1545_v46  ;;  %v1530_v63 = vpack.c.bf16 %v877_v47, %v877_v47  ;;  %v825_v2 = vmul.f32 %v2022_v49, %v786_v44 }
 0x122   : > { %v1546_v0 = vpack.c.bf16 %v893_v48, %v893_v48  ;;  %1035 = vst.msk [vmem:[%s2069_s27 + $0x20] sm:$0xf] %vm1026_vm2, %v1527_v55  ;;  %v1528_v36 = vpack.c.bf16 %v875_v57, %v875_v57  ;;  %v807_v5 = vmul.f32 %v2022_v49, %v768_v52  ;;  %v823_v6 = vmul.f32 %v2022_v49, %v784_v53 }
 0x123   : > { %1051 = vst.msk [vmem:[%s2069_s27 + $0x60] sm:$0xf] %vm1026_vm2, %v1543_v56  ;;  %v1544_v4 = vpack.c.bf16 %v891_v58, %v891_v58  ;;  %1038 = vst.msk [vmem:[%s2069_s27 + $0x2c] sm:$0xf] %vm1026_vm2, %v1530_v63  ;;  %v848_v7 = vadd.f32 %v2027_v54, %v809_v1  ;;  %v864_v41 = vadd.f32 %v2027_v54, %v825_v2 }
 0x124   : > { %1054 = vst.msk [vmem:[%s2069_s27 + $0x6c] sm:$0xf] %vm1026_vm2, %v1546_v0  ;;  %v810_v42 = vmul.f32 %v2022_v49, %v771_v61  ;;  %v826_v8 = vmul.f32 %v2022_v49, %v787_v62  ;;  %1036 = vst.msk [vmem:[%s2069_s27 + $0x24] sm:$0xf] %vm1026_vm2, %v1528_v36  ;;  %v846_v9 = vadd.f32 %v2027_v54, %v807_v5 }
 0x125   : > { %1052 = vst.msk [vmem:[%s2069_s27 + $0x64] sm:$0xf] %vm1026_vm2, %v1544_v4  ;;  %v862_v10 = vadd.f32 %v2027_v54, %v823_v6  ;;  %v808_v50 = vmul.f32 %v2022_v49, %v769_v35  ;;  %v824_v51 = vmul.f32 %v2022_v49, %v785_v3  ;;  %v880_v59 = vmax.f32 %v848_v7, 0.0 }
 0x126   : > { %v896_v60 = vmax.f32 %v864_v41, 0.0  ;;  %v849_v11 = vadd.f32 %v2027_v54, %v810_v42  ;;  %v865_v12 = vadd.f32 %v2027_v54, %v826_v8  ;;  %v878_v13 = vmax.f32 %v846_v9, 0.0 }
 0x127   : > { %v894_v14 = vmax.f32 %v862_v10, 0.0  ;;  %v847_v15 = vadd.f32 %v2027_v54, %v808_v50  ;;  %v863_v16 = vadd.f32 %v2027_v54, %v824_v51  ;;  %v1533_v17 = vpack.c.bf16 %v880_v59, %v880_v59  ;;  %1065 = sbr.rel (!%p1909_p3) target bundleno = 372 (0x174), region = 48 }
 0x128   : > { %v1549_v18 = vpack.c.bf16 %v896_v60, %v896_v60  ;;  %v881_v49 = vmax.f32 %v849_v11, 0.0  ;;  %v897_v19 = vmax.f32 %v865_v12, 0.0  ;;  %v1531_v20 = vpack.c.bf16 %v878_v13, %v878_v13 }
 0x129   : > { %v1547_v21 = vpack.c.bf16 %v894_v14, %v894_v14  ;;  %v879_v22 = vmax.f32 %v847_v15, 0.0  ;;  %v895_v23 = vmax.f32 %v863_v16, 0.0  ;;  %1041 = vst.msk [vmem:[%s2069_s27 + $0x38] sm:$0xf] %vm1026_vm2, %v1533_v17 }
 0x12a   : > { %1057 = vst.msk [vmem:[%s2069_s27 + $0x78] sm:$0xf] %vm1026_vm2, %v1549_v18  ;;  %v1534_v24 = vpack.c.bf16 %v881_v49, %v881_v49  ;;  %v1550_v25 = vpack.c.bf16 %v897_v19, %v897_v19  ;;  %1039 = vst.msk [vmem:[%s2069_s27 + $0x30] sm:$0xf] %vm1026_vm2, %v1531_v20 }
 0x12b   : > { %1055 = vst.msk [vmem:[%s2069_s27 + $0x70] sm:$0xf] %vm1026_vm2, %v1547_v21  ;;  %v1532_v54 = vpack.c.bf16 %v879_v22, %v879_v22  ;;  %v1548_v26 = vpack.c.bf16 %v895_v23, %v895_v23 }
 0x12c   : > { %1042 = vst.msk [vmem:[%s2069_s27 + $0x3c] sm:$0xf] %vm1026_vm2, %v1534_v24  ;;  %1058 = vst.msk [vmem:[%s2069_s27 + $0x7c] sm:$0xf] %vm1026_vm2, %v1550_v25 }
 0x12d   : > { %1040 = vst.msk [vmem:[%s2069_s27 + $0x34] sm:$0xf] %vm1026_vm2, %v1532_v54  ;;  %1056 = vst.msk [vmem:[%s2069_s27 + $0x74] sm:$0xf] %vm1026_vm2, %v1548_v26 }
 0x12e   : > { %s2367_s29 = smov (!%p1068_p9, %s1067_s29), 32 }
 0x12f   : > { %s1504_s8 = sshll.u32 %s2367_s29, 6 }
 0x130   : > { %p1507_p10 = scmp.eq.s32.totalorder %s1504_s8, 0 }
 0x131   : > { %s2224_s9 = sshrl.u32 (!%p1507_p10), %s2367_s29, 5 }
 0x132   : > { %1076 = sbr.rel (%p1507_p10) target bundleno = 372 (0x174), region = 52  ;;  %p1508_p11 = scmp.le.s32.totalorder (!%p1507_p10), %s2224_s9, 0 }
 0x139   : > { %1362 = sbr.rel (%p1508_p11) target bundleno = 351 (0x15f), region = 127  ;;  %s2357_s17 = smov (!%p1508_p11), %s2218_s7 }
 0x13a   : > { %s2358_s23 = smov (!%p1508_p11), %s2069_s27  ;;  %s2233_s28 = smov (!%p1508_p11), 0  }
 0x13b   : > { %s2235_s10 = smov (!%p1508_p11), 0  }
 0x140 LB: >> { %v1092_v27 = vld [vmem:[%s1825_s23] sm:$0xf]  ;;  %v1094_v28 = vld [vmem:[%s1825_s23 + $0x4] sm:$0xf]  ;;  %v1096_v29 = vld [vmem:[%s1825_s23 + $0x8] sm:$0xf]  ;;  %s1833_s10 = sphi %s2235_s10, %s1086_s10   ;;  %s1829_s28 = sphi %s2233_s28, %s2359_s28   ;;  %s1825_s23 = sphi %s2358_s23, %s1161_s23   ;;  %s1821_s17 = sphi %s2357_s17, %s1162_s17  }
 0x141   : >> { %1093 = vst [vmem:[%s1821_s17] sm:$0xf] %v1092_v27  ;;  %1095 = vst [vmem:[%s1821_s17 + $0x4] sm:$0xf] %v1094_v28  ;;  %v1098_v30 = vld [vmem:[%s1825_s23 + $0xc] sm:$0xf]  ;;  %s1156_s11 = sadd.s32 1, %s1829_s28 }
 0x142   : >> { %1097 = vst [vmem:[%s1821_s17 + $0x8] sm:$0xf] %v1096_v29  ;;  %v1100_v31 = vld [vmem:[%s1825_s23 + $0x10] sm:$0xf]  ;;  %v1102_v32 = vld [vmem:[%s1825_s23 + $0x14] sm:$0xf]  ;;  %p1157_p12 = scmp.ge.s32.totalorder %s1156_s11, %s2224_s9 }
 0x143   : >> { %1099 = vst [vmem:[%s1821_s17 + $0xc] sm:$0xf] %v1098_v30  ;;  %1101 = vst [vmem:[%s1821_s17 + $0x10] sm:$0xf] %v1100_v31  ;;  %v1104_v33 = vld [vmem:[%s1825_s23 + $0x18] sm:$0xf] }
 0x144   : >> { %1103 = vst [vmem:[%s1821_s17 + $0x14] sm:$0xf] %v1102_v32  ;;  %v1106_v34 = vld [vmem:[%s1825_s23 + $0x1c] sm:$0xf]  ;;  %v1108_v37 = vld [vmem:[%s1825_s23 + $0x20] sm:$0xf] }
 0x145   : >> { %1105 = vst [vmem:[%s1821_s17 + $0x18] sm:$0xf] %v1104_v33  ;;  %1107 = vst [vmem:[%s1821_s17 + $0x1c] sm:$0xf] %v1106_v34  ;;  %v1110_v38 = vld [vmem:[%s1825_s23 + $0x24] sm:$0xf] }
 0x146   : >> { %1109 = vst [vmem:[%s1821_s17 + $0x20] sm:$0xf] %v1108_v37  ;;  %v1112_v39 = vld [vmem:[%s1825_s23 + $0x28] sm:$0xf]  ;;  %v1114_v40 = vld [vmem:[%s1825_s23 + $0x2c] sm:$0xf] }
 0x147   : >> { %1111 = vst [vmem:[%s1821_s17 + $0x24] sm:$0xf] %v1110_v38  ;;  %1113 = vst [vmem:[%s1821_s17 + $0x28] sm:$0xf] %v1112_v39  ;;  %v1116_v43 = vld [vmem:[%s1825_s23 + $0x30] sm:$0xf] }
 0x148   : >> { %1115 = vst [vmem:[%s1821_s17 + $0x2c] sm:$0xf] %v1114_v40  ;;  %v1118_v44 = vld [vmem:[%s1825_s23 + $0x34] sm:$0xf]  ;;  %v1120_v45 = vld [vmem:[%s1825_s23 + $0x38] sm:$0xf] }
 0x149   : >> { %1117 = vst [vmem:[%s1821_s17 + $0x30] sm:$0xf] %v1116_v43  ;;  %1119 = vst [vmem:[%s1821_s17 + $0x34] sm:$0xf] %v1118_v44  ;;  %v1122_v46 = vld [vmem:[%s1825_s23 + $0x3c] sm:$0xf] }
 0x14a   : >> { %1121 = vst [vmem:[%s1821_s17 + $0x38] sm:$0xf] %v1120_v45  ;;  %v1124_v47 = vld [vmem:[%s1825_s23 + $0x40] sm:$0xf]  ;;  %v1126_v48 = vld [vmem:[%s1825_s23 + $0x44] sm:$0xf] }
 0x14b   : >> { %1123 = vst [vmem:[%s1821_s17 + $0x3c] sm:$0xf] %v1122_v46  ;;  %1125 = vst [vmem:[%s1821_s17 + $0x40] sm:$0xf] %v1124_v47  ;;  %v1128_v52 = vld [vmem:[%s1825_s23 + $0x48] sm:$0xf] }
 0x14c   : >> { %1127 = vst [vmem:[%s1821_s17 + $0x44] sm:$0xf] %v1126_v48  ;;  %v1130_v53 = vld [vmem:[%s1825_s23 + $0x4c] sm:$0xf]  ;;  %v1132_v55 = vld [vmem:[%s1825_s23 + $0x50] sm:$0xf] }
 0x14d   : >> { %1129 = vst [vmem:[%s1821_s17 + $0x48] sm:$0xf] %v1128_v52  ;;  %1131 = vst [vmem:[%s1821_s17 + $0x4c] sm:$0xf] %v1130_v53  ;;  %v1134_v56 = vld [vmem:[%s1825_s23 + $0x54] sm:$0xf] }
 0x14e   : >> { %1133 = vst [vmem:[%s1821_s17 + $0x50] sm:$0xf] %v1132_v55  ;;  %v1136_v57 = vld [vmem:[%s1825_s23 + $0x58] sm:$0xf]  ;;  %v1138_v58 = vld [vmem:[%s1825_s23 + $0x5c] sm:$0xf] }
 0x14f   : >> { %1135 = vst [vmem:[%s1821_s17 + $0x54] sm:$0xf] %v1134_v56  ;;  %1137 = vst [vmem:[%s1821_s17 + $0x58] sm:$0xf] %v1136_v57  ;;  %v1140_v61 = vld [vmem:[%s1825_s23 + $0x60] sm:$0xf] }
 0x150   : >> { %1139 = vst [vmem:[%s1821_s17 + $0x5c] sm:$0xf] %v1138_v58  ;;  %v1142_v62 = vld [vmem:[%s1825_s23 + $0x64] sm:$0xf]  ;;  %v1144_v63 = vld [vmem:[%s1825_s23 + $0x68] sm:$0xf] }
 0x151   : >> { %1141 = vst [vmem:[%s1821_s17 + $0x60] sm:$0xf] %v1140_v61  ;;  %1143 = vst [vmem:[%s1821_s17 + $0x64] sm:$0xf] %v1142_v62  ;;  %v1146_v0 = vld [vmem:[%s1825_s23 + $0x6c] sm:$0xf] }
 0x152   : >> { %1145 = vst [vmem:[%s1821_s17 + $0x68] sm:$0xf] %v1144_v63  ;;  %v1148_v1 = vld [vmem:[%s1825_s23 + $0x70] sm:$0xf]  ;;  %v1150_v2 = vld [vmem:[%s1825_s23 + $0x74] sm:$0xf] }
 0x153   : >> { %1147 = vst [vmem:[%s1821_s17 + $0x6c] sm:$0xf] %v1146_v0  ;;  %1149 = vst [vmem:[%s1821_s17 + $0x70] sm:$0xf] %v1148_v1  ;;  %v1152_v35 = vld [vmem:[%s1825_s23 + $0x78] sm:$0xf] }
 0x154   : >> { %1151 = vst [vmem:[%s1821_s17 + $0x74] sm:$0xf] %v1150_v2  ;;  %v1154_v3 = vld [vmem:[%s1825_s23 + $0x7c] sm:$0xf]  ;;  %1153 = vst [vmem:[%s1821_s17 + $0x78] sm:$0xf] %v1152_v35 }
 0x155   : >> { %1155 = vst [vmem:[%s1821_s17 + $0x7c] sm:$0xf] %v1154_v3  ;;  %s2369_s11 = smov (%p1157_p12, %s1156_s11), 0  ;;  %s1086_s10 = sadd.s32 1, %s1833_s10  }
 0x156   : >> { %s1509_s12 = sshll.u32 %s2369_s11, 7  ;;  %p1085_p13 = scmp.ge.s32.totalorder %s1086_s10, %s2224_s9 }
 0x157   : >> { %s1161_s23 = scalar_lea.vmem %s2069_s27, %s1509_s12 [#allocation3]   ;;  %s1162_s17 = scalar_lea.vmem %s2218_s7, %s1509_s12  }
 0x158   : >> { %s2359_s28 = smov %s2369_s11  ;;  %1088 = sbr.rel (!%p1085_p13) target bundleno = 320 (0x140), region = 133 }
 0x15f PF: > { %s2328_s13 = sand.u32 31, %s2367_s29   ;;  %s1552_s14 = sshll.u32 %s2224_s9, 7 }
 0x160   : > { %s1167_s20 = scalar_lea.vmem %s2069_s27, %s1552_s14 [#allocation3]   ;;  %s1169_s22 = scalar_lea.vmem %s2218_s7, %s1552_s14  }
 0x161   : > { %p1514_p0 = scmp.le.s32.totalorder %s2328_s13, 0 }
 0x162   : > { %s1835_s24 = smov (!%p1514_p0), %s1169_s22   ;;  %s1839_s26 = smov (!%p1514_p0), %s1167_s20  }
 0x163   : > { %1376 = sbr.rel (%p1514_p0) target bundleno = 372 (0x174), region = 138  ;;  %s1843_s15 = smov (!%p1514_p0), 0  }
 0x164   : > { %s1847_s30 = smov (!%p1514_p0), 0  }
 0x16a LB: >> { %v1179_v36 = vld [vmem:[%s1841_s26] sm:$0xf]  ;;  %s1181_s29 = sadd.s32 1, %s1845_s15  ;;  %s1173_s30 = sadd.s32 1, %s1849_s30   ;;  %s1849_s30 = sphi %s1847_s30, %s1173_s30   ;;  %s1845_s15 = sphi %s1843_s15, %s1844_s15   ;;  %s1841_s26 = sphi %s1839_s26, %s1186_s26   ;;  %s1837_s24 = sphi %s1835_s24, %s1187_s24  }
 0x16b   : >> { %1180 = vst [vmem:[%s1837_s24] sm:$0xf] %v1179_v36  ;;  %p1182_p1 = scmp.ge.s32.totalorder %s1181_s29, %s2328_s13  ;;  %p1172_p2 = scmp.ge.s32.totalorder %s1173_s30, %s2328_s13 }
 0x16d   : >> { %s2371_s29 = smov (%p1182_p1, %s1181_s29), 0  ;;  %1175 = sbr.rel (!%p1172_p2) target bundleno = 362 (0x16a), region = 144 }
 0x16e   : >> { %s1515_s27 = sshll.u32 %s2371_s29, 2  ;;  %s1844_s15 = smov %s2371_s29  }
 0x16f   : >> { %s1186_s26 = scalar_lea.vmem %s1167_s20, %s1515_s27 [#allocation3]   ;;  %s1187_s24 = scalar_lea.vmem %s1169_s22, %s1515_s27  }
 0x174 PF: > { %s14_s19 = sadd.s32 1, %s1817_s19   ;;  %s2360_s15 = smov %s1805_s16 }
 0x175   : > { %p11_p3 = scmp.ge.s32.totalorder %s14_s19, 7   ;;  %s2361_s16 = smov %s1918_s25 }
 0x176   : > { %s2362_s17 = smov %s1813_s18  ;;  %s2363_s18 = smov %s2365_s21 }
 0x177   :  { %13 = sbr.rel (!%p11_p3) target bundleno = 3 (0x3), region = 155 }

// kernel: dqn_forward.5
= control target key start
LH: loop header
LB: loop body
LE: loop exit
PB: predicated region body
PF: predicated region fallthrough
CT: control target
= control target key end

     0   :  { %vm22_vm0 = vcmask 523264   ;;  %vm1174_vm1 = vcmask 519168   ;;  %s2119_s1 = inlined_call_operand.vmem [shape: bf16[512,64], index: 1, kind: input, shape index: {}]   ;;  %s2120_s0 = inlined_call_operand.vmem [shape: bf16[200,512], index: 0, kind: input, shape index: {}]   ;;  %s2121_s2 = inlined_call_operand.vmem [shape: f32[1,64], index: 2, kind: input, shape index: {}]   ;;  %s2122_s3 = inlined_call_operand.vmem [shape: f32[1,64], index: 3, kind: input, shape index: {}]   ;;  %s2123_s4 = inlined_call_operand.vmem [shape: bf16[200,64], index: 4, kind: output, shape index: {}]  }
   0x1   :  { %v1529_v0 = vld [vmem:[%s2119_s1 + $0x40] sm:$0xff]   ;;  %v1533_v4 = vld [vmem:[%s2119_s1 + $0x48] sm:$0xff]   ;;  %v1537_v8 = vld [vmem:[%s2119_s1 + $0x50] sm:$0xff]  }
   0x2   :  { %v1530_v1 = vld [vmem:[%s2119_s1 + $0xc0] sm:$0xff]   ;;  %1340 = vmatprep.subr.bf16.mxu0 %v1529_v0  ;;  %v1534_v5 = vld [vmem:[%s2119_s1 + $0xc8] sm:$0xff]   ;;  %v1538_v9 = vld [vmem:[%s2119_s1 + $0xd0] sm:$0xff]  }
   0x3   :  { %v1531_v2 = vld [vmem:[%s2119_s1] sm:$0xff]   ;;  %1434 = vmatprep.subr.bf16.mxu1 %v1530_v1  ;;  %v1535_v6 = vld [vmem:[%s2119_s1 + $0x8] sm:$0xff]   ;;  %v1539_v10 = vld [vmem:[%s2119_s1 + $0x10] sm:$0xff]  }
   0x4   :  { %v1532_v3 = vld [vmem:[%s2119_s1 + $0x80] sm:$0xff]   ;;  %1341 = vmatpush3.bf16.msra.mxu0 %v1531_v2  ;;  %v1536_v7 = vld [vmem:[%s2119_s1 + $0x88] sm:$0xff]   ;;  %v1540_v11 = vld [vmem:[%s2119_s1 + $0x90] sm:$0xff]  }
   0x5   :  { %1435 = vmatpush3.bf16.msra.mxu1 %v1532_v3  ;;  %1342 = vmatprep.subr.bf16.mxu0 %v1533_v4  ;;  %v1541_v12 = vld [vmem:[%s2119_s1 + $0x58] sm:$0xff]   ;;  %v1545_v16 = vld [vmem:[%s2119_s1 + $0x60] sm:$0xff]   ;;  %v1549_v20 = vld [vmem:[%s2119_s1 + $0x68] sm:$0xff]  }
   0x6   :  { %1436 = vmatprep.subr.bf16.mxu1 %v1534_v5  ;;  %v1542_v13 = vld [vmem:[%s2119_s1 + $0xd8] sm:$0xff]   ;;  %v1546_v17 = vld [vmem:[%s2119_s1 + $0xe0] sm:$0xff]   ;;  %v1550_v21 = vld [vmem:[%s2119_s1 + $0xe8] sm:$0xff]  }
   0x7   :  { %v1543_v14 = vld [vmem:[%s2119_s1 + $0x18] sm:$0xff]   ;;  %v1547_v18 = vld [vmem:[%s2119_s1 + $0x20] sm:$0xff]   ;;  %v1551_v22 = vld [vmem:[%s2119_s1 + $0x28] sm:$0xff]  }
   0x8   :  { %1343 = vmatpush3.bf16.msra.mxu0 %v1535_v6  ;;  %v1544_v15 = vld [vmem:[%s2119_s1 + $0x98] sm:$0xff]   ;;  %v1548_v19 = vld [vmem:[%s2119_s1 + $0xa0] sm:$0xff]   ;;  %v1552_v23 = vld [vmem:[%s2119_s1 + $0xa8] sm:$0xff]  }
   0x9   :  { %1437 = vmatpush3.bf16.msra.mxu1 %v1536_v7  ;;  %1344 = vmatprep.subr.bf16.mxu0 %v1537_v8  ;;  %v1553_v24 = vld [vmem:[%s2119_s1 + $0x70] sm:$0xff]   ;;  %v1557_v28 = vld [vmem:[%s2119_s1 + $0x78] sm:$0xff]  }
   0xa   :  { %1438 = vmatprep.subr.bf16.mxu1 %v1538_v9  ;;  %v1554_v25 = vld [vmem:[%s2119_s1 + $0xf0] sm:$0xff]   ;;  %v1558_v29 = vld [vmem:[%s2119_s1 + $0xf8] sm:$0xff]  }
   0xb   :  { %v1555_v26 = vld [vmem:[%s2119_s1 + $0x30] sm:$0xff]   ;;  %v1559_v30 = vld [vmem:[%s2119_s1 + $0x38] sm:$0xff]  }
   0xc   :  { %1345 = vmatpush3.bf16.msra.mxu0 %v1539_v10  ;;  %v1556_v27 = vld [vmem:[%s2119_s1 + $0xb0] sm:$0xff]   ;;  %v1560_v31 = vld [vmem:[%s2119_s1 + $0xb8] sm:$0xff]  }
   0xd   :  { %1439 = vmatpush3.bf16.msra.mxu1 %v1540_v11  ;;  %1346 = vmatprep.subr.bf16.mxu0 %v1541_v12  ;;  %v1561_v32 = vld [vmem:[%s2120_s0] ss:$16 sps:$4 sm:$0xff]   ;;  %v1563_v33 = vld [vmem:[%s2120_s0 + $0x4] ss:$16 sps:$4 sm:$0xff]   ;;  %v1564_v34 = vld [vmem:[%s2120_s0 + $0x8] ss:$16 sps:$4 sm:$0xff]  }
   0xe   :  { %1440 = vmatprep.subr.bf16.mxu1 %v1542_v13  ;;  %v1566_v35 = vld [vmem:[%s2120_s0 + $0xc] ss:$16 sps:$4 sm:$0xff]   ;;  %665 = vmatprep.mubr.bf16.mxu0 %v1563_v33  ;;  %v1567_v36 = vld [vmem:[%s2120_s0 + $0x24] ss:$16 sps:$4 sm:$0xff]   ;;  %v1571_v38 = vld [vmem:[%s2120_s0 + $0x20] ss:$16 sps:$4 sm:$0xff]  }
   0xf   :  { %801 = vmatprep.mubr.bf16.mxu1 %v1566_v35  ;;  %v1569_v37 = vld [vmem:[%s2120_s0 + $0x2c] ss:$16 sps:$4 sm:$0xff]   ;;  %v1572_v39 = vld [vmem:[%s2120_s0 + $0x28] ss:$16 sps:$4 sm:$0xff]   ;;  %v1573_v40 = vld [vmem:[%s2120_s0 + $0x44] ss:$16 sps:$4 sm:$0xff]  }
  0x10   :  { %1347 = vmatpush3.bf16.msra.mxu0 %v1543_v14  ;;  %v1575_v41 = vld [vmem:[%s2120_s0 + $0x4c] ss:$16 sps:$4 sm:$0xff]   ;;  %v1577_v42 = vld [vmem:[%s2120_s0 + $0x40] ss:$16 sps:$4 sm:$0xff]   ;;  %v1578_v43 = vld [vmem:[%s2120_s0 + $0x48] ss:$16 sps:$4 sm:$0xff]  }
  0x11   :  { %1441 = vmatpush3.bf16.msra.mxu1 %v1544_v15  ;;  %1348 = vmatprep.subr.bf16.mxu0 %v1545_v16  ;;  %v1579_v44 = vld [vmem:[%s2120_s0 + $0x64] ss:$16 sps:$4 sm:$0xff]   ;;  %v1581_v45 = vld [vmem:[%s2120_s0 + $0x6c] ss:$16 sps:$4 sm:$0xff]   ;;  %v1583_v46 = vld [vmem:[%s2120_s0 + $0x60] ss:$16 sps:$4 sm:$0xff]  }
  0x12   :  { %1442 = vmatprep.subr.bf16.mxu1 %v1546_v17  ;;  %v1584_v47 = vld [vmem:[%s2120_s0 + $0x68] ss:$16 sps:$4 sm:$0xff]   ;;  %v1585_v48 = vld [vmem:[%s2120_s0 + $0x84] ss:$16 sps:$4 sm:$0xff]   ;;  %v1587_v49 = vld [vmem:[%s2120_s0 + $0x8c] ss:$16 sps:$4 sm:$0xff]  }
  0x13   :  { %v1589_v50 = vld [vmem:[%s2120_s0 + $0x80] ss:$16 sps:$4 sm:$0xff]   ;;  %v1590_v51 = vld [vmem:[%s2120_s0 + $0x88] ss:$16 sps:$4 sm:$0xff]   ;;  %v1591_v52 = vld [vmem:[%s2120_s0 + $0xa4] ss:$16 sps:$4 sm:$0xff]  }
  0x14   :  { %1349 = vmatpush3.bf16.msra.mxu0 %v1547_v18  ;;  %v1593_v53 = vld [vmem:[%s2120_s0 + $0xac] ss:$16 sps:$4 sm:$0xff]   ;;  %v1595_v54 = vld [vmem:[%s2120_s0 + $0xa0] ss:$16 sps:$4 sm:$0xff]   ;;  %v1596_v55 = vld [vmem:[%s2120_s0 + $0xa8] ss:$16 sps:$4 sm:$0xff]  }
  0x15   :  { %1443 = vmatpush3.bf16.msra.mxu1 %v1548_v19  ;;  %1350 = vmatprep.subr.bf16.mxu0 %v1549_v20  ;;  %v1597_v56 = vld [vmem:[%s2120_s0 + $0xc4] ss:$16 sps:$4 sm:$0xff]   ;;  %v1599_v57 = vld [vmem:[%s2120_s0 + $0xcc] ss:$16 sps:$4 sm:$0xff]   ;;  %v1601_v58 = vld [vmem:[%s2120_s0 + $0xc0] ss:$16 sps:$4 sm:$0xff]  }
  0x16   :  { %1444 = vmatprep.subr.bf16.mxu1 %v1550_v21  ;;  %v1602_v59 = vld [vmem:[%s2120_s0 + $0xc8] ss:$16 sps:$4 sm:$0xff]   ;;  %v1603_v60 = vld [vmem:[%s2120_s0 + $0xe4] ss:$16 sps:$4 sm:$0xff]   ;;  %v1605_v61 = vld [vmem:[%s2120_s0 + $0xec] ss:$16 sps:$4 sm:$0xff]  }
  0x17   :  { %v1607_v62 = vld [vmem:[%s2120_s0 + $0xe0] ss:$16 sps:$4 sm:$0xff]   ;;  %v1608_v63 = vld [vmem:[%s2120_s0 + $0xe8] ss:$16 sps:$4 sm:$0xff]   ;;  %v1609_v0 = vld [vmem:[%s2120_s0 + $0x104] ss:$16 sps:$4 sm:$0xff]  }
  0x18   :  { %1351 = vmatpush3.bf16.msra.mxu0 %v1551_v22  ;;  %v1611_v1 = vld [vmem:[%s2120_s0 + $0x10c] ss:$16 sps:$4 sm:$0xff]   ;;  %v1613_v2 = vld [vmem:[%s2120_s0 + $0x100] ss:$16 sps:$4 sm:$0xff]   ;;  %v1614_v3 = vld [vmem:[%s2120_s0 + $0x108] ss:$16 sps:$4 sm:$0xff]  }
  0x19   :  { %1445 = vmatpush3.bf16.msra.mxu1 %v1552_v23  ;;  %1352 = vmatprep.subr.bf16.mxu0 %v1553_v24  ;;  %v1615_v4 = vld [vmem:[%s2120_s0 + $0x124] ss:$16 sps:$4 sm:$0xff]   ;;  %v1617_v5 = vld [vmem:[%s2120_s0 + $0x12c] ss:$16 sps:$4 sm:$0xff]   ;;  %v1619_v6 = vld [vmem:[%s2120_s0 + $0x120] ss:$16 sps:$4 sm:$0xff]  }
  0x1a   :  { %1446 = vmatprep.subr.bf16.mxu1 %v1554_v25  ;;  %v1620_v7 = vld [vmem:[%s2120_s0 + $0x128] ss:$16 sps:$4 sm:$0xff]   ;;  %v1621_v8 = vld [vmem:[%s2120_s0 + $0x144] ss:$16 sps:$4 sm:$0xff]   ;;  %v1623_v9 = vld [vmem:[%s2120_s0 + $0x14c] ss:$16 sps:$4 sm:$0xff]  }
  0x1b   :  { %v1625_v10 = vld [vmem:[%s2120_s0 + $0x140] ss:$16 sps:$4 sm:$0xff]   ;;  %v1626_v11 = vld [vmem:[%s2120_s0 + $0x148] ss:$16 sps:$4 sm:$0xff]   ;;  %v1627_v12 = vld [vmem:[%s2120_s0 + $0x164] ss:$16 sps:$4 sm:$0xff]  }
  0x1c   :  { %1353 = vmatpush3.bf16.msra.mxu0 %v1555_v26  ;;  %v1629_v13 = vld [vmem:[%s2120_s0 + $0x16c] ss:$16 sps:$4 sm:$0xff]   ;;  %v121_v14 = vld [vmem:[%s2120_s0 + $0x180] sm:$0xff]  ;;  %v1637_v15 = vmov 0.0   ;;  %v1632_v18 = vld [vmem:[%s2120_s0 + $0x168] ss:$16 sps:$4 sm:$0xff]  }
  0x1d   :  { %1447 = vmatpush3.bf16.msra.mxu1 %v1556_v27  ;;  %1354 = vmatprep.subr.bf16.mxu0 %v1557_v28  ;;  %23 = vst.msk [vmem:[#allocation2] sm:$0xff] %vm22_vm0, %v1637_v15  ;;  %24 = vst.msk [vmem:[#allocation2 + $0x8] sm:$0xff] %vm22_vm0, %v1637_v15  ;;  %v122_v16 = vld [vmem:[%s2120_s0 + $0x188] sm:$0xff]  ;;  %v1631_v17 = vld [vmem:[%s2120_s0 + $0x160] ss:$16 sps:$4 sm:$0xff]   ;;  %v1253_v19 = vcombine.high %v121_v14, %v121_v14  ;;  %v1252_v21 = vcombine.low %v121_v14, %v121_v14 }
  0x1e   :  { %1448 = vmatprep.subr.bf16.mxu1 %v1558_v29  ;;  %25 = vst.msk [vmem:[#allocation2 + $0x10] sm:$0xff] %vm22_vm0, %v1637_v15  ;;  %26 = vst.msk [vmem:[#allocation2 + $0x18] sm:$0xff] %vm22_vm0, %v1637_v15  ;;  %v1255_v20 = vcombine.high %v122_v16, %v122_v16  ;;  %v1254_v22 = vcombine.low %v122_v16, %v122_v16 }
  0x1f   :  { %27 = vst.msk [vmem:[#allocation2 + $0x20] sm:$0xff] %vm22_vm0, %v1637_v15  ;;  %28 = vst.msk [vmem:[#allocation2 + $0x28] sm:$0xff] %vm22_vm0, %v1637_v15 }
  0x20   :  { %1355 = vmatpush3.bf16.msra.mxu0 %v1559_v30  ;;  %29 = vst.msk [vmem:[#allocation2 + $0x30] sm:$0xff] %vm22_vm0, %v1637_v15  ;;  %30 = vst.msk [vmem:[#allocation2 + $0x38] sm:$0xff] %vm22_vm0, %v1637_v15 }
  0x21   :  { %1449 = vmatpush3.bf16.msra.mxu1 %v1560_v31  ;;  %31 = vst.msk [vmem:[#allocation2 + $0x40] sm:$0xff] %vm22_vm0, %v1637_v15  ;;  %32 = vst.msk [vmem:[#allocation2 + $0x48] sm:$0xff] %vm22_vm0, %v1637_v15 }
  0x22   :  { %33 = vst.msk [vmem:[#allocation2 + $0x50] sm:$0xff] %vm22_vm0, %v1637_v15  ;;  %34 = vst.msk [vmem:[#allocation2 + $0x58] sm:$0xff] %vm22_vm0, %v1637_v15 }
  0x23   :  { %666 = vmatmul.mubr.bf16.vlgmr.msra.gmra.mrb[0].mxu0 %v1561_v32  ;;  %35 = vst.msk [vmem:[#allocation2 + $0x60] sm:$0xff] %vm22_vm0, %v1637_v15  ;;  %36 = vst.msk [vmem:[#allocation2 + $0x68] sm:$0xff] %vm22_vm0, %v1637_v15 }
  0x24   :  { %802 = vmatmul.mubr.bf16.vlgmr.msra.gmra.mrb[0].mxu1 %v1564_v34  ;;  %673 = vmatprep.mubr.bf16.mxu0 %v1567_v36  ;;  %37 = vst.msk [vmem:[#allocation2 + $0x70] sm:$0xff] %vm22_vm0, %v1637_v15  ;;  %38 = vst.msk [vmem:[#allocation2 + $0x78] sm:$0xff] %vm22_vm0, %v1637_v15  ;;  %v48_v32 = vld [vmem:[#allocation2] sm:$0xff] }
  0x25   :  { %809 = vmatprep.mubr.bf16.mxu1 %v1569_v37  ;;  %39 = vst.msk [vmem:[#allocation2 + $0x80] sm:$0xff] %vm22_vm0, %v1637_v15  ;;  %40 = vst.msk [vmem:[#allocation2 + $0x88] sm:$0xff] %vm22_vm0, %v1637_v15  ;;  %v49_v37 = vld [vmem:[#allocation2 + $0x8] sm:$0xff] }
  0x26   :  { %41 = vst.msk [vmem:[#allocation2 + $0x90] sm:$0xff] %vm22_vm0, %v1637_v15  ;;  %42 = vst.msk [vmem:[#allocation2 + $0x98] sm:$0xff] %vm22_vm0, %v1637_v15 }
  0x27   :  { %43 = vst.msk [vmem:[#allocation2 + $0xa0] sm:$0xff] %vm22_vm0, %v1637_v15  ;;  %44 = vst.msk [vmem:[#allocation2 + $0xa8] sm:$0xff] %vm22_vm0, %v1637_v15 }
  0x28   :  { %45 = vst.msk [vmem:[#allocation2 + $0xb0] sm:$0xff] %vm22_vm0, %v1637_v15  ;;  %46 = vst.msk [vmem:[#allocation2 + $0xb8] sm:$0xff] %vm22_vm0, %v1637_v15 }
  0x29   :  { %47 = vst.msk [vmem:[#allocation2 + $0xc0] sm:$0xff] %vm22_vm0, %v1637_v15 }
  0x2b   :  { %674 = vmatmul.mubr.bf16.gmra.mrb[4].mxu0 %v1571_v38 }
  0x2c   :  { %810 = vmatmul.mubr.bf16.gmra.mrb[4].mxu1 %v1572_v39  ;;  %681 = vmatprep.mubr.bf16.mxu0 %v1573_v40 }
  0x2d   :  { %817 = vmatprep.mubr.bf16.mxu1 %v1575_v41 }
  0x33   :  { %682 = vmatmul.mubr.bf16.gmra.mrb[8].mxu0 %v1577_v42 }
  0x34   :  { %818 = vmatmul.mubr.bf16.gmra.mrb[8].mxu1 %v1578_v43  ;;  %689 = vmatprep.mubr.bf16.mxu0 %v1579_v44 }
  0x35   :  { %825 = vmatprep.mubr.bf16.mxu1 %v1581_v45 }
  0x3b   :  { %690 = vmatmul.mubr.bf16.gmra.mrb[12].mxu0 %v1583_v46 }
  0x3c   :  { %826 = vmatmul.mubr.bf16.gmra.mrb[12].mxu1 %v1584_v47  ;;  %697 = vmatprep.mubr.bf16.mxu0 %v1585_v48 }
  0x3d   :  { %833 = vmatprep.mubr.bf16.mxu1 %v1587_v49 }
  0x43   :  { %698 = vmatmul.mubr.bf16.gmra.mrb[16].mxu0 %v1589_v50  ;;  %v50_v50 = vld [vmem:[#allocation2 + $0x10] sm:$0xff] }
  0x44   :  { %834 = vmatmul.mubr.bf16.gmra.mrb[16].mxu1 %v1590_v51  ;;  %705 = vmatprep.mubr.bf16.mxu0 %v1591_v52 }
  0x45   :  { %841 = vmatprep.mubr.bf16.mxu1 %v1593_v53 }
  0x4b   :  { %706 = vmatmul.mubr.bf16.gmra.mrb[20].mxu0 %v1595_v54 }
  0x4c   :  { %842 = vmatmul.mubr.bf16.gmra.mrb[20].mxu1 %v1596_v55  ;;  %713 = vmatprep.mubr.bf16.mxu0 %v1597_v56  ;;  %v1939_v55 = vld [vmem:[%s2121_s2] ss:$0 sm:$0xff]  ;;  %v51_v56 = vld [vmem:[#allocation2 + $0x18] sm:$0xff] }
  0x4d   :  { %849 = vmatprep.mubr.bf16.mxu1 %v1599_v57 }
  0x53   :  { %714 = vmatmul.mubr.bf16.gmra.mrb[24].mxu0 %v1601_v58 }
  0x54   :  { %850 = vmatmul.mubr.bf16.gmra.mrb[24].mxu1 %v1602_v59  ;;  %721 = vmatprep.mubr.bf16.mxu0 %v1603_v60  ;;  %v1944_v60 = vld [vmem:[%s2122_s3] ss:$0 sm:$0xff] }
  0x55   :  { %857 = vmatprep.mubr.bf16.mxu1 %v1605_v61 }
  0x5b   :  { %722 = vmatmul.mubr.bf16.gmra.mrb[28].mxu0 %v1607_v62 }
  0x5c   :  { %858 = vmatmul.mubr.bf16.gmra.mrb[28].mxu1 %v1608_v63  ;;  %729 = vmatprep.mubr.bf16.mxu0 %v1609_v0 }
  0x5d   :  { %865 = vmatprep.mubr.bf16.mxu1 %v1611_v1 }
  0x63   :  { %730 = vmatmul.mubr.bf16.gmra.mrb[32].mxu0 %v1613_v2 }
  0x64   :  { %866 = vmatmul.mubr.bf16.gmra.mrb[32].mxu1 %v1614_v3  ;;  %737 = vmatprep.mubr.bf16.mxu0 %v1615_v4 }
  0x65   :  { %873 = vmatprep.mubr.bf16.mxu1 %v1617_v5 }
  0x6b   :  { %738 = vmatmul.mubr.bf16.gmra.mrb[36].mxu0 %v1619_v6 }
  0x6c   :  { %874 = vmatmul.mubr.bf16.gmra.mrb[36].mxu1 %v1620_v7  ;;  %745 = vmatprep.mubr.bf16.mxu0 %v1621_v8 }
  0x6d   :  { %881 = vmatprep.mubr.bf16.mxu1 %v1623_v9 }
  0x73   :  { %746 = vmatmul.mubr.bf16.gmra.mrb[40].mxu0 %v1625_v10 }
  0x74   :  { %882 = vmatmul.mubr.bf16.gmra.mrb[40].mxu1 %v1626_v11  ;;  %753 = vmatprep.mubr.bf16.mxu0 %v1627_v12  ;;  %v52_v11 = vld [vmem:[#allocation2 + $0x20] sm:$0xff] }
  0x75   :  { %889 = vmatprep.mubr.bf16.mxu1 %v1629_v13 }
  0x7b   :  { %754 = vmatmul.mubr.bf16.gmra.mrb[44].mxu0 %v1631_v17 }
  0x7c   :  { %890 = vmatmul.mubr.bf16.gmra.mrb[44].mxu1 %v1632_v18  ;;  %761 = vmatprep.mubr.bf16.mxu0 %v1253_v19  ;;  %v53_v18 = vld [vmem:[#allocation2 + $0x28] sm:$0xff] }
  0x7d   :  { %897 = vmatprep.mubr.bf16.mxu1 %v1255_v20 }
  0x83   :  { %762 = vmatmul.mubr.bf16.gmra.mrb[48].mxu0 %v1252_v21 }
  0x84   :  { %898 = vmatmul.mubr.bf16.gmra.mrb[48].mxu1 %v1254_v22 }
  0xf6   :  { %v1356_v23 = vpop.f32.mrb[0].mxu0 }
  0xf7   :  { %v1450_v24 = vpop.f32.mrb[0].mxu1  ;;  %v1357_v25 = vpop.f32.mrb[1].mxu0 }
  0xf8   :  { %v1358_v26 = vadd.f32 %v1357_v25, %v1356_v23  ;;  %v1451_v27 = vpop.f32.mrb[1].mxu1  ;;  %v1359_v28 = vpop.f32.mrb[2].mxu0 }
  0xf9   :  { %v1452_v29 = vadd.f32 %v1451_v27, %v1450_v24  ;;  %v1453_v30 = vpop.f32.mrb[2].mxu1  ;;  %v1360_v31 = vpop.f32.mrb[3].mxu0 }
  0xfa   :  { %v1361_v33 = vadd.f32 %v1360_v31, %v1359_v28  ;;  %v1454_v34 = vpop.f32.mrb[3].mxu1 }
  0xfb   :  { %v804_v35 = vadd.f32 %v1452_v29, %v1358_v26  ;;  %v1455_v36 = vadd.f32 %v1454_v34, %v1453_v30 }
  0xfd   :  { %v905_v38 = vadd.f32 %v804_v35, %v48_v32  ;;  %v807_v39 = vadd.f32 %v1455_v36, %v1361_v33 }
  0xfe   :  { %v1362_v40 = vpop.f32.mrb[4].mxu0 }
  0xff   :  { %931 = vst.msk [vmem:[#allocation2] sm:$0xff] %vm22_vm0, %v905_v38  ;;  %v906_v41 = vadd.f32 %v807_v39, %v49_v37  ;;  %v1456_v42 = vpop.f32.mrb[4].mxu1  ;;  %v1363_v43 = vpop.f32.mrb[5].mxu0  ;;  %v54_v39 = vld [vmem:[#allocation2 + $0x30] sm:$0xff] }
 0x100   :  { %v1364_v44 = vadd.f32 %v1363_v43, %v1362_v40  ;;  %v1457_v45 = vpop.f32.mrb[5].mxu1  ;;  %v1365_v46 = vpop.f32.mrb[6].mxu0 }
 0x101   :  { %932 = vst.msk [vmem:[#allocation2 + $0x8] sm:$0xff] %vm22_vm0, %v906_v41  ;;  %v1458_v47 = vadd.f32 %v1457_v45, %v1456_v42  ;;  %v1459_v48 = vpop.f32.mrb[6].mxu1  ;;  %v1366_v49 = vpop.f32.mrb[7].mxu0 }
 0x102   :  { %v1367_v51 = vadd.f32 %v1366_v49, %v1365_v46  ;;  %v1460_v52 = vpop.f32.mrb[7].mxu1  ;;  %v55_v46 = vld [vmem:[#allocation2 + $0x38] sm:$0xff] }
 0x103   :  { %v812_v53 = vadd.f32 %v1458_v47, %v1364_v44  ;;  %v1461_v54 = vadd.f32 %v1460_v52, %v1459_v48 }
 0x105   :  { %v907_v57 = vadd.f32 %v812_v53, %v50_v50  ;;  %v815_v58 = vadd.f32 %v1461_v54, %v1367_v51 }
 0x106   :  { %v959_v59 = vld [vmem:[#allocation2] sm:$0xff]  ;;  %v1368_v61 = vpop.f32.mrb[8].mxu0 }
 0x107   :  { %v991_v62 = vmul.f32 %v1939_v55, %v959_v59  ;;  %933 = vst.msk [vmem:[#allocation2 + $0x10] sm:$0xff] %vm22_vm0, %v907_v57  ;;  %v908_v63 = vadd.f32 %v815_v58, %v51_v56  ;;  %v1462_v0 = vpop.f32.mrb[8].mxu1  ;;  %v1369_v1 = vpop.f32.mrb[9].mxu0 }
 0x108   :  { %v960_v2 = vld [vmem:[#allocation2 + $0x8] sm:$0xff]  ;;  %v1370_v3 = vadd.f32 %v1369_v1, %v1368_v61  ;;  %v1463_v4 = vpop.f32.mrb[9].mxu1  ;;  %v1371_v5 = vpop.f32.mrb[10].mxu0 }
 0x109   :  { %v1023_v6 = vadd.f32 %v1944_v60, %v991_v62  ;;  %v992_v7 = vmul.f32 %v1939_v55, %v960_v2  ;;  %934 = vst.msk [vmem:[#allocation2 + $0x18] sm:$0xff] %vm22_vm0, %v908_v63  ;;  %v1464_v8 = vadd.f32 %v1463_v4, %v1462_v0  ;;  %v1465_v9 = vpop.f32.mrb[10].mxu1  ;;  %v1372_v10 = vpop.f32.mrb[11].mxu0 }
 0x10a   :  { %v1373_v12 = vadd.f32 %v1372_v10, %v1371_v5  ;;  %v1466_v13 = vpop.f32.mrb[11].mxu1  ;;  %v56_v5 = vld [vmem:[#allocation2 + $0x40] sm:$0xff] }
 0x10b   :  { %v1048_v14 = vmax.f32 %v1023_v6, 0.0  ;;  %v1024_v15 = vadd.f32 %v1944_v60, %v992_v7  ;;  %v820_v16 = vadd.f32 %v1464_v8, %v1370_v3  ;;  %v1467_v17 = vadd.f32 %v1466_v13, %v1465_v9 }
 0x10d   :  { %v1315_v19 = vpack.c.bf16 %v1048_v14, %v1048_v14  ;;  %v1049_v20 = vmax.f32 %v1024_v15, 0.0  ;;  %v909_v21 = vadd.f32 %v820_v16, %v52_v11  ;;  %v823_v22 = vadd.f32 %v1467_v17, %v1373_v12  ;;  %v57_v12 = vld [vmem:[#allocation2 + $0x48] sm:$0xff] }
 0x10e   :  { %v961_v23 = vld [vmem:[#allocation2 + $0x10] sm:$0xff]  ;;  %v1374_v24 = vpop.f32.mrb[12].mxu0 }
 0x10f   :  { %1175 = vst.msk [vmem:[%s2123_s4] sm:$0xf] %vm1174_vm1, %v1315_v19  ;;  %v1316_v25 = vpack.c.bf16 %v1049_v20, %v1049_v20  ;;  %v993_v26 = vmul.f32 %v1939_v55, %v961_v23  ;;  %v910_v27 = vadd.f32 %v823_v22, %v53_v18  ;;  %v1468_v28 = vpop.f32.mrb[12].mxu1  ;;  %v1375_v29 = vpop.f32.mrb[13].mxu0 }
 0x110   :  { %935 = vst.msk [vmem:[#allocation2 + $0x20] sm:$0xff] %vm22_vm0, %v909_v21  ;;  %v962_v30 = vld [vmem:[#allocation2 + $0x18] sm:$0xff]  ;;  %v1376_v31 = vadd.f32 %v1375_v29, %v1374_v24  ;;  %v1469_v32 = vpop.f32.mrb[13].mxu1  ;;  %v1377_v33 = vpop.f32.mrb[14].mxu0 }
 0x111   :  { %1176 = vst.msk [vmem:[%s2123_s4 + $0x4] sm:$0xf] %vm1174_vm1, %v1316_v25  ;;  %v1025_v34 = vadd.f32 %v1944_v60, %v993_v26  ;;  %v994_v35 = vmul.f32 %v1939_v55, %v962_v30  ;;  %v1470_v36 = vadd.f32 %v1469_v32, %v1468_v28  ;;  %v1471_v37 = vpop.f32.mrb[14].mxu1  ;;  %v1378_v38 = vpop.f32.mrb[15].mxu0 }
 0x112   :  { %936 = vst.msk [vmem:[#allocation2 + $0x28] sm:$0xff] %vm22_vm0, %v910_v27  ;;  %v1379_v40 = vadd.f32 %v1378_v38, %v1377_v33  ;;  %v1472_v41 = vpop.f32.mrb[15].mxu1  ;;  %v58_v33 = vld [vmem:[#allocation2 + $0x50] sm:$0xff] }
 0x113   :  { %v1050_v42 = vmax.f32 %v1025_v34, 0.0  ;;  %v1026_v43 = vadd.f32 %v1944_v60, %v994_v35  ;;  %v828_v44 = vadd.f32 %v1470_v36, %v1376_v31  ;;  %v1473_v45 = vadd.f32 %v1472_v41, %v1471_v37 }
 0x115   :  { %v1317_v47 = vpack.c.bf16 %v1050_v42, %v1050_v42  ;;  %v1051_v48 = vmax.f32 %v1026_v43, 0.0  ;;  %v911_v49 = vadd.f32 %v828_v44, %v54_v39  ;;  %v831_v50 = vadd.f32 %v1473_v45, %v1379_v40  ;;  %v59_v40 = vld [vmem:[#allocation2 + $0x58] sm:$0xff] }
 0x116   :  { %v1380_v52 = vpop.f32.mrb[16].mxu0 }
 0x117   :  { %v963_v51 = vld [vmem:[#allocation2 + $0x20] sm:$0xff]  ;;  %1177 = vst.msk [vmem:[%s2123_s4 + $0x8] sm:$0xf] %vm1174_vm1, %v1317_v47  ;;  %v1318_v53 = vpack.c.bf16 %v1051_v48, %v1051_v48  ;;  %v912_v56 = vadd.f32 %v831_v50, %v55_v46  ;;  %v1474_v57 = vpop.f32.mrb[16].mxu1  ;;  %v1381_v58 = vpop.f32.mrb[17].mxu0 }
 0x118   :  { %v995_v54 = vmul.f32 %v1939_v55, %v963_v51  ;;  %937 = vst.msk [vmem:[#allocation2 + $0x30] sm:$0xff] %vm22_vm0, %v911_v49  ;;  %v1382_v61 = vadd.f32 %v1381_v58, %v1380_v52  ;;  %v1475_v62 = vpop.f32.mrb[17].mxu1  ;;  %v1383_v63 = vpop.f32.mrb[18].mxu0 }
 0x119   :  { %v964_v59 = vld [vmem:[#allocation2 + $0x28] sm:$0xff]  ;;  %1178 = vst.msk [vmem:[%s2123_s4 + $0xc] sm:$0xf] %vm1174_vm1, %v1318_v53  ;;  %v1476_v2 = vadd.f32 %v1475_v62, %v1474_v57  ;;  %v1477_v3 = vpop.f32.mrb[18].mxu1  ;;  %v1384_v4 = vpop.f32.mrb[19].mxu0 }
 0x11a   :  { %v1027_v0 = vadd.f32 %v1944_v60, %v995_v54  ;;  %v996_v1 = vmul.f32 %v1939_v55, %v964_v59  ;;  %938 = vst.msk [vmem:[#allocation2 + $0x38] sm:$0xff] %vm22_vm0, %v912_v56  ;;  %v1385_v6 = vadd.f32 %v1384_v4, %v1383_v63  ;;  %v1478_v7 = vpop.f32.mrb[19].mxu1  ;;  %v60_v63 = vld [vmem:[#allocation2 + $0x60] sm:$0xff] }
 0x11b   :  { %v836_v10 = vadd.f32 %v1476_v2, %v1382_v61  ;;  %v1479_v11 = vadd.f32 %v1478_v7, %v1477_v3 }
 0x11c   :  { %v1052_v8 = vmax.f32 %v1027_v0, 0.0  ;;  %v1028_v9 = vadd.f32 %v1944_v60, %v996_v1 }
 0x11d   :  { %v913_v15 = vadd.f32 %v836_v10, %v56_v5  ;;  %v839_v16 = vadd.f32 %v1479_v11, %v1385_v6  ;;  %v61_v6 = vld [vmem:[#allocation2 + $0x68] sm:$0xff] }
 0x11e   :  { %v1319_v13 = vpack.c.bf16 %v1052_v8, %v1052_v8  ;;  %v1053_v14 = vmax.f32 %v1028_v9, 0.0  ;;  %v1386_v18 = vpop.f32.mrb[20].mxu0 }
 0x11f   :  { %v965_v17 = vld [vmem:[#allocation2 + $0x30] sm:$0xff]  ;;  %939 = vst.msk [vmem:[#allocation2 + $0x40] sm:$0xff] %vm22_vm0, %v913_v15  ;;  %v914_v21 = vadd.f32 %v839_v16, %v57_v12  ;;  %v1480_v22 = vpop.f32.mrb[20].mxu1  ;;  %v1387_v23 = vpop.f32.mrb[21].mxu0 }
 0x120   :  { %1179 = vst.msk [vmem:[%s2123_s4 + $0x10] sm:$0xf] %vm1174_vm1, %v1319_v13  ;;  %v1320_v19 = vpack.c.bf16 %v1053_v14, %v1053_v14  ;;  %v997_v20 = vmul.f32 %v1939_v55, %v965_v17  ;;  %v1388_v25 = vadd.f32 %v1387_v23, %v1386_v18  ;;  %v1481_v26 = vpop.f32.mrb[21].mxu1  ;;  %v1389_v27 = vpop.f32.mrb[22].mxu0 }
 0x121   :  { %v966_v24 = vld [vmem:[#allocation2 + $0x38] sm:$0xff]  ;;  %940 = vst.msk [vmem:[#allocation2 + $0x48] sm:$0xff] %vm22_vm0, %v914_v21  ;;  %v1482_v30 = vadd.f32 %v1481_v26, %v1480_v22  ;;  %v1483_v31 = vpop.f32.mrb[22].mxu1  ;;  %v1390_v32 = vpop.f32.mrb[23].mxu0 }
 0x122   :  { %1180 = vst.msk [vmem:[%s2123_s4 + $0x14] sm:$0xf] %vm1174_vm1, %v1320_v19  ;;  %v1029_v28 = vadd.f32 %v1944_v60, %v997_v20  ;;  %v998_v29 = vmul.f32 %v1939_v55, %v966_v24  ;;  %v1391_v34 = vadd.f32 %v1390_v32, %v1389_v27  ;;  %v1484_v35 = vpop.f32.mrb[23].mxu1  ;;  %v62_v27 = vld [vmem:[#allocation2 + $0x70] sm:$0xff] }
 0x123   :  { %v844_v38 = vadd.f32 %v1482_v30, %v1388_v25  ;;  %v1485_v39 = vadd.f32 %v1484_v35, %v1483_v31 }
 0x124   :  { %v1054_v36 = vmax.f32 %v1029_v28, 0.0  ;;  %v1030_v37 = vadd.f32 %v1944_v60, %v998_v29 }
 0x125   :  { %v915_v43 = vadd.f32 %v844_v38, %v58_v33  ;;  %v847_v44 = vadd.f32 %v1485_v39, %v1391_v34  ;;  %v63_v34 = vld [vmem:[#allocation2 + $0x78] sm:$0xff] }
 0x126   :  { %v1321_v41 = vpack.c.bf16 %v1054_v36, %v1054_v36  ;;  %v1055_v42 = vmax.f32 %v1030_v37, 0.0  ;;  %v967_v45 = vld [vmem:[#allocation2 + $0x40] sm:$0xff]  ;;  %v1392_v46 = vpop.f32.mrb[24].mxu0 }
 0x127   :  { %v999_v48 = vmul.f32 %v1939_v55, %v967_v45  ;;  %941 = vst.msk [vmem:[#allocation2 + $0x50] sm:$0xff] %vm22_vm0, %v915_v43  ;;  %v916_v49 = vadd.f32 %v847_v44, %v59_v40  ;;  %v1486_v50 = vpop.f32.mrb[24].mxu1  ;;  %v1393_v51 = vpop.f32.mrb[25].mxu0 }
 0x128   :  { %1181 = vst.msk [vmem:[%s2123_s4 + $0x18] sm:$0xf] %vm1174_vm1, %v1321_v41  ;;  %v1322_v47 = vpack.c.bf16 %v1055_v42, %v1055_v42  ;;  %v968_v52 = vld [vmem:[#allocation2 + $0x48] sm:$0xff]  ;;  %v1394_v53 = vadd.f32 %v1393_v51, %v1392_v46  ;;  %v1487_v54 = vpop.f32.mrb[25].mxu1  ;;  %v1395_v56 = vpop.f32.mrb[26].mxu0 }
 0x129   :  { %v1031_v57 = vadd.f32 %v1944_v60, %v999_v48  ;;  %v1000_v58 = vmul.f32 %v1939_v55, %v968_v52  ;;  %942 = vst.msk [vmem:[#allocation2 + $0x58] sm:$0xff] %vm22_vm0, %v916_v49  ;;  %v1488_v59 = vadd.f32 %v1487_v54, %v1486_v50  ;;  %v1489_v61 = vpop.f32.mrb[26].mxu1  ;;  %v1396_v62 = vpop.f32.mrb[27].mxu0 }
 0x12a   :  { %1182 = vst.msk [vmem:[%s2123_s4 + $0x1c] sm:$0xf] %vm1174_vm1, %v1322_v47  ;;  %v1397_v0 = vadd.f32 %v1396_v62, %v1395_v56  ;;  %v1490_v1 = vpop.f32.mrb[27].mxu1  ;;  %v64_v56 = vld [vmem:[#allocation2 + $0x80] sm:$0xff] }
 0x12b   :  { %v1056_v2 = vmax.f32 %v1031_v57, 0.0  ;;  %v1032_v3 = vadd.f32 %v1944_v60, %v1000_v58  ;;  %v852_v4 = vadd.f32 %v1488_v59, %v1394_v53  ;;  %v1491_v5 = vadd.f32 %v1490_v1, %v1489_v61 }
 0x12d   :  { %v1323_v7 = vpack.c.bf16 %v1056_v2, %v1056_v2  ;;  %v1057_v8 = vmax.f32 %v1032_v3, 0.0  ;;  %v917_v9 = vadd.f32 %v852_v4, %v60_v63  ;;  %v855_v10 = vadd.f32 %v1491_v5, %v1397_v0  ;;  %v65_v0 = vld [vmem:[#allocation2 + $0x88] sm:$0xff] }
 0x12e   :  { %v969_v11 = vld [vmem:[#allocation2 + $0x50] sm:$0xff]  ;;  %v1398_v12 = vpop.f32.mrb[28].mxu0 }
 0x12f   :  { %1183 = vst.msk [vmem:[%s2123_s4 + $0x20] sm:$0xf] %vm1174_vm1, %v1323_v7  ;;  %v1324_v13 = vpack.c.bf16 %v1057_v8, %v1057_v8  ;;  %v1001_v14 = vmul.f32 %v1939_v55, %v969_v11  ;;  %v918_v15 = vadd.f32 %v855_v10, %v61_v6  ;;  %v1492_v16 = vpop.f32.mrb[28].mxu1  ;;  %v1399_v17 = vpop.f32.mrb[29].mxu0 }
 0x130   :  { %943 = vst.msk [vmem:[#allocation2 + $0x60] sm:$0xff] %vm22_vm0, %v917_v9  ;;  %v970_v18 = vld [vmem:[#allocation2 + $0x58] sm:$0xff]  ;;  %v1400_v19 = vadd.f32 %v1399_v17, %v1398_v12  ;;  %v1493_v20 = vpop.f32.mrb[29].mxu1  ;;  %v1401_v21 = vpop.f32.mrb[30].mxu0 }
 0x131   :  { %1184 = vst.msk [vmem:[%s2123_s4 + $0x24] sm:$0xf] %vm1174_vm1, %v1324_v13  ;;  %v1033_v22 = vadd.f32 %v1944_v60, %v1001_v14  ;;  %v1002_v23 = vmul.f32 %v1939_v55, %v970_v18  ;;  %v1494_v24 = vadd.f32 %v1493_v20, %v1492_v16  ;;  %v1495_v25 = vpop.f32.mrb[30].mxu1  ;;  %v1402_v26 = vpop.f32.mrb[31].mxu0 }
 0x132   :  { %944 = vst.msk [vmem:[#allocation2 + $0x68] sm:$0xff] %vm22_vm0, %v918_v15  ;;  %v1403_v28 = vadd.f32 %v1402_v26, %v1401_v21  ;;  %v1496_v29 = vpop.f32.mrb[31].mxu1  ;;  %v66_v21 = vld [vmem:[#allocation2 + $0x90] sm:$0xff] }
 0x133   :  { %v1058_v30 = vmax.f32 %v1033_v22, 0.0  ;;  %v1034_v31 = vadd.f32 %v1944_v60, %v1002_v23  ;;  %v860_v32 = vadd.f32 %v1494_v24, %v1400_v19  ;;  %v1497_v33 = vadd.f32 %v1496_v29, %v1495_v25 }
 0x135   :  { %v1325_v35 = vpack.c.bf16 %v1058_v30, %v1058_v30  ;;  %v1059_v36 = vmax.f32 %v1034_v31, 0.0  ;;  %v919_v37 = vadd.f32 %v860_v32, %v62_v27  ;;  %v863_v38 = vadd.f32 %v1497_v33, %v1403_v28  ;;  %v67_v28 = vld [vmem:[#allocation2 + $0x98] sm:$0xff] }
 0x136   :  { %v1404_v40 = vpop.f32.mrb[32].mxu0 }
 0x137   :  { %v971_v39 = vld [vmem:[#allocation2 + $0x60] sm:$0xff]  ;;  %1185 = vst.msk [vmem:[%s2123_s4 + $0x28] sm:$0xf] %vm1174_vm1, %v1325_v35  ;;  %v1326_v41 = vpack.c.bf16 %v1059_v36, %v1059_v36  ;;  %v920_v43 = vadd.f32 %v863_v38, %v63_v34  ;;  %v1498_v44 = vpop.f32.mrb[32].mxu1  ;;  %v1405_v45 = vpop.f32.mrb[33].mxu0 }
 0x138   :  { %v1003_v42 = vmul.f32 %v1939_v55, %v971_v39  ;;  %945 = vst.msk [vmem:[#allocation2 + $0x70] sm:$0xff] %vm22_vm0, %v919_v37  ;;  %v1406_v47 = vadd.f32 %v1405_v45, %v1404_v40  ;;  %v1499_v48 = vpop.f32.mrb[33].mxu1  ;;  %v1407_v49 = vpop.f32.mrb[34].mxu0 }
 0x139   :  { %v972_v46 = vld [vmem:[#allocation2 + $0x68] sm:$0xff]  ;;  %1186 = vst.msk [vmem:[%s2123_s4 + $0x2c] sm:$0xf] %vm1174_vm1, %v1326_v41  ;;  %v1500_v52 = vadd.f32 %v1499_v48, %v1498_v44  ;;  %v1501_v53 = vpop.f32.mrb[34].mxu1  ;;  %v1408_v54 = vpop.f32.mrb[35].mxu0 }
 0x13a   :  { %v1035_v50 = vadd.f32 %v1944_v60, %v1003_v42  ;;  %v1004_v51 = vmul.f32 %v1939_v55, %v972_v46  ;;  %946 = vst.msk [vmem:[#allocation2 + $0x78] sm:$0xff] %vm22_vm0, %v920_v43  ;;  %v1409_v57 = vadd.f32 %v1408_v54, %v1407_v49  ;;  %v1502_v58 = vpop.f32.mrb[35].mxu1  ;;  %v68_v49 = vld [vmem:[#allocation2 + $0xa0] sm:$0xff] }
 0x13b   :  { %v868_v62 = vadd.f32 %v1500_v52, %v1406_v47  ;;  %v1503_v63 = vadd.f32 %v1502_v58, %v1501_v53 }
 0x13c   :  { %v1060_v59 = vmax.f32 %v1035_v50, 0.0  ;;  %v1036_v61 = vadd.f32 %v1944_v60, %v1004_v51 }
 0x13d   :  { %v921_v3 = vadd.f32 %v868_v62, %v64_v56  ;;  %v871_v4 = vadd.f32 %v1503_v63, %v1409_v57  ;;  %v69_v57 = vld [vmem:[#allocation2 + $0xa8] sm:$0xff] }
 0x13e   :  { %v1327_v1 = vpack.c.bf16 %v1060_v59, %v1060_v59  ;;  %v1061_v2 = vmax.f32 %v1036_v61, 0.0  ;;  %v1410_v6 = vpop.f32.mrb[36].mxu0 }
 0x13f   :  { %v973_v5 = vld [vmem:[#allocation2 + $0x70] sm:$0xff]  ;;  %947 = vst.msk [vmem:[#allocation2 + $0x80] sm:$0xff] %vm22_vm0, %v921_v3  ;;  %v922_v9 = vadd.f32 %v871_v4, %v65_v0  ;;  %v1504_v10 = vpop.f32.mrb[36].mxu1  ;;  %v1411_v11 = vpop.f32.mrb[37].mxu0 }
 0x140   :  { %1187 = vst.msk [vmem:[%s2123_s4 + $0x30] sm:$0xf] %vm1174_vm1, %v1327_v1  ;;  %v1328_v7 = vpack.c.bf16 %v1061_v2, %v1061_v2  ;;  %v1005_v8 = vmul.f32 %v1939_v55, %v973_v5  ;;  %v1412_v13 = vadd.f32 %v1411_v11, %v1410_v6  ;;  %v1505_v14 = vpop.f32.mrb[37].mxu1  ;;  %v1413_v15 = vpop.f32.mrb[38].mxu0 }
 0x141   :  { %v974_v12 = vld [vmem:[#allocation2 + $0x78] sm:$0xff]  ;;  %948 = vst.msk [vmem:[#allocation2 + $0x88] sm:$0xff] %vm22_vm0, %v922_v9  ;;  %v1506_v18 = vadd.f32 %v1505_v14, %v1504_v10  ;;  %v1507_v19 = vpop.f32.mrb[38].mxu1  ;;  %v1414_v20 = vpop.f32.mrb[39].mxu0 }
 0x142   :  { %1188 = vst.msk [vmem:[%s2123_s4 + $0x34] sm:$0xf] %vm1174_vm1, %v1328_v7  ;;  %v1037_v16 = vadd.f32 %v1944_v60, %v1005_v8  ;;  %v1006_v17 = vmul.f32 %v1939_v55, %v974_v12  ;;  %v1415_v22 = vadd.f32 %v1414_v20, %v1413_v15  ;;  %v1508_v23 = vpop.f32.mrb[39].mxu1  ;;  %v70_v15 = vld [vmem:[#allocation2 + $0xb0] sm:$0xff] }
 0x143   :  { %v876_v26 = vadd.f32 %v1506_v18, %v1412_v13  ;;  %v1509_v27 = vadd.f32 %v1508_v23, %v1507_v19 }
 0x144   :  { %v1062_v24 = vmax.f32 %v1037_v16, 0.0  ;;  %v1038_v25 = vadd.f32 %v1944_v60, %v1006_v17 }
 0x145   :  { %v923_v31 = vadd.f32 %v876_v26, %v66_v21  ;;  %v879_v32 = vadd.f32 %v1509_v27, %v1415_v22  ;;  %v71_v22 = vld [vmem:[#allocation2 + $0xb8] sm:$0xff] }
 0x146   :  { %v1329_v29 = vpack.c.bf16 %v1062_v24, %v1062_v24  ;;  %v1063_v30 = vmax.f32 %v1038_v25, 0.0  ;;  %v975_v33 = vld [vmem:[#allocation2 + $0x80] sm:$0xff]  ;;  %v1416_v34 = vpop.f32.mrb[40].mxu0 }
 0x147   :  { %v1007_v36 = vmul.f32 %v1939_v55, %v975_v33  ;;  %949 = vst.msk [vmem:[#allocation2 + $0x90] sm:$0xff] %vm22_vm0, %v923_v31  ;;  %v924_v37 = vadd.f32 %v879_v32, %v67_v28  ;;  %v1510_v38 = vpop.f32.mrb[40].mxu1  ;;  %v1417_v39 = vpop.f32.mrb[41].mxu0 }
 0x148   :  { %1189 = vst.msk [vmem:[%s2123_s4 + $0x38] sm:$0xf] %vm1174_vm1, %v1329_v29  ;;  %v1330_v35 = vpack.c.bf16 %v1063_v30, %v1063_v30  ;;  %v976_v40 = vld [vmem:[#allocation2 + $0x88] sm:$0xff]  ;;  %v1418_v41 = vadd.f32 %v1417_v39, %v1416_v34  ;;  %v1511_v42 = vpop.f32.mrb[41].mxu1  ;;  %v1419_v43 = vpop.f32.mrb[42].mxu0 }
 0x149   :  { %v1039_v44 = vadd.f32 %v1944_v60, %v1007_v36  ;;  %v1008_v45 = vmul.f32 %v1939_v55, %v976_v40  ;;  %950 = vst.msk [vmem:[#allocation2 + $0x98] sm:$0xff] %vm22_vm0, %v924_v37  ;;  %v1512_v46 = vadd.f32 %v1511_v42, %v1510_v38  ;;  %v1513_v47 = vpop.f32.mrb[42].mxu1  ;;  %v1420_v48 = vpop.f32.mrb[43].mxu0 }
 0x14a   :  { %1190 = vst.msk [vmem:[%s2123_s4 + $0x3c] sm:$0xf] %vm1174_vm1, %v1330_v35  ;;  %v1421_v50 = vadd.f32 %v1420_v48, %v1419_v43  ;;  %v1514_v51 = vpop.f32.mrb[43].mxu1  ;;  %v72_v43 = vld [vmem:[#allocation2 + $0xc0] sm:$0xff] }
 0x14b   :  { %v1064_v52 = vmax.f32 %v1039_v44, 0.0  ;;  %v1040_v53 = vadd.f32 %v1944_v60, %v1008_v45  ;;  %v884_v54 = vadd.f32 %v1512_v46, %v1418_v41  ;;  %v1515_v56 = vadd.f32 %v1514_v51, %v1513_v47 }
 0x14d   :  { %v1331_v58 = vpack.c.bf16 %v1064_v52, %v1064_v52  ;;  %v1065_v59 = vmax.f32 %v1040_v53, 0.0  ;;  %v925_v61 = vadd.f32 %v884_v54, %v68_v49  ;;  %v887_v62 = vadd.f32 %v1515_v56, %v1421_v50 }
 0x14e   :  { %v977_v63 = vld [vmem:[#allocation2 + $0x90] sm:$0xff]  ;;  %v1422_v0 = vpop.f32.mrb[44].mxu0 }
 0x14f   :  { %1191 = vst.msk [vmem:[%s2123_s4 + $0x40] sm:$0xf] %vm1174_vm1, %v1331_v58  ;;  %v1332_v1 = vpack.c.bf16 %v1065_v59, %v1065_v59  ;;  %v1009_v2 = vmul.f32 %v1939_v55, %v977_v63  ;;  %v926_v3 = vadd.f32 %v887_v62, %v69_v57  ;;  %v1516_v4 = vpop.f32.mrb[44].mxu1  ;;  %v1423_v5 = vpop.f32.mrb[45].mxu0 }
 0x150   :  { %951 = vst.msk [vmem:[#allocation2 + $0xa0] sm:$0xff] %vm22_vm0, %v925_v61  ;;  %v978_v6 = vld [vmem:[#allocation2 + $0x98] sm:$0xff]  ;;  %v1424_v7 = vadd.f32 %v1423_v5, %v1422_v0  ;;  %v1517_v8 = vpop.f32.mrb[45].mxu1  ;;  %v1425_v9 = vpop.f32.mrb[46].mxu0 }
 0x151   :  { %1192 = vst.msk [vmem:[%s2123_s4 + $0x44] sm:$0xf] %vm1174_vm1, %v1332_v1  ;;  %v1041_v10 = vadd.f32 %v1944_v60, %v1009_v2  ;;  %v1010_v11 = vmul.f32 %v1939_v55, %v978_v6  ;;  %v1518_v12 = vadd.f32 %v1517_v8, %v1516_v4  ;;  %v1519_v13 = vpop.f32.mrb[46].mxu1  ;;  %v1426_v14 = vpop.f32.mrb[47].mxu0 }
 0x152   :  { %952 = vst.msk [vmem:[#allocation2 + $0xa8] sm:$0xff] %vm22_vm0, %v926_v3  ;;  %v1427_v16 = vadd.f32 %v1426_v14, %v1425_v9  ;;  %v1520_v17 = vpop.f32.mrb[47].mxu1 }
 0x153   :  { %v1066_v18 = vmax.f32 %v1041_v10, 0.0  ;;  %v1042_v19 = vadd.f32 %v1944_v60, %v1010_v11  ;;  %v892_v20 = vadd.f32 %v1518_v12, %v1424_v7  ;;  %v1521_v21 = vadd.f32 %v1520_v17, %v1519_v13 }
 0x155   :  { %v1333_v23 = vpack.c.bf16 %v1066_v18, %v1066_v18  ;;  %v1067_v24 = vmax.f32 %v1042_v19, 0.0  ;;  %v927_v25 = vadd.f32 %v892_v20, %v70_v15  ;;  %v895_v26 = vadd.f32 %v1521_v21, %v1427_v16 }
 0x156   :  { %v1428_v28 = vpop.f32.mrb[48].mxu0 }
 0x157   :  { %v979_v27 = vld [vmem:[#allocation2 + $0xa0] sm:$0xff]  ;;  %1193 = vst.msk [vmem:[%s2123_s4 + $0x48] sm:$0xf] %vm1174_vm1, %v1333_v23  ;;  %v1334_v29 = vpack.c.bf16 %v1067_v24, %v1067_v24  ;;  %v928_v31 = vadd.f32 %v895_v26, %v71_v22  ;;  %v1522_v32 = vpop.f32.mrb[48].mxu1  ;;  %v1429_v33 = vpop.f32.mrb[49].mxu0 }
 0x158   :  { %v1011_v30 = vmul.f32 %v1939_v55, %v979_v27  ;;  %953 = vst.msk [vmem:[#allocation2 + $0xb0] sm:$0xff] %vm22_vm0, %v927_v25  ;;  %v1430_v35 = vadd.f32 %v1429_v33, %v1428_v28  ;;  %v1523_v36 = vpop.f32.mrb[49].mxu1  ;;  %v1431_v37 = vpop.f32.mrb[50].mxu0 }
 0x159   :  { %v980_v34 = vld [vmem:[#allocation2 + $0xa8] sm:$0xff]  ;;  %1194 = vst.msk [vmem:[%s2123_s4 + $0x4c] sm:$0xf] %vm1174_vm1, %v1334_v29  ;;  %v1524_v40 = vadd.f32 %v1523_v36, %v1522_v32  ;;  %v1525_v41 = vpop.f32.mrb[50].mxu1  ;;  %v1432_v42 = vpop.f32.mrb[51].mxu0 }
 0x15a   :  { %v1043_v38 = vadd.f32 %v1944_v60, %v1011_v30  ;;  %v1012_v39 = vmul.f32 %v1939_v55, %v980_v34  ;;  %954 = vst.msk [vmem:[#allocation2 + $0xb8] sm:$0xff] %vm22_vm0, %v928_v31  ;;  %v1526_v44 = vpop.f32.mrb[51].mxu1 }
 0x15b   :  { %v900_v47 = vadd.f32 %v1524_v40, %v1430_v35 }
 0x15c   :  { %v1068_v45 = vmax.f32 %v1043_v38, 0.0  ;;  %v1044_v46 = vadd.f32 %v1944_v60, %v1012_v39 }
 0x15d   :  { %v929_v50 = vadd.f32 %v900_v47, %v72_v43 }
 0x15e   :  { %v1335_v48 = vpack.c.bf16 %v1068_v45, %v1068_v45  ;;  %v1069_v49 = vmax.f32 %v1044_v46, 0.0 }
 0x15f   :  { %v981_v51 = vld [vmem:[#allocation2 + $0xb0] sm:$0xff]  ;;  %955 = vst.msk [vmem:[#allocation2 + $0xc0] sm:$0xff] %vm22_vm0, %v929_v50 }
 0x160   :  { %1195 = vst.msk [vmem:[%s2123_s4 + $0x50] sm:$0xf] %vm1174_vm1, %v1335_v48  ;;  %v1336_v52 = vpack.c.bf16 %v1069_v49, %v1069_v49  ;;  %v1013_v53 = vmul.f32 %v1939_v55, %v981_v51 }
 0x161   :  { %v982_v54 = vld [vmem:[#allocation2 + $0xb8] sm:$0xff] }
 0x162   :  { %1196 = vst.msk [vmem:[%s2123_s4 + $0x54] sm:$0xf] %vm1174_vm1, %v1336_v52  ;;  %v1045_v56 = vadd.f32 %v1944_v60, %v1013_v53  ;;  %v1014_v57 = vmul.f32 %v1939_v55, %v982_v54 }
 0x164   :  { %v1070_v58 = vmax.f32 %v1045_v56, 0.0  ;;  %v1046_v59 = vadd.f32 %v1944_v60, %v1014_v57 }
 0x166   :  { %v1337_v61 = vpack.c.bf16 %v1070_v58, %v1070_v58  ;;  %v1071_v62 = vmax.f32 %v1046_v59, 0.0  ;;  %v983_v63 = vld [vmem:[#allocation2 + $0xc0] sm:$0xff] }
 0x167   :  { %v1015_v1 = vmul.f32 %v1939_v55, %v983_v63 }
 0x168   :  { %1197 = vst.msk [vmem:[%s2123_s4 + $0x58] sm:$0xf] %vm1174_vm1, %v1337_v61  ;;  %v1338_v0 = vpack.c.bf16 %v1071_v62, %v1071_v62 }
 0x169   :  { %v1047_v2 = vadd.f32 %v1944_v60, %v1015_v1 }
 0x16a   :  { %1198 = vst.msk [vmem:[%s2123_s4 + $0x5c] sm:$0xf] %vm1174_vm1, %v1338_v0 }
 0x16b   :  { %v1072_v3 = vmax.f32 %v1047_v2, 0.0 }
 0x16d   :  { %v1339_v4 = vpack.c.bf16 %v1072_v3, %v1072_v3 }
 0x16f   :  { %1199 = vst.msk [vmem:[%s2123_s4 + $0x60] sm:$0xf] %vm1174_vm1, %v1339_v4 }

// kernel: dqn_forward.6
= control target key start
LH: loop header
LB: loop body
LE: loop exit
PB: predicated region body
PF: predicated region fallthrough
CT: control target
= control target key end

     0   :  { %vm22_vm0 = vcmask 523264   ;;  %vm1084_vm1 = vcmask 519168   ;;  %s1924_s1 = inlined_call_operand.vmem [shape: bf16[576,64], index: 1, kind: input, shape index: {}]   ;;  %s1925_s0 = inlined_call_operand.vmem [shape: bf16[128,576], index: 0, kind: input, shape index: {}]   ;;  %s1926_s2 = inlined_call_operand.vmem [shape: f32[1,64], index: 2, kind: input, shape index: {}]   ;;  %s1927_s3 = inlined_call_operand.vmem [shape: f32[1,64], index: 3, kind: input, shape index: {}]   ;;  %s1928_s4 = inlined_call_operand.vmem [shape: bf16[128,64], index: 4, kind: output, shape index: {}]  }
   0x1   :  { %v1396_v0 = vld [vmem:[%s1924_s1 + $0x40] sm:$0xff]   ;;  %v1400_v4 = vld [vmem:[%s1924_s1 + $0x48] sm:$0xff]   ;;  %v1404_v8 = vld [vmem:[%s1924_s1 + $0x50] sm:$0xff]  }
   0x2   :  { %v1397_v1 = vld [vmem:[%s1924_s1 + $0xc0] sm:$0xff]   ;;  %1223 = vmatprep.subr.bf16.mxu0 %v1396_v0  ;;  %v1401_v5 = vld [vmem:[%s1924_s1 + $0xc8] sm:$0xff]   ;;  %v1405_v9 = vld [vmem:[%s1924_s1 + $0xd0] sm:$0xff]  }
   0x3   :  { %v1398_v2 = vld [vmem:[%s1924_s1] sm:$0xff]   ;;  %1287 = vmatprep.subr.bf16.mxu1 %v1397_v1  ;;  %v1402_v6 = vld [vmem:[%s1924_s1 + $0x8] sm:$0xff]   ;;  %v1406_v10 = vld [vmem:[%s1924_s1 + $0x10] sm:$0xff]  }
   0x4   :  { %v1399_v3 = vld [vmem:[%s1924_s1 + $0x80] sm:$0xff]   ;;  %1224 = vmatpush3.bf16.msra.mxu0 %v1398_v2  ;;  %v1403_v7 = vld [vmem:[%s1924_s1 + $0x88] sm:$0xff]   ;;  %v1407_v11 = vld [vmem:[%s1924_s1 + $0x90] sm:$0xff]  }
   0x5   :  { %1288 = vmatpush3.bf16.msra.mxu1 %v1399_v3  ;;  %1225 = vmatprep.subr.bf16.mxu0 %v1400_v4  ;;  %v1408_v12 = vld [vmem:[%s1924_s1 + $0x58] sm:$0xff]   ;;  %v1412_v16 = vld [vmem:[%s1924_s1 + $0x60] sm:$0xff]   ;;  %v1416_v20 = vld [vmem:[%s1924_s1 + $0x68] sm:$0xff]  }
   0x6   :  { %1289 = vmatprep.subr.bf16.mxu1 %v1401_v5  ;;  %v1409_v13 = vld [vmem:[%s1924_s1 + $0xd8] sm:$0xff]   ;;  %v1413_v17 = vld [vmem:[%s1924_s1 + $0xe0] sm:$0xff]   ;;  %v1417_v21 = vld [vmem:[%s1924_s1 + $0xe8] sm:$0xff]  }
   0x7   :  { %v1410_v14 = vld [vmem:[%s1924_s1 + $0x18] sm:$0xff]   ;;  %v1414_v18 = vld [vmem:[%s1924_s1 + $0x20] sm:$0xff]   ;;  %v1418_v22 = vld [vmem:[%s1924_s1 + $0x28] sm:$0xff]  }
   0x8   :  { %1226 = vmatpush3.bf16.msra.mxu0 %v1402_v6  ;;  %v1411_v15 = vld [vmem:[%s1924_s1 + $0x98] sm:$0xff]   ;;  %v1415_v19 = vld [vmem:[%s1924_s1 + $0xa0] sm:$0xff]   ;;  %v1419_v23 = vld [vmem:[%s1924_s1 + $0xa8] sm:$0xff]  }
   0x9   :  { %1290 = vmatpush3.bf16.msra.mxu1 %v1403_v7  ;;  %1227 = vmatprep.subr.bf16.mxu0 %v1404_v8  ;;  %v1420_v24 = vld [vmem:[%s1924_s1 + $0x70] sm:$0xff]   ;;  %v1424_v28 = vld [vmem:[%s1924_s1 + $0x78] sm:$0xff]   ;;  %v1433_v35 = vld [vmem:[%s1925_s0 + $0xc] ss:$20 sps:$4 sm:$0xff]  }
   0xa   :  { %1291 = vmatprep.subr.bf16.mxu1 %v1405_v9  ;;  %v1421_v25 = vld [vmem:[%s1924_s1 + $0xf0] sm:$0xff]   ;;  %v1425_v29 = vld [vmem:[%s1924_s1 + $0xf8] sm:$0xff]   ;;  %v1434_v36 = vld [vmem:[%s1924_s1 + $0x100] sm:$0xff]   ;;  %745 = vmatprep.mubr.bf16.mxu1 %v1433_v35 }
   0xb   :  { %v1422_v26 = vld [vmem:[%s1924_s1 + $0x30] sm:$0xff]   ;;  %v1426_v30 = vld [vmem:[%s1924_s1 + $0x38] sm:$0xff]   ;;  %v1435_v37 = vld [vmem:[%s1925_s0 + $0x2c] ss:$20 sps:$4 sm:$0xff]  }
   0xc   :  { %1228 = vmatpush3.bf16.msra.mxu0 %v1406_v10  ;;  %v1423_v27 = vld [vmem:[%s1924_s1 + $0xb0] sm:$0xff]   ;;  %v1427_v31 = vld [vmem:[%s1924_s1 + $0xb8] sm:$0xff]   ;;  %v1447_v42 = vld [vmem:[%s1924_s1 + $0x108] sm:$0xff]  }
   0xd   :  { %1292 = vmatpush3.bf16.msra.mxu1 %v1407_v11  ;;  %1229 = vmatprep.subr.bf16.mxu0 %v1408_v12  ;;  %v1428_v32 = vld [vmem:[%s1925_s0] ss:$20 sps:$4 sm:$0xff]   ;;  %v1430_v33 = vld [vmem:[%s1925_s0 + $0x4] ss:$20 sps:$4 sm:$0xff]   ;;  %v1431_v34 = vld [vmem:[%s1925_s0 + $0x8] ss:$20 sps:$4 sm:$0xff]  }
   0xe   :  { %1293 = vmatprep.subr.bf16.mxu1 %v1409_v13  ;;  %648 = vmatprep.mubr.bf16.mxu0 %v1430_v33  ;;  %v1437_v38 = vld [vmem:[%s1925_s0 + $0x34] ss:$20 sps:$4 sm:$0xff]   ;;  %v1440_v40 = vld [vmem:[%s1925_s0 + $0x30] ss:$20 sps:$4 sm:$0xff]   ;;  %v1446_v45 = vld [vmem:[%s1925_s0 + $0x58] ss:$20 sps:$4 sm:$0xff]  }
   0xf   :  { %v1439_v39 = vld [vmem:[%s1925_s0 + $0x28] ss:$20 sps:$4 sm:$0xff]   ;;  %v1445_v44 = vld [vmem:[%s1925_s0 + $0x50] ss:$20 sps:$4 sm:$0xff]   ;;  %v1452_v50 = vld [vmem:[%s1925_s0 + $0x78] ss:$20 sps:$4 sm:$0xff]  }
  0x10   :  { %1230 = vmatpush3.bf16.msra.mxu0 %v1410_v14  ;;  %v1441_v41 = vld [vmem:[%s1925_s0 + $0x54] ss:$20 sps:$4 sm:$0xff]   ;;  %v1443_v43 = vld [vmem:[%s1925_s0 + $0x5c] ss:$20 sps:$4 sm:$0xff]   ;;  %v1450_v48 = vld [vmem:[%s1925_s0 + $0x84] ss:$20 sps:$4 sm:$0xff]  }
  0x11   :  { %1294 = vmatpush3.bf16.msra.mxu1 %v1411_v15  ;;  %1231 = vmatprep.subr.bf16.mxu0 %v1412_v16  ;;  %v1460_v46 = vld [vmem:[%s1924_s1 + $0x110] sm:$0xff]   ;;  %v1473_v49 = vld [vmem:[%s1924_s1 + $0x118] sm:$0xff]   ;;  %v1456_v53 = vld [vmem:[%s1925_s0 + $0xac] ss:$20 sps:$4 sm:$0xff]   ;;  %v1488_v12 = vmov 0.0  }
  0x12   :  { %1295 = vmatprep.subr.bf16.mxu1 %v1413_v17  ;;  %v1448_v47 = vld [vmem:[%s1925_s0 + $0x7c] ss:$20 sps:$4 sm:$0xff]   ;;  %v1453_v51 = vld [vmem:[%s1925_s0 + $0x80] ss:$20 sps:$4 sm:$0xff]   ;;  %v1454_v52 = vld [vmem:[%s1925_s0 + $0xa4] ss:$20 sps:$4 sm:$0xff]  }
  0x13   :  { %v1458_v54 = vld [vmem:[%s1925_s0 + $0xa0] ss:$20 sps:$4 sm:$0xff]   ;;  %v1459_v55 = vld [vmem:[%s1925_s0 + $0xa8] ss:$20 sps:$4 sm:$0xff]   ;;  %v1466_v59 = vld [vmem:[%s1925_s0 + $0xd0] ss:$20 sps:$4 sm:$0xff]  }
  0x14   :  { %1232 = vmatpush3.bf16.msra.mxu0 %v1414_v18  ;;  %v1461_v56 = vld [vmem:[%s1925_s0 + $0xcc] ss:$20 sps:$4 sm:$0xff]   ;;  %v1463_v57 = vld [vmem:[%s1925_s0 + $0xd4] ss:$20 sps:$4 sm:$0xff]   ;;  %v1469_v61 = vld [vmem:[%s1925_s0 + $0xfc] ss:$20 sps:$4 sm:$0xff]  }
  0x15   :  { %1296 = vmatpush3.bf16.msra.mxu1 %v1415_v19  ;;  %1233 = vmatprep.subr.bf16.mxu0 %v1416_v20  ;;  %v1465_v58 = vld [vmem:[%s1925_s0 + $0xc8] ss:$20 sps:$4 sm:$0xff]   ;;  %v1471_v62 = vld [vmem:[%s1925_s0 + $0xf0] ss:$20 sps:$4 sm:$0xff]   ;;  %v1472_v63 = vld [vmem:[%s1925_s0 + $0xf8] ss:$20 sps:$4 sm:$0xff]  }
  0x16   :  { %1297 = vmatprep.subr.bf16.mxu1 %v1417_v21  ;;  %v1467_v60 = vld [vmem:[%s1925_s0 + $0xf4] ss:$20 sps:$4 sm:$0xff]   ;;  %v1474_v0 = vld [vmem:[%s1925_s0 + $0x11c] ss:$20 sps:$4 sm:$0xff]   ;;  %v1476_v1 = vld [vmem:[%s1925_s0 + $0x124] ss:$20 sps:$4 sm:$0xff]  }
  0x17   :  { %v1478_v2 = vld [vmem:[%s1925_s0 + $0x118] ss:$20 sps:$4 sm:$0xff]   ;;  %v1479_v3 = vld [vmem:[%s1925_s0 + $0x120] ss:$20 sps:$4 sm:$0xff]   ;;  %v1480_v4 = vld [vmem:[%s1925_s0 + $0x10] ss:$20 sps:$4 sm:$0xff]  }
  0x18   :  { %1234 = vmatpush3.bf16.msra.mxu0 %v1418_v22  ;;  %v1481_v5 = vld [vmem:[%s1925_s0 + $0xb0] ss:$20 sps:$4 sm:$0xff]   ;;  %v1482_v6 = vld [vmem:[%s1925_s0 + $0x38] ss:$20 sps:$4 sm:$0xff]   ;;  %v1484_v8 = vld [vmem:[%s1925_s0 + $0x60] ss:$20 sps:$4 sm:$0xff]  }
  0x19   :  { %1298 = vmatpush3.bf16.msra.mxu1 %v1419_v23  ;;  %1235 = vmatprep.subr.bf16.mxu0 %v1420_v24  ;;  %v1483_v7 = vld [vmem:[%s1925_s0 + $0xd8] ss:$20 sps:$4 sm:$0xff]   ;;  %v1485_v9 = vld [vmem:[%s1925_s0 + $0x100] ss:$20 sps:$4 sm:$0xff]   ;;  %v1486_v10 = vld [vmem:[%s1925_s0 + $0x88] ss:$20 sps:$4 sm:$0xff]  }
  0x1a   :  { %1299 = vmatprep.subr.bf16.mxu1 %v1421_v25  ;;  %v1487_v11 = vld [vmem:[%s1925_s0 + $0x128] ss:$20 sps:$4 sm:$0xff]   ;;  %25 = vst.msk [vmem:[#allocation2 + $0x10] sm:$0xff] %vm22_vm0, %v1488_v12  ;;  %23 = vst.msk [vmem:[#allocation2] sm:$0xff] %vm22_vm0, %v1488_v12 }
  0x1b   :  { %24 = vst.msk [vmem:[#allocation2 + $0x8] sm:$0xff] %vm22_vm0, %v1488_v12  ;;  %26 = vst.msk [vmem:[#allocation2 + $0x18] sm:$0xff] %vm22_vm0, %v1488_v12 }
  0x1c   :  { %1236 = vmatpush3.bf16.msra.mxu0 %v1422_v26  ;;  %27 = vst.msk [vmem:[#allocation2 + $0x20] sm:$0xff] %vm22_vm0, %v1488_v12  ;;  %28 = vst.msk [vmem:[#allocation2 + $0x28] sm:$0xff] %vm22_vm0, %v1488_v12 }
  0x1d   :  { %1300 = vmatpush3.bf16.msra.mxu1 %v1423_v27  ;;  %1237 = vmatprep.subr.bf16.mxu0 %v1424_v28  ;;  %29 = vst.msk [vmem:[#allocation2 + $0x30] sm:$0xff] %vm22_vm0, %v1488_v12  ;;  %30 = vst.msk [vmem:[#allocation2 + $0x38] sm:$0xff] %vm22_vm0, %v1488_v12 }
  0x1e   :  { %1301 = vmatprep.subr.bf16.mxu1 %v1425_v29  ;;  %31 = vst.msk [vmem:[#allocation2 + $0x40] sm:$0xff] %vm22_vm0, %v1488_v12  ;;  %32 = vst.msk [vmem:[#allocation2 + $0x48] sm:$0xff] %vm22_vm0, %v1488_v12 }
  0x1f   :  { %33 = vst.msk [vmem:[#allocation2 + $0x50] sm:$0xff] %vm22_vm0, %v1488_v12  ;;  %34 = vst.msk [vmem:[#allocation2 + $0x58] sm:$0xff] %vm22_vm0, %v1488_v12 }
  0x20   :  { %1238 = vmatpush3.bf16.msra.mxu0 %v1426_v30  ;;  %35 = vst.msk [vmem:[#allocation2 + $0x60] sm:$0xff] %vm22_vm0, %v1488_v12  ;;  %36 = vst.msk [vmem:[#allocation2 + $0x68] sm:$0xff] %vm22_vm0, %v1488_v12 }
  0x21   :  { %1302 = vmatpush3.bf16.msra.mxu1 %v1427_v31  ;;  %1363 = vmatprep.subr.bf16.mxu0 %v1434_v36  ;;  %37 = vst.msk [vmem:[#allocation2 + $0x70] sm:$0xff] %vm22_vm0, %v1488_v12  ;;  %38 = vst.msk [vmem:[#allocation2 + $0x78] sm:$0xff] %vm22_vm0, %v1488_v12 }
  0x22   :  { %1387 = vmatprep.subr.bf16.mxu1 %v1434_v36 }
  0x23   :  { %649 = vmatmul.mubr.bf16.vlgmr.msra.gmra.mrb[0].mxu0 %v1428_v32 }
  0x24   :  { %746 = vmatmul.mubr.bf16.vlgmr.msra.gmra.mrb[0].mxu1 %v1431_v34  ;;  %1364 = vmatpush3.bf16.msra.mxu0 %v1434_v36 }
  0x25   :  { %1391 = vmatpush3.bf16.msra.mxu1 %v1434_v36  ;;  %656 = vmatprep.mubr.bf16.mxu0 %v1435_v37 }
  0x26   :  { %753 = vmatprep.mubr.bf16.mxu1 %v1437_v38  ;;  %1365 = vmatprep.subr.bf16.mxu0 %v1447_v42 }
  0x27   :  { %1388 = vmatprep.subr.bf16.mxu1 %v1447_v42 }
  0x28   :  { %1366 = vmatpush3.bf16.msra.mxu0 %v1447_v42 }
  0x29   :  { %1392 = vmatpush3.bf16.msra.mxu1 %v1447_v42  ;;  %1367 = vmatprep.subr.bf16.mxu0 %v1460_v46 }
  0x2a   :  { %1389 = vmatprep.subr.bf16.mxu1 %v1460_v46 }
  0x2b   :  { %657 = vmatmul.mubr.bf16.gmra.mrb[4].mxu0 %v1439_v39 }
  0x2c   :  { %754 = vmatmul.mubr.bf16.gmra.mrb[4].mxu1 %v1440_v40  ;;  %664 = vmatprep.mubr.bf16.mxu0 %v1441_v41 }
  0x2d   :  { %761 = vmatprep.mubr.bf16.mxu1 %v1443_v43  ;;  %1368 = vmatpush3.bf16.msra.mxu0 %v1460_v46 }
  0x2e   :  { %1393 = vmatpush3.bf16.msra.mxu1 %v1460_v46  ;;  %1369 = vmatprep.subr.bf16.mxu0 %v1473_v49 }
  0x2f   :  { %1390 = vmatprep.subr.bf16.mxu1 %v1473_v49 }
  0x31   :  { %1370 = vmatpush3.bf16.msra.mxu0 %v1473_v49 }
  0x32   :  { %1394 = vmatpush3.bf16.msra.mxu1 %v1473_v49 }
  0x33   :  { %665 = vmatmul.mubr.bf16.gmra.mrb[8].mxu0 %v1445_v44 }
  0x34   :  { %762 = vmatmul.mubr.bf16.gmra.mrb[8].mxu1 %v1446_v45  ;;  %672 = vmatprep.mubr.bf16.mxu0 %v1448_v47 }
  0x35   :  { %769 = vmatprep.mubr.bf16.mxu1 %v1450_v48 }
  0x3b   :  { %673 = vmatmul.mubr.bf16.gmra.mrb[12].mxu0 %v1452_v50 }
  0x3c   :  { %770 = vmatmul.mubr.bf16.gmra.mrb[12].mxu1 %v1453_v51  ;;  %680 = vmatprep.mubr.bf16.mxu0 %v1454_v52 }
  0x3d   :  { %777 = vmatprep.mubr.bf16.mxu1 %v1456_v53 }
  0x43   :  { %681 = vmatmul.mubr.bf16.gmra.mrb[16].mxu0 %v1458_v54 }
  0x44   :  { %778 = vmatmul.mubr.bf16.gmra.mrb[16].mxu1 %v1459_v55  ;;  %688 = vmatprep.mubr.bf16.mxu0 %v1461_v56 }
  0x45   :  { %785 = vmatprep.mubr.bf16.mxu1 %v1463_v57 }
  0x4b   :  { %689 = vmatmul.mubr.bf16.gmra.mrb[20].mxu0 %v1465_v58 }
  0x4c   :  { %786 = vmatmul.mubr.bf16.gmra.mrb[20].mxu1 %v1466_v59  ;;  %696 = vmatprep.mubr.bf16.mxu0 %v1467_v60 }
  0x4d   :  { %793 = vmatprep.mubr.bf16.mxu1 %v1469_v61 }
  0x53   :  { %697 = vmatmul.mubr.bf16.gmra.mrb[24].mxu0 %v1471_v62 }
  0x54   :  { %794 = vmatmul.mubr.bf16.gmra.mrb[24].mxu1 %v1472_v63  ;;  %704 = vmatprep.mubr.bf16.mxu0 %v1474_v0 }
  0x55   :  { %801 = vmatprep.mubr.bf16.mxu1 %v1476_v1 }
  0x5b   :  { %705 = vmatmul.mubr.bf16.gmra.mrb[28].mxu0 %v1478_v2 }
  0x5c   :  { %802 = vmatmul.mubr.bf16.gmra.mrb[28].mxu1 %v1479_v3  ;;  %1371 = vmatprep.mubr.msk.bf16.mxu0 %vm22_vm0, %v1480_v4 }
  0x5d   :  { %1379 = vmatprep.mubr.msk.bf16.mxu1 %vm22_vm0, %v1481_v5 }
  0x63   :  { %1372 = vmatmul.mubr.msk.bf16.vlgmr.msra.gmra.mrb[32].mxu0 %vm22_vm0, %v1482_v6 }
  0x64   :  { %1380 = vmatmul.mubr.msk.bf16.vlgmr.msra.gmra.mrb[32].mxu1 %vm22_vm0, %v1483_v7  ;;  %1375 = vmatprep.mubr.msk.bf16.mxu0 %vm22_vm0, %v1484_v8 }
  0x65   :  { %1383 = vmatprep.mubr.msk.bf16.mxu1 %vm22_vm0, %v1485_v9 }
  0x6b   :  { %1376 = vmatmul.mubr.msk.bf16.gmra.mrb[36].mxu0 %vm22_vm0, %v1486_v10 }
  0x6c   :  { %1384 = vmatmul.mubr.msk.bf16.gmra.mrb[36].mxu1 %vm22_vm0, %v1487_v11 }
  0xf6   :  { %v1239_v13 = vpop.f32.mrb[0].mxu0 }
  0xf7   :  { %v1303_v14 = vpop.f32.mrb[0].mxu1  ;;  %v1240_v15 = vpop.f32.mrb[1].mxu0 }
  0xf8   :  { %v1241_v16 = vadd.f32 %v1240_v15, %v1239_v13  ;;  %v1304_v17 = vpop.f32.mrb[1].mxu1  ;;  %v1242_v18 = vpop.f32.mrb[2].mxu0 }
  0xf9   :  { %v1305_v19 = vadd.f32 %v1304_v17, %v1303_v14  ;;  %v1306_v20 = vpop.f32.mrb[2].mxu1  ;;  %v1243_v21 = vpop.f32.mrb[3].mxu0 }
  0xfa   :  { %v1244_v22 = vadd.f32 %v1243_v21, %v1242_v18  ;;  %v1307_v23 = vpop.f32.mrb[3].mxu1 }
  0xfb   :  { %v1308_v24 = vadd.f32 %v1307_v23, %v1306_v20  ;;  %v1766_v25 = vadd.f32 %v1305_v19, %v1241_v16 }
  0xfd   :  { %v1768_v26 = vadd.f32 %v1308_v24, %v1244_v22 }
  0xfe   :  { %v1245_v27 = vpop.f32.mrb[4].mxu0 }
  0xff   :  { %v1309_v28 = vpop.f32.mrb[4].mxu1  ;;  %v1246_v29 = vpop.f32.mrb[5].mxu0 }
 0x100   :  { %v1247_v30 = vadd.f32 %v1246_v29, %v1245_v27  ;;  %v1310_v31 = vpop.f32.mrb[5].mxu1  ;;  %v1248_v32 = vpop.f32.mrb[6].mxu0 }
 0x101   :  { %v1311_v33 = vadd.f32 %v1310_v31, %v1309_v28  ;;  %v1312_v34 = vpop.f32.mrb[6].mxu1  ;;  %v1249_v35 = vpop.f32.mrb[7].mxu0 }
 0x102   :  { %v1250_v36 = vadd.f32 %v1249_v35, %v1248_v32  ;;  %v1313_v37 = vpop.f32.mrb[7].mxu1 }
 0x103   :  { %v1314_v38 = vadd.f32 %v1313_v37, %v1312_v34  ;;  %v1770_v39 = vadd.f32 %v1311_v33, %v1247_v30 }
 0x105   :  { %v1772_v40 = vadd.f32 %v1314_v38, %v1250_v36 }
 0x106   :  { %v1251_v41 = vpop.f32.mrb[8].mxu0 }
 0x107   :  { %v1315_v42 = vpop.f32.mrb[8].mxu1  ;;  %v1252_v43 = vpop.f32.mrb[9].mxu0 }
 0x108   :  { %v1253_v44 = vadd.f32 %v1252_v43, %v1251_v41  ;;  %v1316_v45 = vpop.f32.mrb[9].mxu1  ;;  %v1254_v46 = vpop.f32.mrb[10].mxu0 }
 0x109   :  { %v1317_v47 = vadd.f32 %v1316_v45, %v1315_v42  ;;  %v1318_v48 = vpop.f32.mrb[10].mxu1  ;;  %v1255_v49 = vpop.f32.mrb[11].mxu0 }
 0x10a   :  { %v1256_v50 = vadd.f32 %v1255_v49, %v1254_v46  ;;  %v1319_v51 = vpop.f32.mrb[11].mxu1 }
 0x10b   :  { %v1320_v52 = vadd.f32 %v1319_v51, %v1318_v48  ;;  %v1774_v53 = vadd.f32 %v1317_v47, %v1253_v44 }
 0x10d   :  { %v1776_v54 = vadd.f32 %v1320_v52, %v1256_v50 }
 0x10e   :  { %v1257_v55 = vpop.f32.mrb[12].mxu0 }
 0x10f   :  { %v1321_v56 = vpop.f32.mrb[12].mxu1  ;;  %v1258_v57 = vpop.f32.mrb[13].mxu0 }
 0x110   :  { %v1259_v58 = vadd.f32 %v1258_v57, %v1257_v55  ;;  %v1322_v59 = vpop.f32.mrb[13].mxu1  ;;  %v1260_v60 = vpop.f32.mrb[14].mxu0 }
 0x111   :  { %v1323_v61 = vadd.f32 %v1322_v59, %v1321_v56  ;;  %v1324_v62 = vpop.f32.mrb[14].mxu1  ;;  %v1261_v63 = vpop.f32.mrb[15].mxu0 }
 0x112   :  { %v1262_v0 = vadd.f32 %v1261_v63, %v1260_v60  ;;  %v1325_v1 = vpop.f32.mrb[15].mxu1 }
 0x113   :  { %v1326_v2 = vadd.f32 %v1325_v1, %v1324_v62  ;;  %v1778_v3 = vadd.f32 %v1323_v61, %v1259_v58 }
 0x115   :  { %v1780_v4 = vadd.f32 %v1326_v2, %v1262_v0 }
 0x116   :  { %v1263_v5 = vpop.f32.mrb[16].mxu0 }
 0x117   :  { %v1327_v6 = vpop.f32.mrb[16].mxu1  ;;  %v1264_v7 = vpop.f32.mrb[17].mxu0 }
 0x118   :  { %v1265_v8 = vadd.f32 %v1264_v7, %v1263_v5  ;;  %v1328_v9 = vpop.f32.mrb[17].mxu1  ;;  %v1266_v10 = vpop.f32.mrb[18].mxu0  ;;  %v41_v5 = vld [vmem:[#allocation2 + $0x10] sm:$0xff] }
 0x119   :  { %v1329_v11 = vadd.f32 %v1328_v9, %v1327_v6  ;;  %v1330_v12 = vpop.f32.mrb[18].mxu1  ;;  %v1267_v13 = vpop.f32.mrb[19].mxu0 }
 0x11a   :  { %v1268_v14 = vadd.f32 %v1267_v13, %v1266_v10  ;;  %v1331_v15 = vpop.f32.mrb[19].mxu1  ;;  %v39_v10 = vld [vmem:[#allocation2] sm:$0xff] }
 0x11b   :  { %v1332_v16 = vadd.f32 %v1331_v15, %v1330_v12  ;;  %v780_v17 = vadd.f32 %v1329_v11, %v1265_v8  ;;  %v49_v8 = vld [vmem:[#allocation2 + $0x50] sm:$0xff] }
 0x11d   :  { %v1782_v18 = vadd.f32 %v1332_v16, %v1268_v14  ;;  %v47_v14 = vld [vmem:[#allocation2 + $0x40] sm:$0xff]  ;;  %v42_v16 = vld [vmem:[#allocation2 + $0x18] sm:$0xff] }
 0x11e   :  { %v1269_v19 = vpop.f32.mrb[20].mxu0 }
 0x11f   :  { %v1333_v20 = vpop.f32.mrb[20].mxu1  ;;  %v1270_v21 = vpop.f32.mrb[21].mxu0 }
 0x120   :  { %v1271_v22 = vadd.f32 %v1270_v21, %v1269_v19  ;;  %v1334_v23 = vpop.f32.mrb[21].mxu1  ;;  %v1272_v24 = vpop.f32.mrb[22].mxu0 }
 0x121   :  { %v1335_v27 = vadd.f32 %v1334_v23, %v1333_v20  ;;  %v1336_v28 = vpop.f32.mrb[22].mxu1  ;;  %v1273_v29 = vpop.f32.mrb[23].mxu0  ;;  %v50_v23 = vld [vmem:[#allocation2 + $0x58] sm:$0xff] }
 0x122   :  { %v1274_v30 = vadd.f32 %v1273_v29, %v1272_v24  ;;  %v1337_v31 = vpop.f32.mrb[23].mxu1 }
 0x123   :  { %v1338_v32 = vadd.f32 %v1337_v31, %v1336_v28  ;;  %v788_v33 = vadd.f32 %v1335_v27, %v1271_v22  ;;  %v40_v27 = vld [vmem:[#allocation2 + $0x8] sm:$0xff] }
 0x125   :  { %v791_v34 = vadd.f32 %v1338_v32, %v1274_v30  ;;  %v48_v32 = vld [vmem:[#allocation2 + $0x48] sm:$0xff] }
 0x126   :  { %v1275_v35 = vpop.f32.mrb[24].mxu0 }
 0x127   :  { %v1339_v36 = vpop.f32.mrb[24].mxu1  ;;  %v1276_v37 = vpop.f32.mrb[25].mxu0 }
 0x128   :  { %v1277_v38 = vadd.f32 %v1276_v37, %v1275_v35  ;;  %v1340_v41 = vpop.f32.mrb[25].mxu1  ;;  %v1278_v42 = vpop.f32.mrb[26].mxu0 }
 0x129   :  { %v1341_v43 = vadd.f32 %v1340_v41, %v1339_v36  ;;  %v1342_v44 = vpop.f32.mrb[26].mxu1  ;;  %v1279_v45 = vpop.f32.mrb[27].mxu0 }
 0x12a   :  { %v1280_v46 = vadd.f32 %v1279_v45, %v1278_v42  ;;  %v1343_v47 = vpop.f32.mrb[27].mxu1  ;;  %v43_v42 = vld [vmem:[#allocation2 + $0x20] sm:$0xff] }
 0x12b   :  { %v1344_v48 = vadd.f32 %v1343_v47, %v1342_v44  ;;  %v1784_v49 = vadd.f32 %v1341_v43, %v1277_v38  ;;  %v53_v38 = vld [vmem:[#allocation2 + $0x70] sm:$0xff]  ;;  %v1807_v44 = vld [vmem:[%s1926_s2] ss:$0 sm:$0xff] }
 0x12c   :  { %v51_v47 = vld [vmem:[#allocation2 + $0x60] sm:$0xff] }
 0x12d   :  { %v1786_v50 = vadd.f32 %v1344_v48, %v1280_v46 }
 0x12e   :  { %v1281_v51 = vpop.f32.mrb[28].mxu0 }
 0x12f   :  { %v1345_v52 = vpop.f32.mrb[28].mxu1  ;;  %v1282_v55 = vpop.f32.mrb[29].mxu0 }
 0x130   :  { %v1283_v56 = vadd.f32 %v1282_v55, %v1281_v51  ;;  %v1346_v57 = vpop.f32.mrb[29].mxu1  ;;  %v1284_v58 = vpop.f32.mrb[30].mxu0  ;;  %v46_v51 = vld [vmem:[#allocation2 + $0x38] sm:$0xff] }
 0x131   :  { %v1347_v59 = vadd.f32 %v1346_v57, %v1345_v52  ;;  %v1348_v60 = vpop.f32.mrb[30].mxu1  ;;  %v1285_v61 = vpop.f32.mrb[31].mxu0  ;;  %v54_v57 = vld [vmem:[#allocation2 + $0x78] sm:$0xff] }
 0x132   :  { %v1286_v62 = vadd.f32 %v1285_v61, %v1284_v58  ;;  %v1349_v63 = vpop.f32.mrb[31].mxu1 }
 0x133   :  { %v1350_v0 = vadd.f32 %v1349_v63, %v1348_v60  ;;  %v804_v1 = vadd.f32 %v1347_v59, %v1283_v56  ;;  %v44_v59 = vld [vmem:[#allocation2 + $0x28] sm:$0xff] }
 0x135   :  { %v1788_v2 = vadd.f32 %v1350_v0, %v1286_v62  ;;  %v1815_v62 = vld [vmem:[%s1927_s3] ss:$0 sm:$0xff] }
 0x136   :  { %v1373_v6 = vpop.f32.mrb[32].mxu0 }
 0x137   :  { %v853_v7 = vadd.f32 %v1373_v6, %v1770_v39  ;;  %v1381_v9 = vpop.f32.mrb[32].mxu1  ;;  %v844_v11 = vpop.f32.mrb[33].mxu0 }
 0x138   :  { %v885_v12 = vadd.f32 %v1381_v9, %v788_v33  ;;  %v845_v13 = vadd.f32 %v844_v11, %v1766_v25  ;;  %v876_v15 = vpop.f32.mrb[33].mxu1  ;;  %v1374_v19 = vpop.f32.mrb[34].mxu0 }
 0x139   :  { %v909_v20 = vadd.f32 %v853_v7, %v41_v5  ;;  %v877_v21 = vadd.f32 %v876_v15, %v780_v17  ;;  %v856_v22 = vadd.f32 %v1374_v19, %v1772_v40  ;;  %v1382_v24 = vpop.f32.mrb[34].mxu1  ;;  %v847_v28 = vpop.f32.mrb[35].mxu0  ;;  %v52_v5 = vld [vmem:[#allocation2 + $0x68] sm:$0xff] }
 0x13a   :  { %v917_v39 = vadd.f32 %v885_v12, %v49_v8  ;;  %v907_v29 = vadd.f32 %v845_v13, %v39_v10  ;;  %v888_v30 = vadd.f32 %v1382_v24, %v791_v34  ;;  %v848_v31 = vadd.f32 %v847_v28, %v1768_v26  ;;  %v879_v33 = vpop.f32.mrb[35].mxu1  ;;  %v45_v26 = vld [vmem:[#allocation2 + $0x30] sm:$0xff] }
 0x13b   :  { %925 = vst.msk [vmem:[#allocation2 + $0x10] sm:$0xff] %vm22_vm0, %v909_v20  ;;  %v915_v25 = vadd.f32 %v877_v21, %v47_v14  ;;  %v910_v35 = vadd.f32 %v856_v22, %v42_v16  ;;  %v880_v36 = vadd.f32 %v879_v33, %v1782_v18 }
 0x13c   :  { %933 = vst.msk [vmem:[#allocation2 + $0x50] sm:$0xff] %vm22_vm0, %v917_v39  ;;  %923 = vst.msk [vmem:[#allocation2] sm:$0xff] %vm22_vm0, %v907_v29  ;;  %v918_v40 = vadd.f32 %v888_v30, %v50_v23  ;;  %v908_v17 = vadd.f32 %v848_v31, %v40_v27 }
 0x13d   :  { %931 = vst.msk [vmem:[#allocation2 + $0x40] sm:$0xff] %vm22_vm0, %v915_v25  ;;  %926 = vst.msk [vmem:[#allocation2 + $0x18] sm:$0xff] %vm22_vm0, %v910_v35  ;;  %v916_v34 = vadd.f32 %v880_v36, %v48_v32 }
 0x13e   :  { %934 = vst.msk [vmem:[#allocation2 + $0x58] sm:$0xff] %vm22_vm0, %v918_v40  ;;  %924 = vst.msk [vmem:[#allocation2 + $0x8] sm:$0xff] %vm22_vm0, %v908_v17  ;;  %v1377_v37 = vpop.f32.mrb[36].mxu0 }
 0x13f   :  { %932 = vst.msk [vmem:[#allocation2 + $0x48] sm:$0xff] %vm22_vm0, %v916_v34  ;;  %v869_v18 = vadd.f32 %v1377_v37, %v1778_v3  ;;  %v1385_v41 = vpop.f32.mrb[36].mxu1  ;;  %v860_v43 = vpop.f32.mrb[37].mxu0 }
 0x140   :  { %v901_v45 = vadd.f32 %v1385_v41, %v804_v1  ;;  %v861_v46 = vadd.f32 %v860_v43, %v1774_v53  ;;  %v892_v48 = vpop.f32.mrb[37].mxu1  ;;  %v1378_v52 = vpop.f32.mrb[38].mxu0 }
 0x141   :  { %v913_v55 = vadd.f32 %v869_v18, %v45_v26  ;;  %v893_v3 = vadd.f32 %v892_v48, %v1784_v49  ;;  %v872_v56 = vadd.f32 %v1378_v52, %v1780_v4  ;;  %v1386_v58 = vpop.f32.mrb[38].mxu1  ;;  %v863_v60 = vpop.f32.mrb[39].mxu0 }
 0x142   :  { %v944_v61 = vld [vmem:[#allocation2 + $0x10] sm:$0xff]  ;;  %v921_v53 = vadd.f32 %v901_v45, %v53_v38  ;;  %v911_v63 = vadd.f32 %v861_v46, %v43_v42  ;;  %v904_v0 = vadd.f32 %v1386_v58, %v1788_v2  ;;  %v864_v1 = vadd.f32 %v863_v60, %v1776_v54  ;;  %v895_v49 = vpop.f32.mrb[39].mxu1 }
 0x143   :  { %v967_v4 = vmul.f32 %v1807_v44, %v944_v61  ;;  %v952_v6 = vld [vmem:[#allocation2 + $0x50] sm:$0xff]  ;;  %v942_v7 = vld [vmem:[#allocation2] sm:$0xff]  ;;  %929 = vst.msk [vmem:[#allocation2 + $0x30] sm:$0xff] %vm22_vm0, %v913_v55  ;;  %v919_v8 = vadd.f32 %v893_v3, %v51_v47  ;;  %v914_v9 = vadd.f32 %v872_v56, %v46_v51  ;;  %v896_v10 = vadd.f32 %v895_v49, %v1786_v50 }
 0x144   :  { %v975_v11 = vmul.f32 %v1807_v44, %v952_v6  ;;  %v965_v12 = vmul.f32 %v1807_v44, %v942_v7  ;;  %v950_v13 = vld [vmem:[#allocation2 + $0x40] sm:$0xff]  ;;  %v945_v2 = vld [vmem:[#allocation2 + $0x18] sm:$0xff]  ;;  %937 = vst.msk [vmem:[#allocation2 + $0x70] sm:$0xff] %vm22_vm0, %v921_v53  ;;  %927 = vst.msk [vmem:[#allocation2 + $0x20] sm:$0xff] %vm22_vm0, %v911_v63  ;;  %v922_v54 = vadd.f32 %v904_v0, %v54_v57 }
 0x145   :  { %v912_v14 = vadd.f32 %v864_v1, %v44_v59  ;;  %v990_v15 = vadd.f32 %v1815_v62, %v967_v4  ;;  %v973_v16 = vmul.f32 %v1807_v44, %v950_v13  ;;  %v968_v19 = vmul.f32 %v1807_v44, %v945_v2  ;;  %v953_v20 = vld [vmem:[#allocation2 + $0x58] sm:$0xff]  ;;  %v943_v50 = vld [vmem:[#allocation2 + $0x8] sm:$0xff]  ;;  %935 = vst.msk [vmem:[#allocation2 + $0x60] sm:$0xff] %vm22_vm0, %v919_v8 }
 0x146   :  { %930 = vst.msk [vmem:[#allocation2 + $0x38] sm:$0xff] %vm22_vm0, %v914_v9  ;;  %v920_v21 = vadd.f32 %v896_v10, %v52_v5  ;;  %v998_v22 = vadd.f32 %v1815_v62, %v975_v11  ;;  %v988_v23 = vadd.f32 %v1815_v62, %v965_v12  ;;  %v976_v24 = vmul.f32 %v1807_v44, %v953_v20  ;;  %v951_v28 = vld [vmem:[#allocation2 + $0x48] sm:$0xff] }
 0x147   :  { %v966_v27 = vmul.f32 %v1807_v44, %v943_v50  ;;  %938 = vst.msk [vmem:[#allocation2 + $0x78] sm:$0xff] %vm22_vm0, %v922_v54  ;;  %928 = vst.msk [vmem:[#allocation2 + $0x28] sm:$0xff] %vm22_vm0, %v912_v14  ;;  %v1006_v39 = vmax.f32 %v990_v15, 0.0  ;;  %v996_v29 = vadd.f32 %v1815_v62, %v973_v16  ;;  %v991_v30 = vadd.f32 %v1815_v62, %v968_v19 }
 0x148   :  { %v974_v31 = vmul.f32 %v1807_v44, %v951_v28  ;;  %936 = vst.msk [vmem:[#allocation2 + $0x68] sm:$0xff] %vm22_vm0, %v920_v21  ;;  %v1014_v32 = vmax.f32 %v998_v22, 0.0  ;;  %v1004_v33 = vmax.f32 %v988_v23, 0.0  ;;  %v999_v25 = vadd.f32 %v1815_v62, %v976_v24 }
 0x149   :  { %v989_v35 = vadd.f32 %v1815_v62, %v966_v27  ;;  %v1209_v36 = vpack.c.bf16 %v1006_v39, %v1006_v39  ;;  %v1012_v40 = vmax.f32 %v996_v29, 0.0  ;;  %v1007_v17 = vmax.f32 %v991_v30, 0.0 }
 0x14a   :  { %v997_v34 = vadd.f32 %v1815_v62, %v974_v31  ;;  %v1217_v26 = vpack.c.bf16 %v1014_v32, %v1014_v32  ;;  %v1207_v37 = vpack.c.bf16 %v1004_v33, %v1004_v33  ;;  %v1015_v18 = vmax.f32 %v999_v25, 0.0  ;;  %v948_v41 = vld [vmem:[#allocation2 + $0x30] sm:$0xff] }
 0x14b   :  { %v1005_v38 = vmax.f32 %v989_v35, 0.0  ;;  %1087 = vst.msk [vmem:[%s1928_s4 + $0x8] sm:$0xf] %vm1084_vm1, %v1209_v36  ;;  %v1215_v42 = vpack.c.bf16 %v1012_v40, %v1012_v40  ;;  %v1210_v43 = vpack.c.bf16 %v1007_v17, %v1007_v17  ;;  %v971_v46 = vmul.f32 %v1807_v44, %v948_v41  ;;  %v956_v47 = vld [vmem:[#allocation2 + $0x70] sm:$0xff]  ;;  %v946_v48 = vld [vmem:[#allocation2 + $0x20] sm:$0xff] }
 0x14c   :  { %v1013_v45 = vmax.f32 %v997_v34, 0.0  ;;  %1095 = vst.msk [vmem:[%s1928_s4 + $0x28] sm:$0xf] %vm1084_vm1, %v1217_v26  ;;  %1085 = vst.msk [vmem:[%s1928_s4] sm:$0xf] %vm1084_vm1, %v1207_v37  ;;  %v1218_v51 = vpack.c.bf16 %v1015_v18, %v1015_v18  ;;  %v979_v55 = vmul.f32 %v1807_v44, %v956_v47  ;;  %v969_v3 = vmul.f32 %v1807_v44, %v946_v48  ;;  %v954_v56 = vld [vmem:[#allocation2 + $0x60] sm:$0xff] }
 0x14d   :  { %v1208_v52 = vpack.c.bf16 %v1005_v38, %v1005_v38  ;;  %v949_v57 = vld [vmem:[#allocation2 + $0x38] sm:$0xff]  ;;  %1093 = vst.msk [vmem:[%s1928_s4 + $0x20] sm:$0xf] %vm1084_vm1, %v1215_v42  ;;  %1088 = vst.msk [vmem:[%s1928_s4 + $0xc] sm:$0xf] %vm1084_vm1, %v1210_v43  ;;  %v994_v59 = vadd.f32 %v1815_v62, %v971_v46  ;;  %v977_v60 = vmul.f32 %v1807_v44, %v954_v56 }
 0x14e   :  { %v1216_v58 = vpack.c.bf16 %v1013_v45, %v1013_v45  ;;  %v972_v61 = vmul.f32 %v1807_v44, %v949_v57  ;;  %v957_v53 = vld [vmem:[#allocation2 + $0x78] sm:$0xff]  ;;  %v947_v63 = vld [vmem:[#allocation2 + $0x28] sm:$0xff]  ;;  %1096 = vst.msk [vmem:[%s1928_s4 + $0x2c] sm:$0xf] %vm1084_vm1, %v1218_v51  ;;  %v1002_v0 = vadd.f32 %v1815_v62, %v979_v55  ;;  %v992_v1 = vadd.f32 %v1815_v62, %v969_v3 }
 0x14f   :  { %1086 = vst.msk [vmem:[%s1928_s4 + $0x4] sm:$0xf] %vm1084_vm1, %v1208_v52  ;;  %v980_v5 = vmul.f32 %v1807_v44, %v957_v53  ;;  %v970_v49 = vmul.f32 %v1807_v44, %v947_v63  ;;  %v955_v4 = vld [vmem:[#allocation2 + $0x68] sm:$0xff]  ;;  %v1010_v6 = vmax.f32 %v994_v59, 0.0  ;;  %v1000_v7 = vadd.f32 %v1815_v62, %v977_v60 }
 0x150   :  { %1094 = vst.msk [vmem:[%s1928_s4 + $0x24] sm:$0xf] %vm1084_vm1, %v1216_v58  ;;  %v995_v8 = vadd.f32 %v1815_v62, %v972_v61  ;;  %v978_v9 = vmul.f32 %v1807_v44, %v955_v4  ;;  %v1018_v10 = vmax.f32 %v1002_v0, 0.0  ;;  %v1008_v11 = vmax.f32 %v992_v1, 0.0 }
 0x151   :  { %v1003_v12 = vadd.f32 %v1815_v62, %v980_v5  ;;  %v993_v13 = vadd.f32 %v1815_v62, %v970_v49  ;;  %v1213_v2 = vpack.c.bf16 %v1010_v6, %v1010_v6  ;;  %v1016_v54 = vmax.f32 %v1000_v7, 0.0 }
 0x152   :  { %v1011_v14 = vmax.f32 %v995_v8, 0.0  ;;  %v1001_v15 = vadd.f32 %v1815_v62, %v978_v9  ;;  %v1221_v16 = vpack.c.bf16 %v1018_v10, %v1018_v10  ;;  %v1211_v19 = vpack.c.bf16 %v1008_v11, %v1008_v11 }
 0x153   :  { %v1019_v20 = vmax.f32 %v1003_v12, 0.0  ;;  %v1009_v50 = vmax.f32 %v993_v13, 0.0  ;;  %1091 = vst.msk [vmem:[%s1928_s4 + $0x18] sm:$0xf] %vm1084_vm1, %v1213_v2  ;;  %v1219_v44 = vpack.c.bf16 %v1016_v54, %v1016_v54 }
 0x154   :  { %v1214_v21 = vpack.c.bf16 %v1011_v14, %v1011_v14  ;;  %v1017_v22 = vmax.f32 %v1001_v15, 0.0  ;;  %1099 = vst.msk [vmem:[%s1928_s4 + $0x38] sm:$0xf] %vm1084_vm1, %v1221_v16  ;;  %1089 = vst.msk [vmem:[%s1928_s4 + $0x10] sm:$0xf] %vm1084_vm1, %v1211_v19 }
 0x155   :  { %v1222_v62 = vpack.c.bf16 %v1019_v20, %v1019_v20  ;;  %v1212_v23 = vpack.c.bf16 %v1009_v50, %v1009_v50  ;;  %1097 = vst.msk [vmem:[%s1928_s4 + $0x30] sm:$0xf] %vm1084_vm1, %v1219_v44 }
 0x156   :  { %1092 = vst.msk [vmem:[%s1928_s4 + $0x1c] sm:$0xf] %vm1084_vm1, %v1214_v21  ;;  %v1220_v24 = vpack.c.bf16 %v1017_v22, %v1017_v22 }
 0x157   :  { %1100 = vst.msk [vmem:[%s1928_s4 + $0x3c] sm:$0xf] %vm1084_vm1, %v1222_v62  ;;  %1090 = vst.msk [vmem:[%s1928_s4 + $0x14] sm:$0xf] %vm1084_vm1, %v1212_v23 }
 0x158   :  { %1098 = vst.msk [vmem:[%s1928_s4 + $0x34] sm:$0xf] %vm1084_vm1, %v1220_v24 }

// kernel: dqn_forward.7
= control target key start
LH: loop header
LB: loop body
LE: loop exit
PB: predicated region body
PF: predicated region fallthrough
CT: control target
= control target key end

     0   :  { %10 = vsyncpa [#allocation4], 0  ;;  %s2240_s18 = smov 0   ;;  %s2548_s0 = inlined_call_operand.vmem [shape: bf16[2,4096], index: 0, kind: input, shape index: {}]   ;;  %s2549_s1 = inlined_call_operand.vmem [shape: bf16[4096,512], index: 1, kind: input, shape index: {}]   ;;  %s2550_s2 = inlined_call_operand.vmem [shape: f32[1,512], index: 2, kind: input, shape index: {}]   ;;  %s2551_s3 = inlined_call_operand.vmem [shape: bf16[512,4], index: 3, kind: input, shape index: {}]   ;;  %s2552_s4 = inlined_call_operand.vmem [shape: f32[1,4], index: 4, kind: input, shape index: {}]   ;;  %s2553_s5 = inlined_call_operand.hbm [shape: f32[2,4], index: 5, kind: output, shape index: {}]  }
   0x1 LB: > { %s2246_s19 = sadd.s32 4294967295, %s2204_s18   ;;  %p1700_p0 = scmp.ge.s32.totalorder %s2204_s18, 1  ;;  %s2204_s18 = sphi %s2240_s18, %s16_s18  }
   0x2   : > { %p195_p1 = scmp.lt.s32.totalorder %s2204_s18, 9 }
   0x4   : > { %p196_p2 = pnand %p1700_p0, %p195_p1 }
   0x5   : > { %s1701_s20 = sshll.u32 (!%p196_p2), %s2246_s19, 2  ;;  %s1702_s21 = sshll.u32 (!%p196_p2), %s2246_s19, 6 }
   0x6   : > { %199 = sbr.rel (%p196_p2) target bundleno = 636 (0x27c), region = 40  ;;  %p224_p3 = scmp.lt.s32.totalorder (!%p196_p2), %s1701_s20, 31 }
   0x7   : > { %p229_p4 = scmp.lt.s32.totalorder (!%p196_p2), %s1702_s21, 511  ;;  %p1705_p5 = scmp.ne.s32.totalorder (!%p196_p2), %s2246_s19, 0 }
   0xd   : > { %s2555_s20 = smov (!%p224_p3, %s1701_s20), 31  ;;  %s2557_s21 = smov (!%p229_p4, %s1702_s21), 511 }
   0xe   : > { %s226_s24 = scalar_lea.vmem %s2548_s0, %s2555_s20  ;;  %s1873_s25 = sshll.u32 %s2557_s21, 4  ;;  %v2206_v0 = vmov (!%p1705_p5), 0.0  }
   0xf   : > { %s2261_s28 = scalar_lea.vmem %s2549_s1, %s1873_s25  ;;  %239 = sbr.rel (%p1705_p5) target bundleno = 22 (0x16), region = 44  ;;  %240 = vst [vmem:[#allocation2] sm:$0xff] (!%p1705_p5), %v2206_v0 }
  0x16 PF: > { %v1944_v1 = vld [vmem:[%s2261_s28 + $0x4] ss:$16 sps:$4 sm:$0xff]   ;;  %v1946_v2 = vld [vmem:[%s2261_s28 + $0xc] ss:$16 sps:$4 sm:$0xff]   ;;  %v1948_v3 = vld [vmem:[%s2261_s28] ss:$16 sps:$4 sm:$0xff]   ;;  %v383_v41 = vlaneseq }
  0x17   : > { %1040 = vmatprep.subr.bf16.mxu0 %v1944_v1  ;;  %v1949_v4 = vld [vmem:[%s2261_s28 + $0x8] ss:$16 sps:$4 sm:$0xff]   ;;  %1122 = vmatprep.subr.bf16.mxu1 %v1946_v2  ;;  %v1950_v5 = vld [vmem:[%s2261_s28 + $0x24] ss:$16 sps:$4 sm:$0xff]   ;;  %v1952_v6 = vld [vmem:[%s2261_s28 + $0x2c] ss:$16 sps:$4 sm:$0xff]  }
  0x18   : > { %1041 = vmatpush1.bf16.msra.mxu0 %v1948_v3  ;;  %1123 = vmatpush1.bf16.msra.mxu1 %v1949_v4  ;;  %v1954_v7 = vld [vmem:[%s2261_s28 + $0x20] ss:$16 sps:$4 sm:$0xff]   ;;  %v1955_v8 = vld [vmem:[%s2261_s28 + $0x28] ss:$16 sps:$4 sm:$0xff]   ;;  %v1956_v9 = vld [vmem:[%s2261_s28 + $0x44] ss:$16 sps:$4 sm:$0xff]  }
  0x19   : > { %1042 = vmatprep.subr.bf16.mxu0 %v1950_v5  ;;  %1124 = vmatprep.subr.bf16.mxu1 %v1952_v6  ;;  %v1958_v10 = vld [vmem:[%s2261_s28 + $0x4c] ss:$16 sps:$4 sm:$0xff]   ;;  %v1960_v11 = vld [vmem:[%s2261_s28 + $0x40] ss:$16 sps:$4 sm:$0xff]   ;;  %v1961_v12 = vld [vmem:[%s2261_s28 + $0x48] ss:$16 sps:$4 sm:$0xff]  }
  0x1a   : > { %v1962_v13 = vld [vmem:[%s2261_s28 + $0x64] ss:$16 sps:$4 sm:$0xff]   ;;  %v1964_v14 = vld [vmem:[%s2261_s28 + $0x6c] ss:$16 sps:$4 sm:$0xff]   ;;  %v1966_v15 = vld [vmem:[%s2261_s28 + $0x60] ss:$16 sps:$4 sm:$0xff]  }
  0x1b   : > { %v1967_v16 = vld [vmem:[%s2261_s28 + $0x68] ss:$16 sps:$4 sm:$0xff]   ;;  %v1968_v17 = vld [vmem:[%s2261_s28 + $0x84] ss:$16 sps:$4 sm:$0xff]   ;;  %v1970_v18 = vld [vmem:[%s2261_s28 + $0x8c] ss:$16 sps:$4 sm:$0xff]  }
  0x1c   : > { %1043 = vmatpush1.bf16.msra.mxu0 %v1954_v7  ;;  %1125 = vmatpush1.bf16.msra.mxu1 %v1955_v8  ;;  %v1972_v19 = vld [vmem:[%s2261_s28 + $0x80] ss:$16 sps:$4 sm:$0xff]   ;;  %v1973_v20 = vld [vmem:[%s2261_s28 + $0x88] ss:$16 sps:$4 sm:$0xff]   ;;  %v1974_v21 = vld [vmem:[%s2261_s28 + $0xa4] ss:$16 sps:$4 sm:$0xff]  }
  0x1d   : > { %1044 = vmatprep.subr.bf16.mxu0 %v1956_v9  ;;  %1126 = vmatprep.subr.bf16.mxu1 %v1958_v10  ;;  %v1976_v22 = vld [vmem:[%s2261_s28 + $0xac] ss:$16 sps:$4 sm:$0xff]   ;;  %v1978_v23 = vld [vmem:[%s2261_s28 + $0xa0] ss:$16 sps:$4 sm:$0xff]   ;;  %v1979_v24 = vld [vmem:[%s2261_s28 + $0xa8] ss:$16 sps:$4 sm:$0xff]  }
  0x1e   : > { %v1980_v25 = vld [vmem:[%s2261_s28 + $0xc4] ss:$16 sps:$4 sm:$0xff]   ;;  %v1982_v26 = vld [vmem:[%s2261_s28 + $0xcc] ss:$16 sps:$4 sm:$0xff]   ;;  %v1984_v27 = vld [vmem:[%s2261_s28 + $0xc0] ss:$16 sps:$4 sm:$0xff]  }
  0x1f   : > { %v1985_v28 = vld [vmem:[%s2261_s28 + $0xc8] ss:$16 sps:$4 sm:$0xff]   ;;  %v1986_v29 = vld [vmem:[%s2261_s28 + $0xe4] ss:$16 sps:$4 sm:$0xff]   ;;  %v1988_v30 = vld [vmem:[%s2261_s28 + $0xec] ss:$16 sps:$4 sm:$0xff]  }
  0x20   : > { %1045 = vmatpush1.bf16.msra.mxu0 %v1960_v11  ;;  %1127 = vmatpush1.bf16.msra.mxu1 %v1961_v12  ;;  %v1990_v31 = vld [vmem:[%s2261_s28 + $0xe0] ss:$16 sps:$4 sm:$0xff]   ;;  %v1991_v32 = vld [vmem:[%s2261_s28 + $0xe8] ss:$16 sps:$4 sm:$0xff]   ;;  %v1992_v33 = vld [vmem:[%s2261_s28 + $0x104] ss:$16 sps:$4 sm:$0xff]  }
  0x21   : > { %1046 = vmatprep.subr.bf16.mxu0 %v1962_v13  ;;  %1128 = vmatprep.subr.bf16.mxu1 %v1964_v14  ;;  %v1994_v34 = vld [vmem:[%s2261_s28 + $0x10c] ss:$16 sps:$4 sm:$0xff]   ;;  %v1996_v35 = vld [vmem:[%s2261_s28 + $0x100] ss:$16 sps:$4 sm:$0xff]   ;;  %v1997_v36 = vld [vmem:[%s2261_s28 + $0x108] ss:$16 sps:$4 sm:$0xff]  }
  0x22   : > { %v1998_v37 = vld [vmem:[%s2261_s28 + $0x124] ss:$16 sps:$4 sm:$0xff]   ;;  %v2000_v38 = vld [vmem:[%s2261_s28 + $0x12c] ss:$16 sps:$4 sm:$0xff]   ;;  %v2207_v39 = vmov 1966171168  }
  0x23   : > { %v381_v40 = vunpack.c.l.s4 %v2207_v39  ;;  %v2002_v42 = vld [vmem:[%s2261_s28 + $0x120] ss:$16 sps:$4 sm:$0xff]   ;;  %v2003_v43 = vld [vmem:[%s2261_s28 + $0x128] ss:$16 sps:$4 sm:$0xff]   ;;  %v2004_v44 = vld [vmem:[%s2261_s28 + $0x144] ss:$16 sps:$4 sm:$0xff]  }
  0x24   : > { %1047 = vmatpush1.bf16.msra.mxu0 %v1966_v15  ;;  %1129 = vmatpush1.bf16.msra.mxu1 %v1967_v16  ;;  %v2006_v45 = vld [vmem:[%s2261_s28 + $0x14c] ss:$16 sps:$4 sm:$0xff]   ;;  %v2306_v47 = vshrl.u32 %v383_v41, 7  ;;  %v2008_v48 = vld [vmem:[%s2261_s28 + $0x140] ss:$16 sps:$4 sm:$0xff]   ;;  %p1835_p6 = scmp.ne.s32.totalorder %s2246_s19, 7 }
  0x25   : > { %1048 = vmatprep.subr.bf16.mxu0 %v1968_v17  ;;  %1130 = vmatprep.subr.bf16.mxu1 %v1970_v18  ;;  %v382_v46 = vunpack.c.0.s8 %v381_v40  ;;  %v2009_v49 = vld [vmem:[%s2261_s28 + $0x148] ss:$16 sps:$4 sm:$0xff]   ;;  %v2010_v50 = vld [vmem:[%s2261_s28 + $0x164] ss:$16 sps:$4 sm:$0xff]   ;;  %v2012_v51 = vld [vmem:[%s2261_s28 + $0x16c] ss:$16 sps:$4 sm:$0xff]  }
  0x26   : > { %v1706_v53 = vld.sshfl [vmem:[%s226_s24] sm:$0x33 pattern:$0x75316420]  ;;  %v2015_v55 = vld [vmem:[%s2261_s28 + $0x168] ss:$16 sps:$4 sm:$0xff]  }
  0x27   : > { %v385_v52 = vsub.s32 %v382_v46, %v2306_v47  ;;  %v2014_v54 = vld [vmem:[%s2261_s28 + $0x160] ss:$16 sps:$4 sm:$0xff]   ;;  %v379_v56 = vcombine.high %v1706_v53, %v1706_v53  ;;  %v2016_v57 = vld [vmem:[%s2261_s28 + $0x184] ss:$16 sps:$4 sm:$0xff]   ;;  %v2018_v58 = vld [vmem:[%s2261_s28 + $0x18c] ss:$16 sps:$4 sm:$0xff]  }
  0x28   : > { %1049 = vmatpush1.bf16.msra.mxu0 %v1972_v19  ;;  %1131 = vmatpush1.bf16.msra.mxu1 %v1973_v20  ;;  %v2020_v60 = vld [vmem:[%s2261_s28 + $0x180] ss:$16 sps:$4 sm:$0xff]   ;;  %v2021_v61 = vld [vmem:[%s2261_s28 + $0x188] ss:$16 sps:$4 sm:$0xff]   ;;  %v2022_v62 = vld [vmem:[%s2261_s28 + $0x1a4] ss:$16 sps:$4 sm:$0xff]  }
  0x29   : > { %1050 = vmatprep.subr.bf16.mxu0 %v1974_v21  ;;  %1132 = vmatprep.subr.bf16.mxu1 %v1976_v22  ;;  %v393_v59 = vrot.slane %v379_v56, %v385_v52  ;;  %v2024_v63 = vld [vmem:[%s2261_s28 + $0x1ac] ss:$16 sps:$4 sm:$0xff]   ;;  %v2026_v0 = vld [vmem:[%s2261_s28 + $0x1a0] ss:$16 sps:$4 sm:$0xff]   ;;  %v2027_v1 = vld [vmem:[%s2261_s28 + $0x1a8] ss:$16 sps:$4 sm:$0xff]   ;;  %v2339_v13 = vrot.slane %v1706_v53, %v385_v52 }
  0x2a   : > { %v2028_v2 = vld [vmem:[%s2261_s28 + $0x1c4] ss:$16 sps:$4 sm:$0xff]   ;;  %v2030_v3 = vld [vmem:[%s2261_s28 + $0x1cc] ss:$16 sps:$4 sm:$0xff]   ;;  %v2032_v4 = vld [vmem:[%s2261_s28 + $0x1c0] ss:$16 sps:$4 sm:$0xff]  }
  0x2b   : > { %1072 = vmatprep.mubr.bf16.mxu0 %v393_v59  ;;  %1154 = vmatprep.mubr.bf16.mxu1 %v393_v59  ;;  %v2033_v5 = vld [vmem:[%s2261_s28 + $0x1c8] ss:$16 sps:$4 sm:$0xff]   ;;  %v2034_v6 = vld [vmem:[%s2261_s28 + $0x1e4] ss:$16 sps:$4 sm:$0xff]   ;;  %v2036_v7 = vld [vmem:[%s2261_s28 + $0x1ec] ss:$16 sps:$4 sm:$0xff]   ;;  %v395_v17 = vcombine.high %v393_v59, %v393_v59 }
  0x2c   : > { %1051 = vmatpush1.bf16.msra.mxu0 %v1978_v23  ;;  %1133 = vmatpush1.bf16.msra.mxu1 %v1979_v24  ;;  %v2038_v8 = vld [vmem:[%s2261_s28 + $0x1e0] ss:$16 sps:$4 sm:$0xff]   ;;  %v2039_v9 = vld [vmem:[%s2261_s28 + $0x1e8] ss:$16 sps:$4 sm:$0xff]   ;;  %v2042_v10 = vld [vmem:[%s2261_s28 + $0x204] ss:$16 sps:$4 sm:$0xff]  }
  0x2d   : > { %1052 = vmatprep.subr.bf16.mxu0 %v1980_v25  ;;  %1134 = vmatprep.subr.bf16.mxu1 %v1982_v26  ;;  %v2045_v11 = vld [vmem:[%s2261_s28 + $0x20c] ss:$16 sps:$4 sm:$0xff]   ;;  %v2040_v12 = vld [vmem:[%s2261_s28 + $0x200] ss:$16 sps:$4 sm:$0xff]   ;;  %v2043_v14 = vld [vmem:[%s2261_s28 + $0x208] ss:$16 sps:$4 sm:$0xff]  }
  0x2e   : > { %v2048_v15 = vld [vmem:[%s2261_s28 + $0x224] ss:$16 sps:$4 sm:$0xff]   ;;  %v2051_v16 = vld [vmem:[%s2261_s28 + $0x22c] ss:$16 sps:$4 sm:$0xff]   ;;  %v2046_v18 = vld [vmem:[%s2261_s28 + $0x220] ss:$16 sps:$4 sm:$0xff]  }
  0x2f   : > { %v2049_v19 = vld [vmem:[%s2261_s28 + $0x228] ss:$16 sps:$4 sm:$0xff]   ;;  %v2054_v20 = vld [vmem:[%s2261_s28 + $0x244] ss:$16 sps:$4 sm:$0xff]   ;;  %v2057_v21 = vld [vmem:[%s2261_s28 + $0x24c] ss:$16 sps:$4 sm:$0xff]  }
  0x30   : > { %1053 = vmatpush1.bf16.msra.mxu0 %v1984_v27  ;;  %1135 = vmatpush1.bf16.msra.mxu1 %v1985_v28  ;;  %v2052_v22 = vld [vmem:[%s2261_s28 + $0x240] ss:$16 sps:$4 sm:$0xff]   ;;  %v2055_v23 = vld [vmem:[%s2261_s28 + $0x248] ss:$16 sps:$4 sm:$0xff]   ;;  %v2060_v24 = vld [vmem:[%s2261_s28 + $0x264] ss:$16 sps:$4 sm:$0xff]  }
  0x31   : > { %1054 = vmatprep.subr.bf16.mxu0 %v1986_v29  ;;  %1136 = vmatprep.subr.bf16.mxu1 %v1988_v30  ;;  %v2063_v25 = vld [vmem:[%s2261_s28 + $0x26c] ss:$16 sps:$4 sm:$0xff]   ;;  %v2058_v26 = vld [vmem:[%s2261_s28 + $0x260] ss:$16 sps:$4 sm:$0xff]   ;;  %v2061_v27 = vld [vmem:[%s2261_s28 + $0x268] ss:$16 sps:$4 sm:$0xff]  }
  0x32   : > { %v2066_v28 = vld [vmem:[%s2261_s28 + $0x284] ss:$16 sps:$4 sm:$0xff]   ;;  %v2069_v29 = vld [vmem:[%s2261_s28 + $0x28c] ss:$16 sps:$4 sm:$0xff]   ;;  %v2064_v30 = vld [vmem:[%s2261_s28 + $0x280] ss:$16 sps:$4 sm:$0xff]  }
  0x33   : > { %v2079_v39 = vld [vmem:[%s2261_s28 + $0x2c8] ss:$16 sps:$4 sm:$0xff]   ;;  %v2084_v40 = vld [vmem:[%s2261_s28 + $0x2e4] ss:$16 sps:$4 sm:$0xff]   ;;  %v2087_v41 = vld [vmem:[%s2261_s28 + $0x2ec] ss:$16 sps:$4 sm:$0xff]  }
  0x34   : > { %1055 = vmatpush1.bf16.msra.mxu0 %v1990_v31  ;;  %1137 = vmatpush1.bf16.msra.mxu1 %v1991_v32  ;;  %v2067_v31 = vld [vmem:[%s2261_s28 + $0x288] ss:$16 sps:$4 sm:$0xff]   ;;  %v2072_v32 = vld [vmem:[%s2261_s28 + $0x2a4] ss:$16 sps:$4 sm:$0xff]   ;;  %v2088_v46 = vld [vmem:[%s2261_s28 + $0x300] ss:$16 sps:$4 sm:$0xff]  }
  0x35   : > { %1056 = vmatprep.subr.bf16.mxu0 %v1992_v33  ;;  %1138 = vmatprep.subr.bf16.mxu1 %v1994_v34  ;;  %v2075_v33 = vld [vmem:[%s2261_s28 + $0x2ac] ss:$16 sps:$4 sm:$0xff]   ;;  %v2070_v34 = vld [vmem:[%s2261_s28 + $0x2a0] ss:$16 sps:$4 sm:$0xff]   ;;  %v2097_v52 = vld [vmem:[%s2261_s28 + $0x328] ss:$16 sps:$4 sm:$0xff]  }
  0x36   : > { %v2102_v53 = vld [vmem:[%s2261_s28 + $0x344] ss:$16 sps:$4 sm:$0xff]   ;;  %v2103_v56 = vld [vmem:[%s2261_s28 + $0x348] ss:$16 sps:$4 sm:$0xff]   ;;  %v2106_v59 = vld [vmem:[%s2261_s28 + $0x360] ss:$16 sps:$4 sm:$0xff]  }
  0x37   : > { %vm1640_vm0 = vcmask (!%p1835_p6), 25600  }
  0x38   : > { %1057 = vmatpush1.bf16.msra.mxu0 %v1996_v35  ;;  %1139 = vmatpush1.bf16.msra.mxu1 %v1997_v36  ;;  %v2073_v35 = vld [vmem:[%s2261_s28 + $0x2a8] ss:$16 sps:$4 sm:$0xff]   ;;  %v2078_v36 = vld [vmem:[%s2261_s28 + $0x2c4] ss:$16 sps:$4 sm:$0xff]  }
  0x39   : > { %1058 = vmatprep.subr.bf16.mxu0 %v1998_v37  ;;  %1140 = vmatprep.subr.bf16.mxu1 %v2000_v38  ;;  %v2081_v37 = vld [vmem:[%s2261_s28 + $0x2cc] ss:$16 sps:$4 sm:$0xff]   ;;  %v2076_v38 = vld [vmem:[%s2261_s28 + $0x2c0] ss:$16 sps:$4 sm:$0xff]  }
  0x3c   : > { %1059 = vmatpush1.bf16.msra.mxu0 %v2002_v42  ;;  %1141 = vmatpush1.bf16.msra.mxu1 %v2003_v43  ;;  %v2082_v42 = vld [vmem:[%s2261_s28 + $0x2e0] ss:$16 sps:$4 sm:$0xff]   ;;  %v2085_v43 = vld [vmem:[%s2261_s28 + $0x2e8] ss:$16 sps:$4 sm:$0xff]  }
  0x3d   : > { %1060 = vmatprep.subr.bf16.mxu0 %v2004_v44  ;;  %1142 = vmatprep.subr.bf16.mxu1 %v2006_v45  ;;  %v2090_v44 = vld [vmem:[%s2261_s28 + $0x304] ss:$16 sps:$4 sm:$0xff]   ;;  %v2093_v45 = vld [vmem:[%s2261_s28 + $0x30c] ss:$16 sps:$4 sm:$0xff]  }
  0x40   : > { %1061 = vmatpush1.bf16.msra.mxu0 %v2008_v48  ;;  %1143 = vmatpush1.bf16.msra.mxu1 %v2009_v49  ;;  %v2091_v48 = vld [vmem:[%s2261_s28 + $0x308] ss:$16 sps:$4 sm:$0xff]   ;;  %v2096_v49 = vld [vmem:[%s2261_s28 + $0x324] ss:$16 sps:$4 sm:$0xff]  }
  0x41   : > { %1062 = vmatprep.subr.bf16.mxu0 %v2010_v50  ;;  %1144 = vmatprep.subr.bf16.mxu1 %v2012_v51  ;;  %v2099_v50 = vld [vmem:[%s2261_s28 + $0x32c] ss:$16 sps:$4 sm:$0xff]   ;;  %v2094_v51 = vld [vmem:[%s2261_s28 + $0x320] ss:$16 sps:$4 sm:$0xff]  }
  0x44   : > { %1063 = vmatpush1.bf16.msra.mxu0 %v2014_v54  ;;  %1145 = vmatpush1.bf16.msra.mxu1 %v2015_v55  ;;  %v2105_v54 = vld [vmem:[%s2261_s28 + $0x34c] ss:$16 sps:$4 sm:$0xff]   ;;  %v2100_v55 = vld [vmem:[%s2261_s28 + $0x340] ss:$16 sps:$4 sm:$0xff]  }
  0x45   : > { %1064 = vmatprep.subr.bf16.mxu0 %v2016_v57  ;;  %1146 = vmatprep.subr.bf16.mxu1 %v2018_v58  ;;  %v2108_v57 = vld [vmem:[%s2261_s28 + $0x364] ss:$16 sps:$4 sm:$0xff]   ;;  %v2111_v58 = vld [vmem:[%s2261_s28 + $0x36c] ss:$16 sps:$4 sm:$0xff]  }
  0x48   : > { %1065 = vmatpush1.bf16.msra.mxu0 %v2020_v60  ;;  %1147 = vmatpush1.bf16.msra.mxu1 %v2021_v61  ;;  %v2109_v60 = vld [vmem:[%s2261_s28 + $0x368] ss:$16 sps:$4 sm:$0xff]   ;;  %v2114_v61 = vld [vmem:[%s2261_s28 + $0x384] ss:$16 sps:$4 sm:$0xff]  }
  0x49   : > { %1066 = vmatprep.subr.bf16.mxu0 %v2022_v62  ;;  %1148 = vmatprep.subr.bf16.mxu1 %v2024_v63  ;;  %v2117_v62 = vld [vmem:[%s2261_s28 + $0x38c] ss:$16 sps:$4 sm:$0xff]   ;;  %v2112_v63 = vld [vmem:[%s2261_s28 + $0x380] ss:$16 sps:$4 sm:$0xff]  }
  0x4c   : > { %1067 = vmatpush1.bf16.msra.mxu0 %v2026_v0  ;;  %1149 = vmatpush1.bf16.msra.mxu1 %v2027_v1  ;;  %v2115_v0 = vld [vmem:[%s2261_s28 + $0x388] ss:$16 sps:$4 sm:$0xff]   ;;  %v2120_v1 = vld [vmem:[%s2261_s28 + $0x3a4] ss:$16 sps:$4 sm:$0xff]  }
  0x4d   : > { %1068 = vmatprep.subr.bf16.mxu0 %v2028_v2  ;;  %1150 = vmatprep.subr.bf16.mxu1 %v2030_v3  ;;  %v2123_v2 = vld [vmem:[%s2261_s28 + $0x3ac] ss:$16 sps:$4 sm:$0xff]   ;;  %v2118_v3 = vld [vmem:[%s2261_s28 + $0x3a0] ss:$16 sps:$4 sm:$0xff]  }
  0x50   : > { %1069 = vmatpush1.bf16.msra.mxu0 %v2032_v4  ;;  %1151 = vmatpush1.bf16.msra.mxu1 %v2033_v5  ;;  %v2121_v4 = vld [vmem:[%s2261_s28 + $0x3a8] ss:$16 sps:$4 sm:$0xff]   ;;  %v2126_v5 = vld [vmem:[%s2261_s28 + $0x3c4] ss:$16 sps:$4 sm:$0xff]  }
  0x51   : > { %1070 = vmatprep.subr.bf16.mxu0 %v2034_v6  ;;  %1152 = vmatprep.subr.bf16.mxu1 %v2036_v7  ;;  %v2129_v6 = vld [vmem:[%s2261_s28 + $0x3cc] ss:$16 sps:$4 sm:$0xff]   ;;  %v2124_v7 = vld [vmem:[%s2261_s28 + $0x3c0] ss:$16 sps:$4 sm:$0xff]  }
  0x54   : > { %1071 = vmatpush1.bf16.msra.mxu0 %v2038_v8  ;;  %1153 = vmatpush1.bf16.msra.mxu1 %v2039_v9  ;;  %v2127_v8 = vld [vmem:[%s2261_s28 + $0x3c8] ss:$16 sps:$4 sm:$0xff]   ;;  %v2132_v9 = vld [vmem:[%s2261_s28 + $0x3e4] ss:$16 sps:$4 sm:$0xff]  }
  0x55   : > { %1081 = vmatprep.subr.bf16.mxu0 %v2042_v10  ;;  %1163 = vmatprep.subr.bf16.mxu1 %v2045_v11  ;;  %v2135_v10 = vld [vmem:[%s2261_s28 + $0x3ec] ss:$16 sps:$4 sm:$0xff]   ;;  %v2130_v11 = vld [vmem:[%s2261_s28 + $0x3e0] ss:$16 sps:$4 sm:$0xff]  }
  0x57   : > { %1073 = vmatmul.mubr.bf16.vlgmr.msra.gmra.mrb[0].mxu0 %v2339_v13  ;;  %1155 = vmatmul.mubr.bf16.vlgmr.msra.gmra.mrb[0].mxu1 %v2339_v13 }
  0x58   : > { %1082 = vmatpush1.bf16.msra.mxu0 %v2040_v12  ;;  %1164 = vmatpush1.bf16.msra.mxu1 %v2043_v14  ;;  %v2133_v12 = vld [vmem:[%s2261_s28 + $0x3e8] ss:$16 sps:$4 sm:$0xff]   ;;  %v394_v14 = vcombine.high %v2339_v13, %v2339_v13 }
  0x59   : > { %1083 = vmatprep.subr.bf16.mxu0 %v2048_v15  ;;  %1165 = vmatprep.subr.bf16.mxu1 %v2051_v16  ;;  %v2208_v15 = vmov 1983009808  }
  0x5a   : > { %1113 = vmatprep.mubr.bf16.mxu0 %v395_v17  ;;  %1195 = vmatprep.mubr.bf16.mxu1 %v395_v17  ;;  %v1211_v16 = vunpack.c.l.s4 %v2208_v15 }
  0x5c   : > { %1084 = vmatpush1.bf16.msra.mxu0 %v2046_v18  ;;  %1166 = vmatpush1.bf16.msra.mxu1 %v2049_v19  ;;  %v1212_v17 = vunpack.c.0.s8 %v1211_v16 }
  0x5d   : > { %1085 = vmatprep.subr.bf16.mxu0 %v2054_v20  ;;  %1167 = vmatprep.subr.bf16.mxu1 %v2057_v21 }
  0x5e   : > { %v2407_v20 = vsub.s32 %v1212_v17, %v2306_v47 }
  0x60   : > { %1086 = vmatpush1.bf16.msra.mxu0 %v2052_v22  ;;  %1168 = vmatpush1.bf16.msra.mxu1 %v2055_v23 }
  0x61   : > { %1087 = vmatprep.subr.bf16.mxu0 %v2060_v24  ;;  %1169 = vmatprep.subr.bf16.mxu1 %v2063_v25 }
  0x64   : > { %1088 = vmatpush1.bf16.msra.mxu0 %v2058_v26  ;;  %1170 = vmatpush1.bf16.msra.mxu1 %v2061_v27 }
  0x65   : > { %1089 = vmatprep.subr.bf16.mxu0 %v2066_v28  ;;  %1171 = vmatprep.subr.bf16.mxu1 %v2069_v29 }
  0x68   : > { %1090 = vmatpush1.bf16.msra.mxu0 %v2064_v30  ;;  %1172 = vmatpush1.bf16.msra.mxu1 %v2067_v31  ;;  %v241_v30 = vld [vmem:[#allocation2] sm:$0xff] }
  0x69   : > { %1091 = vmatprep.subr.bf16.mxu0 %v2072_v32  ;;  %1173 = vmatprep.subr.bf16.mxu1 %v2075_v33  ;;  %v2136_v33 = vld [vmem:[%s2551_s3 + $0x40] sm:$0xff] (!%p1835_p6)  }
  0x6c   : > { %1092 = vmatpush1.bf16.msra.mxu0 %v2070_v34  ;;  %1174 = vmatpush1.bf16.msra.mxu1 %v2073_v35  ;;  %v2137_v34 = vld [vmem:[%s2551_s3 + $0xc0] sm:$0xff] (!%p1835_p6)  }
  0x6d   : > { %1093 = vmatprep.subr.bf16.mxu0 %v2078_v36  ;;  %1175 = vmatprep.subr.bf16.mxu1 %v2081_v37  ;;  %v2138_v35 = vld [vmem:[%s2551_s3] sm:$0xff] (!%p1835_p6)   ;;  %v2140_v37 = vld [vmem:[%s2551_s3 + $0x48] sm:$0xff] (!%p1835_p6)  }
  0x6e   : > { %v2139_v36 = vld [vmem:[%s2551_s3 + $0x80] sm:$0xff] (!%p1835_p6)  }
  0x70   : > { %1094 = vmatpush1.bf16.msra.mxu0 %v2076_v38  ;;  %1176 = vmatpush1.bf16.msra.mxu1 %v2079_v39  ;;  %v2141_v38 = vld [vmem:[%s2551_s3 + $0xc8] sm:$0xff] (!%p1835_p6)  }
  0x71   : > { %1095 = vmatprep.subr.bf16.mxu0 %v2084_v40  ;;  %1177 = vmatprep.subr.bf16.mxu1 %v2087_v41  ;;  %v2142_v39 = vld [vmem:[%s2551_s3 + $0x8] sm:$0xff] (!%p1835_p6)   ;;  %v2144_v41 = vld [vmem:[%s2551_s3 + $0x50] sm:$0xff] (!%p1835_p6)  }
  0x72   : > { %v2143_v40 = vld [vmem:[%s2551_s3 + $0x88] sm:$0xff] (!%p1835_p6)  }
  0x74   : > { %1096 = vmatpush1.bf16.msra.mxu0 %v2082_v42  ;;  %1178 = vmatpush1.bf16.msra.mxu1 %v2085_v43  ;;  %v2145_v42 = vld [vmem:[%s2551_s3 + $0xd0] sm:$0xff] (!%p1835_p6)  }
  0x75   : > { %1097 = vmatprep.subr.bf16.mxu0 %v2090_v44  ;;  %1179 = vmatprep.subr.bf16.mxu1 %v2093_v45  ;;  %v2146_v43 = vld [vmem:[%s2551_s3 + $0x10] sm:$0xff] (!%p1835_p6)   ;;  %v2148_v45 = vld [vmem:[%s2551_s3 + $0x58] sm:$0xff] (!%p1835_p6)  }
  0x76   : > { %v2147_v44 = vld [vmem:[%s2551_s3 + $0x90] sm:$0xff] (!%p1835_p6)  }
  0x78   : > { %1098 = vmatpush1.bf16.msra.mxu0 %v2088_v46  ;;  %1180 = vmatpush1.bf16.msra.mxu1 %v2091_v48  ;;  %v2149_v46 = vld [vmem:[%s2551_s3 + $0xd8] sm:$0xff] (!%p1835_p6)  }
  0x79   : > { %1099 = vmatprep.subr.bf16.mxu0 %v2096_v49  ;;  %1181 = vmatprep.subr.bf16.mxu1 %v2099_v50  ;;  %v2150_v48 = vld [vmem:[%s2551_s3 + $0x18] sm:$0xff] (!%p1835_p6)   ;;  %v2152_v50 = vld [vmem:[%s2551_s3 + $0x60] sm:$0xff] (!%p1835_p6)  }
  0x7a   : > { %v2151_v49 = vld [vmem:[%s2551_s3 + $0x98] sm:$0xff] (!%p1835_p6)  }
  0x7c   : > { %1100 = vmatpush1.bf16.msra.mxu0 %v2094_v51  ;;  %1182 = vmatpush1.bf16.msra.mxu1 %v2097_v52  ;;  %v2153_v51 = vld [vmem:[%s2551_s3 + $0xe0] sm:$0xff] (!%p1835_p6)  }
  0x7d   : > { %1101 = vmatprep.subr.bf16.mxu0 %v2102_v53  ;;  %1183 = vmatprep.subr.bf16.mxu1 %v2105_v54  ;;  %v2154_v52 = vld [vmem:[%s2551_s3 + $0x20] sm:$0xff] (!%p1835_p6)   ;;  %v2156_v54 = vld [vmem:[%s2551_s3 + $0x68] sm:$0xff] (!%p1835_p6)  }
  0x7e   : > { %v2155_v53 = vld [vmem:[%s2551_s3 + $0xa0] sm:$0xff] (!%p1835_p6)  }
  0x80   : > { %1102 = vmatpush1.bf16.msra.mxu0 %v2100_v55  ;;  %1184 = vmatpush1.bf16.msra.mxu1 %v2103_v56  ;;  %v2157_v55 = vld [vmem:[%s2551_s3 + $0xe8] sm:$0xff] (!%p1835_p6)  }
  0x81   : > { %1103 = vmatprep.subr.bf16.mxu0 %v2108_v57  ;;  %1185 = vmatprep.subr.bf16.mxu1 %v2111_v58  ;;  %v2158_v56 = vld [vmem:[%s2551_s3 + $0x28] sm:$0xff] (!%p1835_p6)   ;;  %v2160_v58 = vld [vmem:[%s2551_s3 + $0x70] sm:$0xff] (!%p1835_p6)  }
  0x82   : > { %v2159_v57 = vld [vmem:[%s2551_s3 + $0xa8] sm:$0xff] (!%p1835_p6)  }
  0x84   : > { %1104 = vmatpush1.bf16.msra.mxu0 %v2106_v59  ;;  %1186 = vmatpush1.bf16.msra.mxu1 %v2109_v60  ;;  %v2161_v59 = vld [vmem:[%s2551_s3 + $0xf0] sm:$0xff] (!%p1835_p6)  }
  0x85   : > { %1105 = vmatprep.subr.bf16.mxu0 %v2114_v61  ;;  %1187 = vmatprep.subr.bf16.mxu1 %v2117_v62  ;;  %v2162_v60 = vld [vmem:[%s2551_s3 + $0x30] sm:$0xff] (!%p1835_p6)   ;;  %v1237_v61 = vsub.s32 (!%p1835_p6), 0, %v2306_v47 }
  0x86   : > { %v2163_v62 = vld [vmem:[%s2551_s3 + $0xb0] sm:$0xff] (!%p1835_p6)  }
  0x88   : > { %1106 = vmatpush1.bf16.msra.mxu0 %v2112_v63  ;;  %1188 = vmatpush1.bf16.msra.mxu1 %v2115_v0  ;;  %v1241_v63 = vsub.s32 (!%p1835_p6), 1, %v2306_v47  ;;  %v2164_v0 = vld [vmem:[%s2551_s3 + $0x78] sm:$0xff] (!%p1835_p6)  }
  0x89   : > { %1107 = vmatprep.subr.bf16.mxu0 %v2120_v1  ;;  %1189 = vmatprep.subr.bf16.mxu1 %v2123_v2  ;;  %v1245_v1 = vsub.s32 (!%p1835_p6), 2, %v2306_v47  ;;  %v2165_v2 = vld [vmem:[%s2551_s3 + $0xf8] sm:$0xff] (!%p1835_p6)  }
  0x8c   : > { %1108 = vmatpush1.bf16.msra.mxu0 %v2118_v3  ;;  %1190 = vmatpush1.bf16.msra.mxu1 %v2121_v4  ;;  %v1249_v3 = vsub.s32 (!%p1835_p6), 3, %v2306_v47  ;;  %v2166_v4 = vld [vmem:[%s2551_s3 + $0x38] sm:$0xff] (!%p1835_p6)  }
  0x8d   : > { %1109 = vmatprep.subr.bf16.mxu0 %v2126_v5  ;;  %1191 = vmatprep.subr.bf16.mxu1 %v2129_v6  ;;  %v2167_v5 = vld [vmem:[%s2551_s3 + $0xb8] sm:$0xff] (!%p1835_p6)   ;;  %v1233_v6 = vld [vmem:[%s2550_s2] sm:$0xf] (!%p1835_p6) }
  0x8e   : > { %v1250_v47 = vrot.slane (!%p1835_p6), %v1233_v6, %v1249_v3 }
  0x90   : > { %1110 = vmatpush1.bf16.msra.mxu0 %v2124_v7  ;;  %1192 = vmatpush1.bf16.msra.mxu1 %v2127_v8  ;;  %v1238_v7 = vrot.slane (!%p1835_p6), %v1233_v6, %v1237_v61  ;;  %v1242_v8 = vrot.slane (!%p1835_p6), %v1233_v6, %v1241_v63 }
  0x91   : > { %1111 = vmatprep.subr.bf16.mxu0 %v2132_v9  ;;  %1193 = vmatprep.subr.bf16.mxu1 %v2135_v10  ;;  %v1246_v9 = vrot.slane (!%p1835_p6), %v1233_v6, %v1245_v1 }
  0x92   : > { %v1251_v10 = vcombine.low (!%p1835_p6), %v1238_v7, %v1242_v8 }
  0x94   : > { %1112 = vmatpush1.bf16.msra.mxu0 %v2130_v11  ;;  %1194 = vmatpush1.bf16.msra.mxu1 %v2133_v12  ;;  %v1252_v11 = vcombine.low (!%p1835_p6), %v1246_v9, %v1250_v47  ;;  %v1259_v12 = vrot.slane (!%p1835_p6), %v1251_v10, %v2407_v20 }
  0x95   : > { %1874 = vmatprep.subr.bf16.mxu0 (!%p1835_p6), %v2136_v33  ;;  %1896 = vmatprep.subr.bf16.mxu1 (!%p1835_p6), %v2137_v34 }
  0x97   : > { %1114 = vmatmul.mubr.bf16.vlgmr.msra.gmra.mrb[0].mxu0 %v394_v14  ;;  %1196 = vmatmul.mubr.bf16.vlgmr.msra.gmra.mrb[0].mxu1 %v394_v14  ;;  %v1266_v14 = vrot.slane (!%p1835_p6), %v1252_v11, %v2407_v20 }
  0x98   : > { %1875 = vmatpush3.bf16.msra.mxu0 (!%p1835_p6), %v2138_v35  ;;  %1897 = vmatpush3.bf16.msra.mxu1 (!%p1835_p6), %v2139_v36 }
  0x99   : > { %1876 = vmatprep.subr.bf16.mxu0 (!%p1835_p6), %v2140_v37  ;;  %1898 = vmatprep.subr.bf16.mxu1 (!%p1835_p6), %v2141_v38  ;;  %v1267_v16 = vcombine.low (!%p1835_p6), %v1259_v12, %v1266_v14 }
  0x9c   : > { %1877 = vmatpush3.bf16.msra.mxu0 (!%p1835_p6), %v2142_v39  ;;  %1899 = vmatpush3.bf16.msra.mxu1 (!%p1835_p6), %v2143_v40 }
  0x9d   : > { %1878 = vmatprep.subr.bf16.mxu0 (!%p1835_p6), %v2144_v41  ;;  %1900 = vmatprep.subr.bf16.mxu1 (!%p1835_p6), %v2145_v42 }
  0xa0   : > { %1879 = vmatpush3.bf16.msra.mxu0 (!%p1835_p6), %v2146_v43  ;;  %1901 = vmatpush3.bf16.msra.mxu1 (!%p1835_p6), %v2147_v44 }
  0xa1   : > { %1880 = vmatprep.subr.bf16.mxu0 (!%p1835_p6), %v2148_v45  ;;  %1902 = vmatprep.subr.bf16.mxu1 (!%p1835_p6), %v2149_v46 }
  0xa4   : > { %1881 = vmatpush3.bf16.msra.mxu0 (!%p1835_p6), %v2150_v48  ;;  %1903 = vmatpush3.bf16.msra.mxu1 (!%p1835_p6), %v2151_v49 }
  0xa5   : > { %1882 = vmatprep.subr.bf16.mxu0 (!%p1835_p6), %v2152_v50  ;;  %1904 = vmatprep.subr.bf16.mxu1 (!%p1835_p6), %v2153_v51 }
  0xa8   : > { %1883 = vmatpush3.bf16.msra.mxu0 (!%p1835_p6), %v2154_v52  ;;  %1905 = vmatpush3.bf16.msra.mxu1 (!%p1835_p6), %v2155_v53 }
  0xa9   : > { %1884 = vmatprep.subr.bf16.mxu0 (!%p1835_p6), %v2156_v54  ;;  %1906 = vmatprep.subr.bf16.mxu1 (!%p1835_p6), %v2157_v55 }
  0xac   : > { %1885 = vmatpush3.bf16.msra.mxu0 (!%p1835_p6), %v2158_v56  ;;  %1907 = vmatpush3.bf16.msra.mxu1 (!%p1835_p6), %v2159_v57 }
  0xad   : > { %1886 = vmatprep.subr.bf16.mxu0 (!%p1835_p6), %v2160_v58  ;;  %1908 = vmatprep.subr.bf16.mxu1 (!%p1835_p6), %v2161_v59 }
  0xb0   : > { %1887 = vmatpush3.bf16.msra.mxu0 (!%p1835_p6), %v2162_v60  ;;  %1909 = vmatpush3.bf16.msra.mxu1 (!%p1835_p6), %v2163_v62 }
  0xb1   : > { %1888 = vmatprep.subr.bf16.mxu0 (!%p1835_p6), %v2164_v0  ;;  %1910 = vmatprep.subr.bf16.mxu1 (!%p1835_p6), %v2165_v2 }
  0xb4   : > { %1889 = vmatpush3.bf16.msra.mxu0 (!%p1835_p6), %v2166_v4  ;;  %1911 = vmatpush3.bf16.msra.mxu1 (!%p1835_p6), %v2167_v5 }
 0x16a   : > { %v1115_v18 = vpop.f32.mrb[0].mxu0  ;;  %v1197_v19 = vpop.f32.mrb[0].mxu1 }
 0x16b   : > { %v1117_v21 = vpop.f32.mrb[1].mxu0  ;;  %v1199_v22 = vpop.f32.mrb[1].mxu1 }
 0x16c   : > { %v1208_v23 = vcombine.low %v1115_v18, %v1117_v21  ;;  %v1209_v24 = vcombine.low %v1197_v19, %v1199_v22  ;;  %v1119_v25 = vpop.f32.mrb[2].mxu0  ;;  %v1201_v26 = vpop.f32.mrb[2].mxu1 }
 0x16d   : > { %v1120_v27 = vpop.f32.mrb[3].mxu0  ;;  %v1202_v13 = vpop.f32.mrb[3].mxu1 }
 0x16e   : > { %v1216_v28 = vrot.slane %v1208_v23, %v2407_v20  ;;  %v1223_v29 = vrot.slane %v1209_v24, %v2407_v20  ;;  %1231 = sbr.rel (%p1835_p6) target bundleno = 611 (0x263), region = 48 }
 0x170   : > { %v1224_v31 = vcombine.low %v1216_v28, %v1223_v29  ;;  %v1836_v29 = vld [vmem:[%s2552_s4] ss:$0 sm:$0xff] (!%p1835_p6) }
 0x172   : > { %v1226_v32 = vadd.f32 %v1224_v31, %v241_v30 }
 0x174   : > { %1227 = vst [vmem:[#allocation2] sm:$0xff] %v1226_v32 }
 0x17b   : > { %v1232_v15 = vld [vmem:[#allocation2] sm:$0xff] }
 0x17c   : > { %v1269_v17 = vadd.f32 %v1267_v16, %v1232_v15 }
 0x17e   : > { %v1270_v18 = vmax.f32 %v1269_v17, 0.0 }
 0x180   : > { %v1279_v19 = vrot.slane %v1270_v18, %v2407_v20  ;;  %v1272_v21 = vcombine.high %v1270_v18, %v1270_v18 }
 0x182   : > { %v1287_v22 = vcombine.high %v1279_v19, %v1279_v19  ;;  %v1286_v23 = vrot.slane %v1272_v21, %v2407_v20  ;;  %v1293_v24 = vpack.c.bf16 %v1279_v19, %v1279_v19 }
 0x184   : > { %v1294_v25 = vpack.c.bf16 %v1287_v22, %v1287_v22  ;;  %v1288_v26 = vcombine.high %v1286_v23, %v1286_v23  ;;  %v1295_v27 = vpack.c.bf16 %v1286_v23, %v1286_v23 }
 0x186   : > { %1592 = vmatprep.mubr.bf16.mxu0 %v1294_v25  ;;  %v1296_v13 = vpack.c.bf16 %v1288_v26, %v1288_v26 }
 0x187   : > { %1593 = vmatmul.mubr.bf16.vlgmr.msra.gmra.mrb[0].mxu0 %v1293_v24 }
 0x188   : > { %1632 = vmatprep.mubr.bf16.mxu1 %v1296_v13 }
 0x189   : > { %1633 = vmatmul.mubr.bf16.vlgmr.msra.gmra.mrb[0].mxu1 %v1295_v27 }
 0x25a   : > { %v1890_v28 = vpop.f32.mrb[0].mxu0 }
 0x25b   : > { %v1891_v30 = vpop.f32.mrb[1].mxu0 }
 0x25c   : > { %v1912_v31 = vpop.f32.mrb[0].mxu1  ;;  %v1892_v32 = vadd.f32 %v1891_v30, %v1890_v28  ;;  %v1893_v33 = vpop.f32.mrb[2].mxu0 }
 0x25d   : > { %v1913_v34 = vpop.f32.mrb[1].mxu1  ;;  %v1894_v20 = vpop.f32.mrb[3].mxu0 }
 0x25e   : > { %v1595_v35 = vadd.f32 %v1892_v32, %v1836_v29  ;;  %v1914_v36 = vadd.f32 %v1913_v34, %v1912_v31  ;;  %v1915_v37 = vpop.f32.mrb[2].mxu1 }
 0x25f   : > { %v1916_v38 = vpop.f32.mrb[3].mxu1 }
 0x260   : > { %v1635_v39 = vadd.f32 %v1914_v36, %v1595_v35 }
 0x262   : > { %1641 = vst.msk [vmem:[#allocation3] sm:$0x3] %vm1640_vm0, %v1635_v39 }
 0x263 PF: > { %p1930_p7 = scmp.eq.s32.totalorder %s2246_s19, 7  ;;  %s2209_s30 = smov [#allocation3]  }
 0x264   : > { %s1649_s6 = sshll.u32 %s2209_s30, 4  ;;  %s1650_s6 = int_to_ptr.vmem [resolvable:$true] %s1649_s6 }
 0x265   : > { %s2168_s7 = scalar_lea.vmem %s1650_s6, 32  ;;  %p2175_p11 = scmp.lt.s32.totalorder %s1650_s6, %s1650_s6 }
 0x266   : > { %p2169_p8 = scmp.ne.s32.totalorder %s1650_s6, %s2168_s7  ;;  %p2176_p12 = scmp.lt.s32.totalorder %s2168_s7, %s2168_s7 }
 0x268   : > { %p2170_p9 = pnand %p2169_p8, %p1930_p7  ;;  %p2177_p13 = por %p2176_p12, %p2175_p11 }
 0x26a   : > { %p2171_p10 = pneg %p2170_p9 }
 0x26c   : > { %p2178_p0 = pnand %p2177_p13, %p2171_p10 }
 0x26e   : > { %2181 = shalt.err (!%p2178_p0)
}
 0x26f   : > { %s2182_s10 = scalar_lea.hbm %s2553_s5, 32 }
 0x270   : > { %p2183_p1 = scmp.ne.s32.totalorder %s2553_s5, %s2182_s10  ;;  %p2188_p4 = scmp.lt.u32.totalorder %s2182_s10, %s2553_s5 }
 0x272   : > { %p2184_p2 = pnand %p2183_p1, %p1930_p7 }
 0x274   : > { %p2185_p3 = pneg %p2184_p2 }
 0x276   : > { %p2190_p5 = pnand %p2188_p4, %p2185_p3 }
 0x278   : > { %2193 = shalt.err (!%p2190_p5)
}
 0x279   : > { %1927 = dma.vmem_to_hbm [thread:$0]  (%p1930_p7), %s1650_s6, 32, %s2553_s5, [#allocation4]  }
 0x27a   : > { %2199 = dma.done.wait (%p1930_p7), [#allocation4], 32  }
 0x27b   : > { %2201 = vsyncadd (%p1930_p7), [#allocation4], 4294967264 }
 0x27c PF: > { %s16_s18 = sadd.s32 1, %s2204_s18  }
 0x27d   : > { %p13_p6 = scmp.ge.s32.totalorder %s16_s18, 10  }
 0x27f   :  { %15 = sbr.rel (!%p13_p6) target bundleno = 1 (0x1), region = 78 }
 0x286   :  { %1662 = vsyncpa [#allocation4], 1 }
 0x287   :  { %1664 = vsyncpa [#allocation4 + $0x1], 1 }

</bundles_post_ra>
